<compile_context>
chip_gen: v5e
topology: v5e:2x2
jax: 0.10.0
libtpu: 0.0.40
codegen_flags: <defaults>
</compile_context>

<pallas_src>
import functools

import jax
import jax.numpy as jnp
from jax.experimental import pallas as pl
from jax.experimental.pallas import tpu as pltpu

# ---------- small synthetic, lane-aligned config (original ViT-DeiT-base) ----------
EMBED_DIM = 128           # original: 768  (128 keeps matmuls / stores lane-dense)
NUM_HEADS = 4             # original: 12
HEAD_DIM = EMBED_DIM // NUM_HEADS
DEPTH = 2                 # original: 12 blocks
MLP_DIM = 4 * EMBED_DIM   # mlp_ratio = 4
PATCH = 16
FSTRIDE = 10
TSTRIDE = 10
LN_EPS = 1e-6             # timm ViT LayerNorm eps


# ------------------------------ in-kernel helpers ------------------------------
def _layernorm(x, g, b):
    mu = jnp.mean(x, axis=-1, keepdims=True)
    var = jnp.mean(jnp.square(x - mu), axis=-1, keepdims=True)
    return (x - mu) * jax.lax.rsqrt(var + LN_EPS) * g + b


# --------------------------------- fused kernel --------------------------------
def encoder_kernel(patches_ref, projw_ref, posb_ref,
                   ln1g_ref, ln1b_ref, wqkv_ref, bqkv_ref, wproj_ref, bproj_ref,
                   ln2g_ref, ln2b_ref, wfc1_ref, bfc1_ref, wfc2_ref, bfc2_ref,
                   normg_ref, normb_ref,
                   o_ref, x_scr, *, batch, seq, num_heads):
    """Grid = (depth,).  One transformer block per depth step.  The whole batch
    is in the block: activation (B*P, D) lives in x_scr (VMEM, f32) for the
    entire depth axis, so per-layer weights are DMA'd once per layer total."""
    l = pl.program_id(0)
    n, d = x_scr.shape
    hd = d // num_heads

    # ---- depth step 0: patch projection (conv-as-matmul) + bias + pos_embed ----
    # (posb = tile(pos_embed + proj_bias) precomputed host-side -> (B*P, D)).
    # Kept as a tiny write-then-read of a 12 KiB VMEM block for lowering
    # robustness; the projection matmul itself only runs at l == 0.
    @pl.when(l == 0)
    def _():
        x_scr[...] = jnp.dot(patches_ref[...], projw_ref[...],
                             preferred_element_type=jnp.float32) + posb_ref[...]
        # pos_drop has p=0 in eval -> identity

    x = x_scr[...]                                              # (B*P, D) f32

    # ---- pre-LN MHSA: one fused QKV matmul, per-(batch, head) scores/attend,
    #      one fused output projection on the lane-concatenated heads ----------
    h1 = _layernorm(x, ln1g_ref[0], ln1b_ref[0]).astype(jnp.bfloat16)
    # single lane-dense MXU op: (B*P, D) @ (D, 3D); 1/sqrt(head_dim) is folded
    # into the q columns / bias at init time.
    qkv = jnp.dot(h1, wqkv_ref[0], preferred_element_type=jnp.float32) + bqkv_ref[0]

    attn_rows = []
    for b in range(batch):                      # static loops: attention is
        r0 = b * seq                            # block-diagonal over batch
        head_outs = []
        for h in range(num_heads):
            c = h * hd
            q_bh = qkv[r0:r0 + seq, c:c + hd].astype(jnp.bfloat16)            # (P, hd)
            k_bh = qkv[r0:r0 + seq, d + c:d + c + hd].astype(jnp.bfloat16)
            v_bh = qkv[r0:r0 + seq, 2 * d + c:2 * d + c + hd].astype(jnp.bfloat16)
            s = jax.lax.dot_general(q_bh, k_bh, (((1,), (1,)), ((), ())),
                                    preferred_element_type=jnp.float32)       # (P, P)
            s = s - jnp.max(s, axis=-1, keepdims=True)
            e = jnp.exp(s)
            p_attn = e / jnp.sum(e, axis=-1, keepdims=True)
            head_outs.append(jnp.dot(p_attn.astype(jnp.bfloat16), v_bh,
                                     preferred_element_type=jnp.float32))      # (P, hd)
        attn_rows.append(jnp.concatenate(head_outs, axis=-1))                  # (P, D)
    attn = jnp.concatenate(attn_rows, axis=0).astype(jnp.bfloat16)             # (B*P, D)
    # concat(heads) @ Wproj as ONE lane-dense matmul
    x = x + jnp.dot(attn, wproj_ref[0],
                    preferred_element_type=jnp.float32) + bproj_ref[0]

    # ------------------------------ pre-LN MLP ---------------------------------
    h2 = _layernorm(x, ln2g_ref[0], ln2b_ref[0]).astype(jnp.bfloat16)
    m = jnp.dot(h2, wfc1_ref[0], preferred_element_type=jnp.float32) + bfc1_ref[0]
    # TODO(synk): timm ViT uses exact (erf) GELU; tanh-approx GELU used here for
    # robust Mosaic lowering.
    m = jax.nn.gelu(m, approximate=True).astype(jnp.bfloat16)
    m = jnp.dot(m, wfc2_ref[0], preferred_element_type=jnp.float32) + bfc2_ref[0]
    x = x + m
    x_scr[...] = x

    # ---- last depth step: final LayerNorm (self.v.norm) -> lane-dense store ----
    @pl.when(l == pl.num_programs(0) - 1)
    def _():
        o_ref[...] = _layernorm(x, normg_ref[...], normb_ref[...])


# ------------------------------ pallas_call wrapper -----------------------------
def encode(params, patches_flat, batch, seq):
    BP, K = patches_flat.shape
    D = params['proj_w'].shape[1]
    depth = params['wqkv'].shape[0]
    # pos embed + patch-proj bias, pre-tiled across the batch: (B*P, D) f32
    posb = jnp.tile(params['pos'] + params['proj_b'], (batch, 1))

    def rep(shape):                       # shared param: same block every depth step
        nd = len(shape)
        return pl.BlockSpec(shape, lambda l, _nd=nd: (0,) * _nd)

    def per_layer(shape):                 # (DEPTH, ...) stacked weights: pick layer l
        nd = len(shape)
        return pl.BlockSpec((1,) + tuple(shape[1:]),
                            lambda l, _nd=nd: (l,) + (0,) * (_nd - 1))

    in_specs = [
        rep(patches_flat.shape), rep(params['proj_w'].shape), rep(posb.shape),
        per_layer(params['ln1_g'].shape), per_layer(params['ln1_b'].shape),
        per_layer(params['wqkv'].shape), per_layer(params['bqkv'].shape),
        per_layer(params['wproj'].shape), per_layer(params['bproj'].shape),
        per_layer(params['ln2_g'].shape), per_layer(params['ln2_b'].shape),
        per_layer(params['wfc1'].shape), per_layer(params['bfc1'].shape),
        per_layer(params['wfc2'].shape), per_layer(params['bfc2'].shape),
        rep(params['norm_g'].shape), rep(params['norm_b'].shape),
    ]
    args = (patches_flat, params['proj_w'], posb,
            params['ln1_g'], params['ln1_b'], params['wqkv'], params['bqkv'],
            params['wproj'], params['bproj'], params['ln2_g'], params['ln2_b'],
            params['wfc1'], params['bfc1'], params['wfc2'], params['bfc2'],
            params['norm_g'], params['norm_b'])

    out_flat = pl.pallas_call(
        functools.partial(encoder_kernel, batch=batch, seq=seq, num_heads=NUM_HEADS),
        out_shape=jax.ShapeDtypeStruct((BP, D), jnp.float32),
        grid=(depth,),
        in_specs=in_specs,
        out_specs=pl.BlockSpec((BP, D), lambda l: (0, 0)),
        scratch_shapes=[pltpu.VMEM((BP, D), jnp.float32)],     # resident activation
        compiler_params=pltpu.CompilerParams(
            # depth axis carries state in scratch -> sequential.
            dimension_semantics=("arbitrary",),
            # NOTE: re-budget for real ViT-base size (per-layer bf16 weights
            # ~14 MiB double-buffered); keep <= ~48 MiB on v7x (64 MiB VMEM/TC).
            vmem_limit_bytes=32 * 1024 * 1024),
    )(*args)
    return out_flat.reshape(batch, seq, D)


# ------------------------- glue: shapes, patches, params ------------------------
def get_shape(fstride, tstride, height, width, patch=PATCH):
    # same as Img2SeqModel.get_shape (conv output spatial dims, VALID padding)
    f_dim = (height - patch) // fstride + 1
    t_dim = (width - patch) // tstride + 1
    return f_dim, t_dim


def extract_patches(x, fstride=FSTRIDE, tstride=TSTRIDE, patch=PATCH):
    # x: (B, 1, H, W) NCHW -> (B, P, patch*patch); patch index = fi * t_dim + ti,
    # features in row-major (ph, pw) order (matches the flattened conv kernel).
    B = x.shape[0]
    cols = jax.lax.conv_general_dilated_patches(
        x, filter_shape=(patch, patch), window_strides=(fstride, tstride),
        padding='VALID', dimension_numbers=('NCHW', 'OIHW', 'NCHW'))
    K = patch * patch
    P = cols.shape[2] * cols.shape[3]
    return jnp.transpose(cols.reshape(B, K, P), (0, 2, 1))


def init_params(key, num_patches):
    D, M, H = EMBED_DIM, MLP_DIM, NUM_HEADS
    hd = D // H
    scale = hd ** -0.5
    keys = jax.random.split(key, 3 + DEPTH)

    # patch projection: new_proj.weight = sum over 3 input channels of the
    # original (D,3,16,16) conv weight -> (D,1,16,16); realized as (256, D) matmul.
    w3 = 0.02 * jax.random.normal(keys[0], (D, 3, PATCH, PATCH), jnp.float32)
    w1 = jnp.sum(w3, axis=1)                                  # (D, 16, 16)
    proj_w = w1.reshape(D, PATCH * PATCH).T                   # (256, D)
    proj_b = 0.02 * jax.random.normal(keys[1], (1, D), jnp.float32)
    pos = 0.02 * jax.random.normal(keys[2], (num_patches, D), jnp.float32)

    acc = {k: [] for k in ('ln1_g', 'ln1_b', 'wqkv', 'bqkv', 'wproj', 'bproj',
                           'ln2_g', 'ln2_b', 'wfc1', 'bfc1', 'wfc2', 'bfc2')}
    for li in range(DEPTH):
        bk_ = jax.random.split(keys[3 + li], 8)
        wqkv = 0.02 * jax.random.normal(bk_[0], (D, 3 * D), jnp.float32)
        bqkv = 0.02 * jax.random.normal(bk_[1], (3 * D,), jnp.float32)
        # fold the 1/sqrt(head_dim) softmax scale into q weights/bias
        wqkv = wqkv.at[:, :D].multiply(scale)
        bqkv = bqkv.at[:D].multiply(scale)
        wp = 0.02 * jax.random.normal(bk_[2], (D, D), jnp.float32)
        bp = 0.02 * jax.random.normal(bk_[3], (1, D), jnp.float32)
        wf1 = 0.02 * jax.random.normal(bk_[4], (D, M), jnp.float32)
        bf1 = 0.02 * jax.random.normal(bk_[5], (1, M), jnp.float32)
        wf2 = 0.02 * jax.random.normal(bk_[6], (M, D), jnp.float32)
        bf2 = 0.02 * jax.random.normal(bk_[7], (1, D), jnp.float32)

        acc['wqkv'].append(wqkv); acc['bqkv'].append(bqkv.reshape(1, 3 * D))
        acc['wproj'].append(wp); acc['bproj'].append(bp)
        acc['ln1_g'].append(jnp.ones((1, D), jnp.float32))
        acc['ln1_b'].append(jnp.zeros((1, D), jnp.float32))
        acc['ln2_g'].append(jnp.ones((1, D), jnp.float32))
        acc['ln2_b'].append(jnp.zeros((1, D), jnp.float32))
        acc['wfc1'].append(wf1); acc['bfc1'].append(bf1)
        acc['wfc2'].append(wf2); acc['bfc2'].append(bf2)

    stack = lambda name: jnp.stack(acc[name], axis=0)
    bf16 = lambda x: x.astype(jnp.bfloat16)
    return dict(
        proj_w=bf16(proj_w), proj_b=proj_b, pos=pos,
        ln1_g=stack('ln1_g'), ln1_b=stack('ln1_b'),
        wqkv=bf16(stack('wqkv')), bqkv=stack('bqkv'),
        wproj=bf16(stack('wproj')), bproj=stack('bproj'),
        ln2_g=stack('ln2_g'), ln2_b=stack('ln2_b'),
        wfc1=bf16(stack('wfc1')), bfc1=stack('bfc1'),
        wfc2=bf16(stack('wfc2')), bfc2=stack('bfc2'),
        norm_g=jnp.ones((1, D), jnp.float32), norm_b=jnp.zeros((1, D), jnp.float32),
    )


def img2seq_forward(params, src, tgt=None):
    # encode(): patch_embed -> + pos_embed -> pos_drop (p=0: identity) -> blocks -> norm
    patches = extract_patches(src)                              # (B, P, 256) f32
    B, P, K = patches.shape
    patches = patches.reshape(B * P, K).astype(jnp.bfloat16)    # batch folded into rows
    feats = encode(params, patches, B, P)                       # (B, P, D) f32
    # TODO(synk): DecoderRNN class definition is not provided in the module source;
    # forward() here returns the encoder features instead of decoder outputs.
    return feats


if __name__ == "__main__":
    B, Himg, Wimg = 2, 36, 46
    f_dim, t_dim = get_shape(FSTRIDE, TSTRIDE, Himg, Wimg)   # (3, 4)
    P = f_dim * t_dim                                        # 12 patches

    key = jax.random.PRNGKey(0)
    k_src, k_tgt, k_par = jax.random.split(key, 3)
    src = jax.random.normal(k_src, (B, 1, Himg, Wimg), jnp.float32)  # NCHW, 1 channel
    tgt = jax.random.randint(k_tgt, (B, 8), 0, 100)                  # unused (decoder unavailable)

    params = init_params(k_par, P)
    out = img2seq_forward(params, src, tgt)
    out = jax.block_until_ready(out)
    assert out.shape == (B, P, EMBED_DIM)
    assert bool(jnp.all(jnp.isfinite(out)))
    print("KERNEL_OK")
</pallas_src>

<mosaic_0001>
module attributes {stable_mosaic.version = 11 : i64} {
  func.func @encoder_kernel(%arg0: i32, %arg1: memref<24x256xbf16, #tpu.memory_space<vmem>>, %arg2: memref<256x128xbf16, #tpu.memory_space<vmem>>, %arg3: memref<24x128xf32, #tpu.memory_space<vmem>>, %arg4: memref<1x1x128xf32, #tpu.memory_space<vmem>>, %arg5: memref<1x1x128xf32, #tpu.memory_space<vmem>>, %arg6: memref<1x128x384xbf16, #tpu.memory_space<vmem>>, %arg7: memref<1x1x384xf32, #tpu.memory_space<vmem>>, %arg8: memref<1x128x128xbf16, #tpu.memory_space<vmem>>, %arg9: memref<1x1x128xf32, #tpu.memory_space<vmem>>, %arg10: memref<1x1x128xf32, #tpu.memory_space<vmem>>, %arg11: memref<1x1x128xf32, #tpu.memory_space<vmem>>, %arg12: memref<1x128x512xbf16, #tpu.memory_space<vmem>>, %arg13: memref<1x1x512xf32, #tpu.memory_space<vmem>>, %arg14: memref<1x512x128xbf16, #tpu.memory_space<vmem>>, %arg15: memref<1x1x128xf32, #tpu.memory_space<vmem>>, %arg16: memref<1x128xf32, #tpu.memory_space<vmem>>, %arg17: memref<1x128xf32, #tpu.memory_space<vmem>>, %arg18: memref<24x128xf32, #tpu.memory_space<vmem>>, %arg19: memref<24x128xf32, #tpu.memory_space<vmem>>) attributes {dimension_semantics = [#tpu.dimension_semantics<arbitrary>], iteration_bounds = array<i64: 2>, scalar_prefetch = 0 : i64, scratch_operands = 1 : i64, tpu.core_type = #tpu.core_type<tc>, window_params = [{pipeline_mode = #tpu.pipeline_mode<synchronous>, transform_indices = @transform_0, window_bounds = array<i64: 24, 256>}, {pipeline_mode = #tpu.pipeline_mode<synchronous>, transform_indices = @transform_1, window_bounds = array<i64: 256, 128>}, {pipeline_mode = #tpu.pipeline_mode<synchronous>, transform_indices = @transform_2, window_bounds = array<i64: 24, 128>}, {transform_indices = @transform_3, window_bounds = array<i64: 1, 1, 128>}, {transform_indices = @transform_4, window_bounds = array<i64: 1, 1, 128>}, {transform_indices = @transform_5, window_bounds = array<i64: 1, 128, 384>}, {transform_indices = @transform_6, window_bounds = array<i64: 1, 1, 384>}, {transform_indices = @transform_7, window_bounds = array<i64: 1, 128, 128>}, {transform_indices = @transform_8, window_bounds = array<i64: 1, 1, 128>}, {transform_indices = @transform_9, window_bounds = array<i64: 1, 1, 128>}, {transform_indices = @transform_10, window_bounds = array<i64: 1, 1, 128>}, {transform_indices = @transform_11, window_bounds = array<i64: 1, 128, 512>}, {transform_indices = @transform_12, window_bounds = array<i64: 1, 1, 512>}, {transform_indices = @transform_13, window_bounds = array<i64: 1, 512, 128>}, {transform_indices = @transform_14, window_bounds = array<i64: 1, 1, 128>}, {pipeline_mode = #tpu.pipeline_mode<synchronous>, transform_indices = @transform_15, window_bounds = array<i64: 1, 128>}, {pipeline_mode = #tpu.pipeline_mode<synchronous>, transform_indices = @transform_16, window_bounds = array<i64: 1, 128>}, {pipeline_mode = #tpu.pipeline_mode<synchronous>, transform_indices = @transform_17, window_bounds = array<i64: 24, 128>}]} {
    %c0_i32 = arith.constant 0 : i32
    %0 = arith.cmpi eq, %arg0, %c0_i32 : i32
    %1 = arith.extui %0 : i1 to i32
    %c0_i32_0 = arith.constant 0 : i32
    %2 = arith.cmpi ne, %1, %c0_i32_0 : i32
    scf.if %2 {
      %c0_90 = arith.constant 0 : index
      %c0_91 = arith.constant 0 : index
      %254 = vector.load %arg1[%c0_90, %c0_91] : memref<24x256xbf16, #tpu.memory_space<vmem>>, vector<24x256xbf16>
      %c0_92 = arith.constant 0 : index
      %c0_93 = arith.constant 0 : index
      %255 = vector.load %arg2[%c0_92, %c0_93] : memref<256x128xbf16, #tpu.memory_space<vmem>>, vector<256x128xbf16>
      %cst_94 = arith.constant dense<0.000000e+00> : vector<24x128xf32>
      %256 = tpu.matmul %254, %255, %cst_94 {dimension_numbers = #tpu.dot_dimension_numbers<[1], [0], [0], [1], [0, 0, 1, 1], [], []>} : vector<24x256xbf16>, vector<256x128xbf16>, vector<24x128xf32> -> vector<24x128xf32>
      %c0_95 = arith.constant 0 : index
      %c0_96 = arith.constant 0 : index
      %257 = vector.load %arg3[%c0_95, %c0_96] : memref<24x128xf32, #tpu.memory_space<vmem>>, vector<24x128xf32>
      %258 = arith.addf %256, %257 : vector<24x128xf32>
      %c0_97 = arith.constant 0 : index
      %c0_98 = arith.constant 0 : index
      %259 = vector.load %arg19[%c0_97, %c0_98] : memref<24x128xf32, #tpu.memory_space<vmem>>, vector<24x128xf32>
      tpu.vector_store %arg19[%c0_97, %c0_98], %258 {strides = array<i32>} : memref<24x128xf32, #tpu.memory_space<vmem>>, vector<24x128xf32>,
    } else {
    }
    %c0 = arith.constant 0 : index
    %c0_1 = arith.constant 0 : index
    %3 = vector.load %arg19[%c0, %c0_1] : memref<24x128xf32, #tpu.memory_space<vmem>>, vector<24x128xf32>
    %c0_2 = arith.constant 0 : index
    %c0_3 = arith.constant 0 : index
    %c0_4 = arith.constant 0 : index
    %4 = vector.load %arg4[%c0_2, %c0_3, %c0_4] : memref<1x1x128xf32, #tpu.memory_space<vmem>>, vector<1x1x128xf32>
    %5 = vector.shape_cast %4 : vector<1x1x128xf32> to vector<1x128xf32>
    %c0_5 = arith.constant 0 : index
    %c0_6 = arith.constant 0 : index
    %c0_7 = arith.constant 0 : index
    %6 = vector.load %arg5[%c0_5, %c0_6, %c0_7] : memref<1x1x128xf32, #tpu.memory_space<vmem>>, vector<1x1x128xf32>
    %7 = vector.shape_cast %6 : vector<1x1x128xf32> to vector<1x128xf32>
    %cst = arith.constant dense<0.000000e+00> : vector<24xf32>
    %8 = vector.multi_reduction <add>, %3, %cst [1] : vector<24x128xf32> to vector<24xf32>
    %9 = vector.shape_cast %8 : vector<24xf32> to vector<24x1xf32>
    %cst_8 = arith.constant 1.280000e+02 : f32
    %10 = vector.broadcast %cst_8 : f32 to vector<24x1xf32>
    %11 = arith.divf %9, %10 : vector<24x1xf32>
    %12 = vector.broadcast %11 : vector<24x1xf32> to vector<24x128xf32>
    %13 = arith.subf %3, %12 : vector<24x128xf32>
    %14 = arith.mulf %13, %13 : vector<24x128xf32>
    %cst_9 = arith.constant dense<0.000000e+00> : vector<24xf32>
    %15 = vector.multi_reduction <add>, %14, %cst_9 [1] : vector<24x128xf32> to vector<24xf32>
    %16 = vector.shape_cast %15 : vector<24xf32> to vector<24x1xf32>
    %cst_10 = arith.constant 1.280000e+02 : f32
    %17 = vector.broadcast %cst_10 : f32 to vector<24x1xf32>
    %18 = arith.divf %16, %17 : vector<24x1xf32>
    %19 = vector.broadcast %11 : vector<24x1xf32> to vector<24x128xf32>
    %20 = arith.subf %3, %19 : vector<24x128xf32>
    %cst_11 = arith.constant 9.99999997E-7 : f32
    %21 = vector.broadcast %cst_11 : f32 to vector<24x1xf32>
    %22 = arith.addf %18, %21 : vector<24x1xf32>
    %23 = math.rsqrt %22 : vector<24x1xf32>
    %24 = vector.broadcast %23 : vector<24x1xf32> to vector<24x128xf32>
    %25 = arith.mulf %20, %24 : vector<24x128xf32>
    %26 = vector.broadcast %5 : vector<1x128xf32> to vector<24x128xf32>
    %27 = arith.mulf %25, %26 : vector<24x128xf32>
    %28 = vector.broadcast %7 : vector<1x128xf32> to vector<24x128xf32>
    %29 = arith.addf %27, %28 : vector<24x128xf32>
    %30 = arith.truncf %29 : vector<24x128xf32> to vector<24x128xbf16>
    %c0_12 = arith.constant 0 : index
    %c0_13 = arith.constant 0 : index
    %c0_14 = arith.constant 0 : index
    %31 = vector.load %arg6[%c0_12, %c0_13, %c0_14] : memref<1x128x384xbf16, #tpu.memory_space<vmem>>, vector<1x128x384xbf16>
    %32 = vector.shape_cast %31 : vector<1x128x384xbf16> to vector<128x384xbf16>
    %cst_15 = arith.constant dense<0.000000e+00> : vector<24x384xf32>
    %33 = tpu.matmul %30, %32, %cst_15 {dimension_numbers = #tpu.dot_dimension_numbers<[1], [0], [0], [1], [0, 0, 1, 1], [], []>} : vector<24x128xbf16>, vector<128x384xbf16>, vector<24x384xf32> -> vector<24x384xf32>
    %c0_16 = arith.constant 0 : index
    %c0_17 = arith.constant 0 : index
    %c0_18 = arith.constant 0 : index
    %34 = vector.load %arg7[%c0_16, %c0_17, %c0_18] : memref<1x1x384xf32, #tpu.memory_space<vmem>>, vector<1x1x384xf32>
    %35 = vector.shape_cast %34 : vector<1x1x384xf32> to vector<1x384xf32>
    %36 = vector.broadcast %35 : vector<1x384xf32> to vector<24x384xf32>
    %37 = arith.addf %33, %36 : vector<24x384xf32>
    %38 = vector.extract_strided_slice %37 {offsets = [0, 0], sizes = [12, 32], strides = [1, 1]} : vector<24x384xf32> to vector<12x32xf32>
    %39 = arith.truncf %38 : vector<12x32xf32> to vector<12x32xbf16>
    %40 = vector.extract_strided_slice %37 {offsets = [0, 128], sizes = [12, 32], strides = [1, 1]} : vector<24x384xf32> to vector<12x32xf32>
    %41 = arith.truncf %40 : vector<12x32xf32> to vector<12x32xbf16>
    %42 = vector.extract_strided_slice %37 {offsets = [0, 256], sizes = [12, 32], strides = [1, 1]} : vector<24x384xf32> to vector<12x32xf32>
    %43 = arith.truncf %42 : vector<12x32xf32> to vector<12x32xbf16>
    %cst_19 = arith.constant dense<0.000000e+00> : vector<12x12xf32>
    %44 = tpu.matmul %39, %41, %cst_19 {dimension_numbers = #tpu.dot_dimension_numbers<[1], [1], [0], [0], [0, 0, 1, 0], [], []>} : vector<12x32xbf16>, vector<12x32xbf16>, vector<12x12xf32> -> vector<12x12xf32>
    %cst_20 = arith.constant dense<0xFF800000> : vector<12xf32>
    %45 = vector.multi_reduction <maximumf>, %44, %cst_20 [1] : vector<12x12xf32> to vector<12xf32>
    %46 = vector.shape_cast %45 : vector<12xf32> to vector<12x1xf32>
    %47 = vector.broadcast %46 : vector<12x1xf32> to vector<12x12xf32>
    %48 = arith.subf %44, %47 : vector<12x12xf32>
    %49 = math.exp %48 : vector<12x12xf32>
    %cst_21 = arith.constant dense<0.000000e+00> : vector<12xf32>
    %50 = vector.multi_reduction <add>, %49, %cst_21 [1] : vector<12x12xf32> to vector<12xf32>
    %51 = vector.shape_cast %50 : vector<12xf32> to vector<12x1xf32>
    %52 = vector.broadcast %51 : vector<12x1xf32> to vector<12x12xf32>
    %53 = arith.divf %49, %52 : vector<12x12xf32>
    %54 = arith.truncf %53 : vector<12x12xf32> to vector<12x12xbf16>
    %cst_22 = arith.constant dense<0.000000e+00> : vector<12x32xf32>
    %55 = tpu.matmul %54, %43, %cst_22 {dimension_numbers = #tpu.dot_dimension_numbers<[1], [0], [0], [1], [0, 0, 1, 1], [], []>} : vector<12x12xbf16>, vector<12x32xbf16>, vector<12x32xf32> -> vector<12x32xf32>
    %56 = vector.extract_strided_slice %37 {offsets = [0, 32], sizes = [12, 32], strides = [1, 1]} : vector<24x384xf32> to vector<12x32xf32>
    %57 = arith.truncf %56 : vector<12x32xf32> to vector<12x32xbf16>
    %58 = vector.extract_strided_slice %37 {offsets = [0, 160], sizes = [12, 32], strides = [1, 1]} : vector<24x384xf32> to vector<12x32xf32>
    %59 = arith.truncf %58 : vector<12x32xf32> to vector<12x32xbf16>
    %60 = vector.extract_strided_slice %37 {offsets = [0, 288], sizes = [12, 32], strides = [1, 1]} : vector<24x384xf32> to vector<12x32xf32>
    %61 = arith.truncf %60 : vector<12x32xf32> to vector<12x32xbf16>
    %cst_23 = arith.constant dense<0.000000e+00> : vector<12x12xf32>
    %62 = tpu.matmul %57, %59, %cst_23 {dimension_numbers = #tpu.dot_dimension_numbers<[1], [1], [0], [0], [0, 0, 1, 0], [], []>} : vector<12x32xbf16>, vector<12x32xbf16>, vector<12x12xf32> -> vector<12x12xf32>
    %cst_24 = arith.constant dense<0xFF800000> : vector<12xf32>
    %63 = vector.multi_reduction <maximumf>, %62, %cst_24 [1] : vector<12x12xf32> to vector<12xf32>
    %64 = vector.shape_cast %63 : vector<12xf32> to vector<12x1xf32>
    %65 = vector.broadcast %64 : vector<12x1xf32> to vector<12x12xf32>
    %66 = arith.subf %62, %65 : vector<12x12xf32>
    %67 = math.exp %66 : vector<12x12xf32>
    %cst_25 = arith.constant dense<0.000000e+00> : vector<12xf32>
    %68 = vector.multi_reduction <add>, %67, %cst_25 [1] : vector<12x12xf32> to vector<12xf32>
    %69 = vector.shape_cast %68 : vector<12xf32> to vector<12x1xf32>
    %70 = vector.broadcast %69 : vector<12x1xf32> to vector<12x12xf32>
    %71 = arith.divf %67, %70 : vector<12x12xf32>
    %72 = arith.truncf %71 : vector<12x12xf32> to vector<12x12xbf16>
    %cst_26 = arith.constant dense<0.000000e+00> : vector<12x32xf32>
    %73 = tpu.matmul %72, %61, %cst_26 {dimension_numbers = #tpu.dot_dimension_numbers<[1], [0], [0], [1], [0, 0, 1, 1], [], []>} : vector<12x12xbf16>, vector<12x32xbf16>, vector<12x32xf32> -> vector<12x32xf32>
    %74 = vector.extract_strided_slice %37 {offsets = [0, 64], sizes = [12, 32], strides = [1, 1]} : vector<24x384xf32> to vector<12x32xf32>
    %75 = arith.truncf %74 : vector<12x32xf32> to vector<12x32xbf16>
    %76 = vector.extract_strided_slice %37 {offsets = [0, 192], sizes = [12, 32], strides = [1, 1]} : vector<24x384xf32> to vector<12x32xf32>
    %77 = arith.truncf %76 : vector<12x32xf32> to vector<12x32xbf16>
    %78 = vector.extract_strided_slice %37 {offsets = [0, 320], sizes = [12, 32], strides = [1, 1]} : vector<24x384xf32> to vector<12x32xf32>
    %79 = arith.truncf %78 : vector<12x32xf32> to vector<12x32xbf16>
    %cst_27 = arith.constant dense<0.000000e+00> : vector<12x12xf32>
    %80 = tpu.matmul %75, %77, %cst_27 {dimension_numbers = #tpu.dot_dimension_numbers<[1], [1], [0], [0], [0, 0, 1, 0], [], []>} : vector<12x32xbf16>, vector<12x32xbf16>, vector<12x12xf32> -> vector<12x12xf32>
    %cst_28 = arith.constant dense<0xFF800000> : vector<12xf32>
    %81 = vector.multi_reduction <maximumf>, %80, %cst_28 [1] : vector<12x12xf32> to vector<12xf32>
    %82 = vector.shape_cast %81 : vector<12xf32> to vector<12x1xf32>
    %83 = vector.broadcast %82 : vector<12x1xf32> to vector<12x12xf32>
    %84 = arith.subf %80, %83 : vector<12x12xf32>
    %85 = math.exp %84 : vector<12x12xf32>
    %cst_29 = arith.constant dense<0.000000e+00> : vector<12xf32>
    %86 = vector.multi_reduction <add>, %85, %cst_29 [1] : vector<12x12xf32> to vector<12xf32>
    %87 = vector.shape_cast %86 : vector<12xf32> to vector<12x1xf32>
    %88 = vector.broadcast %87 : vector<12x1xf32> to vector<12x12xf32>
    %89 = arith.divf %85, %88 : vector<12x12xf32>
    %90 = arith.truncf %89 : vector<12x12xf32> to vector<12x12xbf16>
    %cst_30 = arith.constant dense<0.000000e+00> : vector<12x32xf32>
    %91 = tpu.matmul %90, %79, %cst_30 {dimension_numbers = #tpu.dot_dimension_numbers<[1], [0], [0], [1], [0, 0, 1, 1], [], []>} : vector<12x12xbf16>, vector<12x32xbf16>, vector<12x32xf32> -> vector<12x32xf32>
    %92 = vector.extract_strided_slice %37 {offsets = [0, 96], sizes = [12, 32], strides = [1, 1]} : vector<24x384xf32> to vector<12x32xf32>
    %93 = arith.truncf %92 : vector<12x32xf32> to vector<12x32xbf16>
    %94 = vector.extract_strided_slice %37 {offsets = [0, 224], sizes = [12, 32], strides = [1, 1]} : vector<24x384xf32> to vector<12x32xf32>
    %95 = arith.truncf %94 : vector<12x32xf32> to vector<12x32xbf16>
    %96 = vector.extract_strided_slice %37 {offsets = [0, 352], sizes = [12, 32], strides = [1, 1]} : vector<24x384xf32> to vector<12x32xf32>
    %97 = arith.truncf %96 : vector<12x32xf32> to vector<12x32xbf16>
    %cst_31 = arith.constant dense<0.000000e+00> : vector<12x12xf32>
    %98 = tpu.matmul %93, %95, %cst_31 {dimension_numbers = #tpu.dot_dimension_numbers<[1], [1], [0], [0], [0, 0, 1, 0], [], []>} : vector<12x32xbf16>, vector<12x32xbf16>, vector<12x12xf32> -> vector<12x12xf32>
    %cst_32 = arith.constant dense<0xFF800000> : vector<12xf32>
    %99 = vector.multi_reduction <maximumf>, %98, %cst_32 [1] : vector<12x12xf32> to vector<12xf32>
    %100 = vector.shape_cast %99 : vector<12xf32> to vector<12x1xf32>
    %101 = vector.broadcast %100 : vector<12x1xf32> to vector<12x12xf32>
    %102 = arith.subf %98, %101 : vector<12x12xf32>
    %103 = math.exp %102 : vector<12x12xf32>
    %cst_33 = arith.constant dense<0.000000e+00> : vector<12xf32>
    %104 = vector.multi_reduction <add>, %103, %cst_33 [1] : vector<12x12xf32> to vector<12xf32>
    %105 = vector.shape_cast %104 : vector<12xf32> to vector<12x1xf32>
    %106 = vector.broadcast %105 : vector<12x1xf32> to vector<12x12xf32>
    %107 = arith.divf %103, %106 : vector<12x12xf32>
    %108 = arith.truncf %107 : vector<12x12xf32> to vector<12x12xbf16>
    %cst_34 = arith.constant dense<0.000000e+00> : vector<12x32xf32>
    %109 = tpu.matmul %108, %97, %cst_34 {dimension_numbers = #tpu.dot_dimension_numbers<[1], [0], [0], [1], [0, 0, 1, 1], [], []>} : vector<12x12xbf16>, vector<12x32xbf16>, vector<12x32xf32> -> vector<12x32xf32>
    %110 = tpu.concatenate %55, %73, %91, %109 in 1 : vector<12x32xf32>, vector<12x32xf32>, vector<12x32xf32>, vector<12x32xf32> -> vector<12x128xf32>
    %111 = vector.extract_strided_slice %37 {offsets = [12, 0], sizes = [12, 32], strides = [1, 1]} : vector<24x384xf32> to vector<12x32xf32>
    %112 = arith.truncf %111 : vector<12x32xf32> to vector<12x32xbf16>
    %113 = vector.extract_strided_slice %37 {offsets = [12, 128], sizes = [12, 32], strides = [1, 1]} : vector<24x384xf32> to vector<12x32xf32>
    %114 = arith.truncf %113 : vector<12x32xf32> to vector<12x32xbf16>
    %115 = vector.extract_strided_slice %37 {offsets = [12, 256], sizes = [12, 32], strides = [1, 1]} : vector<24x384xf32> to vector<12x32xf32>
    %116 = arith.truncf %115 : vector<12x32xf32> to vector<12x32xbf16>
    %cst_35 = arith.constant dense<0.000000e+00> : vector<12x12xf32>
    %117 = tpu.matmul %112, %114, %cst_35 {dimension_numbers = #tpu.dot_dimension_numbers<[1], [1], [0], [0], [0, 0, 1, 0], [], []>} : vector<12x32xbf16>, vector<12x32xbf16>, vector<12x12xf32> -> vector<12x12xf32>
    %cst_36 = arith.constant dense<0xFF800000> : vector<12xf32>
    %118 = vector.multi_reduction <maximumf>, %117, %cst_36 [1] : vector<12x12xf32> to vector<12xf32>
    %119 = vector.shape_cast %118 : vector<12xf32> to vector<12x1xf32>
    %120 = vector.broadcast %119 : vector<12x1xf32> to vector<12x12xf32>
    %121 = arith.subf %117, %120 : vector<12x12xf32>
    %122 = math.exp %121 : vector<12x12xf32>
    %cst_37 = arith.constant dense<0.000000e+00> : vector<12xf32>
    %123 = vector.multi_reduction <add>, %122, %cst_37 [1] : vector<12x12xf32> to vector<12xf32>
    %124 = vector.shape_cast %123 : vector<12xf32> to vector<12x1xf32>
    %125 = vector.broadcast %124 : vector<12x1xf32> to vector<12x12xf32>
    %126 = arith.divf %122, %125 : vector<12x12xf32>
    %127 = arith.truncf %126 : vector<12x12xf32> to vector<12x12xbf16>
    %cst_38 = arith.constant dense<0.000000e+00> : vector<12x32xf32>
    %128 = tpu.matmul %127, %116, %cst_38 {dimension_numbers = #tpu.dot_dimension_numbers<[1], [0], [0], [1], [0, 0, 1, 1], [], []>} : vector<12x12xbf16>, vector<12x32xbf16>, vector<12x32xf32> -> vector<12x32xf32>
    %129 = vector.extract_strided_slice %37 {offsets = [12, 32], sizes = [12, 32], strides = [1, 1]} : vector<24x384xf32> to vector<12x32xf32>
    %130 = arith.truncf %129 : vector<12x32xf32> to vector<12x32xbf16>
    %131 = vector.extract_strided_slice %37 {offsets = [12, 160], sizes = [12, 32], strides = [1, 1]} : vector<24x384xf32> to vector<12x32xf32>
    %132 = arith.truncf %131 : vector<12x32xf32> to vector<12x32xbf16>
    %133 = vector.extract_strided_slice %37 {offsets = [12, 288], sizes = [12, 32], strides = [1, 1]} : vector<24x384xf32> to vector<12x32xf32>
    %134 = arith.truncf %133 : vector<12x32xf32> to vector<12x32xbf16>
    %cst_39 = arith.constant dense<0.000000e+00> : vector<12x12xf32>
    %135 = tpu.matmul %130, %132, %cst_39 {dimension_numbers = #tpu.dot_dimension_numbers<[1], [1], [0], [0], [0, 0, 1, 0], [], []>} : vector<12x32xbf16>, vector<12x32xbf16>, vector<12x12xf32> -> vector<12x12xf32>
    %cst_40 = arith.constant dense<0xFF800000> : vector<12xf32>
    %136 = vector.multi_reduction <maximumf>, %135, %cst_40 [1] : vector<12x12xf32> to vector<12xf32>
    %137 = vector.shape_cast %136 : vector<12xf32> to vector<12x1xf32>
    %138 = vector.broadcast %137 : vector<12x1xf32> to vector<12x12xf32>
    %139 = arith.subf %135, %138 : vector<12x12xf32>
    %140 = math.exp %139 : vector<12x12xf32>
    %cst_41 = arith.constant dense<0.000000e+00> : vector<12xf32>
    %141 = vector.multi_reduction <add>, %140, %cst_41 [1] : vector<12x12xf32> to vector<12xf32>
    %142 = vector.shape_cast %141 : vector<12xf32> to vector<12x1xf32>
    %143 = vector.broadcast %142 : vector<12x1xf32> to vector<12x12xf32>
    %144 = arith.divf %140, %143 : vector<12x12xf32>
    %145 = arith.truncf %144 : vector<12x12xf32> to vector<12x12xbf16>
    %cst_42 = arith.constant dense<0.000000e+00> : vector<12x32xf32>
    %146 = tpu.matmul %145, %134, %cst_42 {dimension_numbers = #tpu.dot_dimension_numbers<[1], [0], [0], [1], [0, 0, 1, 1], [], []>} : vector<12x12xbf16>, vector<12x32xbf16>, vector<12x32xf32> -> vector<12x32xf32>
    %147 = vector.extract_strided_slice %37 {offsets = [12, 64], sizes = [12, 32], strides = [1, 1]} : vector<24x384xf32> to vector<12x32xf32>
    %148 = arith.truncf %147 : vector<12x32xf32> to vector<12x32xbf16>
    %149 = vector.extract_strided_slice %37 {offsets = [12, 192], sizes = [12, 32], strides = [1, 1]} : vector<24x384xf32> to vector<12x32xf32>
    %150 = arith.truncf %149 : vector<12x32xf32> to vector<12x32xbf16>
    %151 = vector.extract_strided_slice %37 {offsets = [12, 320], sizes = [12, 32], strides = [1, 1]} : vector<24x384xf32> to vector<12x32xf32>
    %152 = arith.truncf %151 : vector<12x32xf32> to vector<12x32xbf16>
    %cst_43 = arith.constant dense<0.000000e+00> : vector<12x12xf32>
    %153 = tpu.matmul %148, %150, %cst_43 {dimension_numbers = #tpu.dot_dimension_numbers<[1], [1], [0], [0], [0, 0, 1, 0], [], []>} : vector<12x32xbf16>, vector<12x32xbf16>, vector<12x12xf32> -> vector<12x12xf32>
    %cst_44 = arith.constant dense<0xFF800000> : vector<12xf32>
    %154 = vector.multi_reduction <maximumf>, %153, %cst_44 [1] : vector<12x12xf32> to vector<12xf32>
    %155 = vector.shape_cast %154 : vector<12xf32> to vector<12x1xf32>
    %156 = vector.broadcast %155 : vector<12x1xf32> to vector<12x12xf32>
    %157 = arith.subf %153, %156 : vector<12x12xf32>
    %158 = math.exp %157 : vector<12x12xf32>
    %cst_45 = arith.constant dense<0.000000e+00> : vector<12xf32>
    %159 = vector.multi_reduction <add>, %158, %cst_45 [1] : vector<12x12xf32> to vector<12xf32>
    %160 = vector.shape_cast %159 : vector<12xf32> to vector<12x1xf32>
    %161 = vector.broadcast %160 : vector<12x1xf32> to vector<12x12xf32>
    %162 = arith.divf %158, %161 : vector<12x12xf32>
    %163 = arith.truncf %162 : vector<12x12xf32> to vector<12x12xbf16>
    %cst_46 = arith.constant dense<0.000000e+00> : vector<12x32xf32>
    %164 = tpu.matmul %163, %152, %cst_46 {dimension_numbers = #tpu.dot_dimension_numbers<[1], [0], [0], [1], [0, 0, 1, 1], [], []>} : vector<12x12xbf16>, vector<12x32xbf16>, vector<12x32xf32> -> vector<12x32xf32>
    %165 = vector.extract_strided_slice %37 {offsets = [12, 96], sizes = [12, 32], strides = [1, 1]} : vector<24x384xf32> to vector<12x32xf32>
    %166 = arith.truncf %165 : vector<12x32xf32> to vector<12x32xbf16>
    %167 = vector.extract_strided_slice %37 {offsets = [12, 224], sizes = [12, 32], strides = [1, 1]} : vector<24x384xf32> to vector<12x32xf32>
    %168 = arith.truncf %167 : vector<12x32xf32> to vector<12x32xbf16>
    %169 = vector.extract_strided_slice %37 {offsets = [12, 352], sizes = [12, 32], strides = [1, 1]} : vector<24x384xf32> to vector<12x32xf32>
    %170 = arith.truncf %169 : vector<12x32xf32> to vector<12x32xbf16>
    %cst_47 = arith.constant dense<0.000000e+00> : vector<12x12xf32>
    %171 = tpu.matmul %166, %168, %cst_47 {dimension_numbers = #tpu.dot_dimension_numbers<[1], [1], [0], [0], [0, 0, 1, 0], [], []>} : vector<12x32xbf16>, vector<12x32xbf16>, vector<12x12xf32> -> vector<12x12xf32>
    %cst_48 = arith.constant dense<0xFF800000> : vector<12xf32>
    %172 = vector.multi_reduction <maximumf>, %171, %cst_48 [1] : vector<12x12xf32> to vector<12xf32>
    %173 = vector.shape_cast %172 : vector<12xf32> to vector<12x1xf32>
    %174 = vector.broadcast %173 : vector<12x1xf32> to vector<12x12xf32>
    %175 = arith.subf %171, %174 : vector<12x12xf32>
    %176 = math.exp %175 : vector<12x12xf32>
    %cst_49 = arith.constant dense<0.000000e+00> : vector<12xf32>
    %177 = vector.multi_reduction <add>, %176, %cst_49 [1] : vector<12x12xf32> to vector<12xf32>
    %178 = vector.shape_cast %177 : vector<12xf32> to vector<12x1xf32>
    %179 = vector.broadcast %178 : vector<12x1xf32> to vector<12x12xf32>
    %180 = arith.divf %176, %179 : vector<12x12xf32>
    %181 = arith.truncf %180 : vector<12x12xf32> to vector<12x12xbf16>
    %cst_50 = arith.constant dense<0.000000e+00> : vector<12x32xf32>
    %182 = tpu.matmul %181, %170, %cst_50 {dimension_numbers = #tpu.dot_dimension_numbers<[1], [0], [0], [1], [0, 0, 1, 1], [], []>} : vector<12x12xbf16>, vector<12x32xbf16>, vector<12x32xf32> -> vector<12x32xf32>
    %183 = tpu.concatenate %128, %146, %164, %182 in 1 : vector<12x32xf32>, vector<12x32xf32>, vector<12x32xf32>, vector<12x32xf32> -> vector<12x128xf32>
    %184 = tpu.concatenate %110, %183 in 0 : vector<12x128xf32>, vector<12x128xf32> -> vector<24x128xf32>
    %185 = arith.truncf %184 : vector<24x128xf32> to vector<24x128xbf16>
    %c0_51 = arith.constant 0 : index
    %c0_52 = arith.constant 0 : index
    %c0_53 = arith.constant 0 : index
    %186 = vector.load %arg8[%c0_51, %c0_52, %c0_53] : memref<1x128x128xbf16, #tpu.memory_space<vmem>>, vector<1x128x128xbf16>
    %187 = vector.shape_cast %186 : vector<1x128x128xbf16> to vector<128x128xbf16>
    %cst_54 = arith.constant dense<0.000000e+00> : vector<24x128xf32>
    %188 = tpu.matmul %185, %187, %cst_54 {dimension_numbers = #tpu.dot_dimension_numbers<[1], [0], [0], [1], [0, 0, 1, 1], [], []>} : vector<24x128xbf16>, vector<128x128xbf16>, vector<24x128xf32> -> vector<24x128xf32>
    %189 = arith.addf %3, %188 : vector<24x128xf32>
    %c0_55 = arith.constant 0 : index
    %c0_56 = arith.constant 0 : index
    %c0_57 = arith.constant 0 : index
    %190 = vector.load %arg9[%c0_55, %c0_56, %c0_57] : memref<1x1x128xf32, #tpu.memory_space<vmem>>, vector<1x1x128xf32>
    %191 = vector.shape_cast %190 : vector<1x1x128xf32> to vector<1x128xf32>
    %192 = vector.broadcast %191 : vector<1x128xf32> to vector<24x128xf32>
    %193 = arith.addf %189, %192 : vector<24x128xf32>
    %c0_58 = arith.constant 0 : index
    %c0_59 = arith.constant 0 : index
    %c0_60 = arith.constant 0 : index
    %194 = vector.load %arg10[%c0_58, %c0_59, %c0_60] : memref<1x1x128xf32, #tpu.memory_space<vmem>>, vector<1x1x128xf32>
    %195 = vector.shape_cast %194 : vector<1x1x128xf32> to vector<1x128xf32>
    %c0_61 = arith.constant 0 : index
    %c0_62 = arith.constant 0 : index
    %c0_63 = arith.constant 0 : index
    %196 = vector.load %arg11[%c0_61, %c0_62, %c0_63] : memref<1x1x128xf32, #tpu.memory_space<vmem>>, vector<1x1x128xf32>
    %197 = vector.shape_cast %196 : vector<1x1x128xf32> to vector<1x128xf32>
    %cst_64 = arith.constant dense<0.000000e+00> : vector<24xf32>
    %198 = vector.multi_reduction <add>, %193, %cst_64 [1] : vector<24x128xf32> to vector<24xf32>
    %199 = vector.shape_cast %198 : vector<24xf32> to vector<24x1xf32>
    %cst_65 = arith.constant 1.280000e+02 : f32
    %200 = vector.broadcast %cst_65 : f32 to vector<24x1xf32>
    %201 = arith.divf %199, %200 : vector<24x1xf32>
    %202 = vector.broadcast %201 : vector<24x1xf32> to vector<24x128xf32>
    %203 = arith.subf %193, %202 : vector<24x128xf32>
    %204 = arith.mulf %203, %203 : vector<24x128xf32>
    %cst_66 = arith.constant dense<0.000000e+00> : vector<24xf32>
    %205 = vector.multi_reduction <add>, %204, %cst_66 [1] : vector<24x128xf32> to vector<24xf32>
    %206 = vector.shape_cast %205 : vector<24xf32> to vector<24x1xf32>
    %cst_67 = arith.constant 1.280000e+02 : f32
    %207 = vector.broadcast %cst_67 : f32 to vector<24x1xf32>
    %208 = arith.divf %206, %207 : vector<24x1xf32>
    %209 = vector.broadcast %201 : vector<24x1xf32> to vector<24x128xf32>
    %210 = arith.subf %193, %209 : vector<24x128xf32>
    %cst_68 = arith.constant 9.99999997E-7 : f32
    %211 = vector.broadcast %cst_68 : f32 to vector<24x1xf32>
    %212 = arith.addf %208, %211 : vector<24x1xf32>
    %213 = math.rsqrt %212 : vector<24x1xf32>
    %214 = vector.broadcast %213 : vector<24x1xf32> to vector<24x128xf32>
    %215 = arith.mulf %210, %214 : vector<24x128xf32>
    %216 = vector.broadcast %195 : vector<1x128xf32> to vector<24x128xf32>
    %217 = arith.mulf %215, %216 : vector<24x128xf32>
    %218 = vector.broadcast %197 : vector<1x128xf32> to vector<24x128xf32>
    %219 = arith.addf %217, %218 : vector<24x128xf32>
    %220 = arith.truncf %219 : vector<24x128xf32> to vector<24x128xbf16>
    %c0_69 = arith.constant 0 : index
    %c0_70 = arith.constant 0 : index
    %c0_71 = arith.constant 0 : index
    %221 = vector.load %arg12[%c0_69, %c0_70, %c0_71] : memref<1x128x512xbf16, #tpu.memory_space<vmem>>, vector<1x128x512xbf16>
    %222 = vector.shape_cast %221 : vector<1x128x512xbf16> to vector<128x512xbf16>
    %cst_72 = arith.constant dense<0.000000e+00> : vector<24x512xf32>
    %223 = tpu.matmul %220, %222, %cst_72 {dimension_numbers = #tpu.dot_dimension_numbers<[1], [0], [0], [1], [0, 0, 1, 1], [], []>} : vector<24x128xbf16>, vector<128x512xbf16>, vector<24x512xf32> -> vector<24x512xf32>
    %c0_73 = arith.constant 0 : index
    %c0_74 = arith.constant 0 : index
    %c0_75 = arith.constant 0 : index
    %224 = vector.load %arg13[%c0_73, %c0_74, %c0_75] : memref<1x1x512xf32, #tpu.memory_space<vmem>>, vector<1x1x512xf32>
    %225 = vector.shape_cast %224 : vector<1x1x512xf32> to vector<1x512xf32>
    %226 = vector.broadcast %225 : vector<1x512xf32> to vector<24x512xf32>
    %227 = arith.addf %223, %226 : vector<24x512xf32>
    %228 = arith.mulf %227, %227 : vector<24x512xf32>
    %229 = arith.mulf %227, %228 : vector<24x512xf32>
    %cst_76 = arith.constant 4.471500e-02 : f32
    %230 = vector.broadcast %cst_76 : f32 to vector<24x512xf32>
    %231 = arith.mulf %230, %229 : vector<24x512xf32>
    %232 = arith.addf %227, %231 : vector<24x512xf32>
    %cst_77 = arith.constant 0.797884583 : f32
    %233 = vector.broadcast %cst_77 : f32 to vector<24x512xf32>
    %234 = arith.mulf %233, %232 : vector<24x512xf32>
    %235 = math.tanh %234 : vector<24x512xf32>
    %cst_78 = arith.constant 1.000000e+00 : f32
    %236 = vector.broadcast %cst_78 : f32 to vector<24x512xf32>
    %237 = arith.addf %236, %235 : vector<24x512xf32>
    %cst_79 = arith.constant 5.000000e-01 : f32
    %238 = vector.broadcast %cst_79 : f32 to vector<24x512xf32>
    %239 = arith.mulf %238, %237 : vector<24x512xf32>
    %240 = arith.mulf %227, %239 : vector<24x512xf32>
    %241 = arith.truncf %240 : vector<24x512xf32> to vector<24x512xbf16>
    %c0_80 = arith.constant 0 : index
    %c0_81 = arith.constant 0 : index
    %c0_82 = arith.constant 0 : index
    %242 = vector.load %arg14[%c0_80, %c0_81, %c0_82] : memref<1x512x128xbf16, #tpu.memory_space<vmem>>, vector<1x512x128xbf16>
    %243 = vector.shape_cast %242 : vector<1x512x128xbf16> to vector<512x128xbf16>
    %cst_83 = arith.constant dense<0.000000e+00> : vector<24x128xf32>
    %244 = tpu.matmul %241, %243, %cst_83 {dimension_numbers = #tpu.dot_dimension_numbers<[1], [0], [0], [1], [0, 0, 1, 1], [], []>} : vector<24x512xbf16>, vector<512x128xbf16>, vector<24x128xf32> -> vector<24x128xf32>
    %c0_84 = arith.constant 0 : index
    %c0_85 = arith.constant 0 : index
    %c0_86 = arith.constant 0 : index
    %245 = vector.load %arg15[%c0_84, %c0_85, %c0_86] : memref<1x1x128xf32, #tpu.memory_space<vmem>>, vector<1x1x128xf32>
    %246 = vector.shape_cast %245 : vector<1x1x128xf32> to vector<1x128xf32>
    %247 = vector.broadcast %246 : vector<1x128xf32> to vector<24x128xf32>
    %248 = arith.addf %244, %247 : vector<24x128xf32>
    %249 = arith.addf %193, %248 : vector<24x128xf32>
    %c0_87 = arith.constant 0 : index
    %c0_88 = arith.constant 0 : index
    %250 = vector.load %arg19[%c0_87, %c0_88] : memref<24x128xf32, #tpu.memory_space<vmem>>, vector<24x128xf32>
    tpu.vector_store %arg19[%c0_87, %c0_88], %249 {strides = array<i32>} : memref<24x128xf32, #tpu.memory_space<vmem>>, vector<24x128xf32>,
    %c1_i32 = arith.constant 1 : i32
    %251 = arith.cmpi eq, %arg0, %c1_i32 : i32
    %252 = arith.extui %251 : i1 to i32
    %c0_i32_89 = arith.constant 0 : i32
    %253 = arith.cmpi ne, %252, %c0_i32_89 : i32
    scf.if %253 {
      %c0_90 = arith.constant 0 : index
      %c0_91 = arith.constant 0 : index
      %254 = vector.load %arg16[%c0_90, %c0_91] : memref<1x128xf32, #tpu.memory_space<vmem>>, vector<1x128xf32>
      %c0_92 = arith.constant 0 : index
      %c0_93 = arith.constant 0 : index
      %255 = vector.load %arg17[%c0_92, %c0_93] : memref<1x128xf32, #tpu.memory_space<vmem>>, vector<1x128xf32>
      %cst_94 = arith.constant dense<0.000000e+00> : vector<24xf32>
      %256 = vector.multi_reduction <add>, %249, %cst_94 [1] : vector<24x128xf32> to vector<24xf32>
      %257 = vector.shape_cast %256 : vector<24xf32> to vector<24x1xf32>
      %cst_95 = arith.constant 1.280000e+02 : f32
      %258 = vector.broadcast %cst_95 : f32 to vector<24x1xf32>
      %259 = arith.divf %257, %258 : vector<24x1xf32>
      %260 = vector.broadcast %259 : vector<24x1xf32> to vector<24x128xf32>
      %261 = arith.subf %249, %260 : vector<24x128xf32>
      %262 = arith.mulf %261, %261 : vector<24x128xf32>
      %cst_96 = arith.constant dense<0.000000e+00> : vector<24xf32>
      %263 = vector.multi_reduction <add>, %262, %cst_96 [1] : vector<24x128xf32> to vector<24xf32>
      %264 = vector.shape_cast %263 : vector<24xf32> to vector<24x1xf32>
      %cst_97 = arith.constant 1.280000e+02 : f32
      %265 = vector.broadcast %cst_97 : f32 to vector<24x1xf32>
      %266 = arith.divf %264, %265 : vector<24x1xf32>
      %267 = vector.broadcast %259 : vector<24x1xf32> to vector<24x128xf32>
      %268 = arith.subf %249, %267 : vector<24x128xf32>
      %cst_98 = arith.constant 9.99999997E-7 : f32
      %269 = vector.broadcast %cst_98 : f32 to vector<24x1xf32>
      %270 = arith.addf %266, %269 : vector<24x1xf32>
      %271 = math.rsqrt %270 : vector<24x1xf32>
      %272 = vector.broadcast %271 : vector<24x1xf32> to vector<24x128xf32>
      %273 = arith.mulf %268, %272 : vector<24x128xf32>
      %274 = vector.broadcast %254 : vector<1x128xf32> to vector<24x128xf32>
      %275 = arith.mulf %273, %274 : vector<24x128xf32>
      %276 = vector.broadcast %255 : vector<1x128xf32> to vector<24x128xf32>
      %277 = arith.addf %275, %276 : vector<24x128xf32>
      %c0_99 = arith.constant 0 : index
      %c0_100 = arith.constant 0 : index
      %278 = vector.load %arg18[%c0_99, %c0_100] : memref<24x128xf32, #tpu.memory_space<vmem>>, vector<24x128xf32>
      tpu.vector_store %arg18[%c0_99, %c0_100], %277 {strides = array<i32>} : memref<24x128xf32, #tpu.memory_space<vmem>>, vector<24x128xf32>,
    } else {
    }
    return
  }
  func.func @transform_0(%arg0: i32) -> (i32, i32) {
    %c0_i32 = arith.constant 0 : i32
    %c0_i32_0 = arith.constant 0 : i32
    %c0_i32_1 = arith.constant 0 : i32
    return %c0_i32, %c0_i32_0 : i32, i32
  }
  func.func @transform_1(%arg0: i32) -> (i32, i32) {
    %c0_i32 = arith.constant 0 : i32
    %c0_i32_0 = arith.constant 0 : i32
    %c0_i32_1 = arith.constant 0 : i32
    return %c0_i32, %c0_i32_0 : i32, i32
  }
  func.func @transform_2(%arg0: i32) -> (i32, i32) {
    %c0_i32 = arith.constant 0 : i32
    %c0_i32_0 = arith.constant 0 : i32
    %c0_i32_1 = arith.constant 0 : i32
    return %c0_i32, %c0_i32_0 : i32, i32
  }
  func.func @transform_3(%arg0: i32) -> (i32, i32, i32) {
    %c0_i32 = arith.constant 0 : i32
    %c0_i32_0 = arith.constant 0 : i32
    %c0_i32_1 = arith.constant 0 : i32
    return %arg0, %c0_i32, %c0_i32_0 : i32, i32, i32
  }
  func.func @transform_4(%arg0: i32) -> (i32, i32, i32) {
    %c0_i32 = arith.constant 0 : i32
    %c0_i32_0 = arith.constant 0 : i32
    %c0_i32_1 = arith.constant 0 : i32
    return %arg0, %c0_i32, %c0_i32_0 : i32, i32, i32
  }
  func.func @transform_5(%arg0: i32) -> (i32, i32, i32) {
    %c0_i32 = arith.constant 0 : i32
    %c0_i32_0 = arith.constant 0 : i32
    %c0_i32_1 = arith.constant 0 : i32
    return %arg0, %c0_i32, %c0_i32_0 : i32, i32, i32
  }
  func.func @transform_6(%arg0: i32) -> (i32, i32, i32) {
    %c0_i32 = arith.constant 0 : i32
    %c0_i32_0 = arith.constant 0 : i32
    %c0_i32_1 = arith.constant 0 : i32
    return %arg0, %c0_i32, %c0_i32_0 : i32, i32, i32
  }
  func.func @transform_7(%arg0: i32) -> (i32, i32, i32) {
    %c0_i32 = arith.constant 0 : i32
    %c0_i32_0 = arith.constant 0 : i32
    %c0_i32_1 = arith.constant 0 : i32
    return %arg0, %c0_i32, %c0_i32_0 : i32, i32, i32
  }
  func.func @transform_8(%arg0: i32) -> (i32, i32, i32) {
    %c0_i32 = arith.constant 0 : i32
    %c0_i32_0 = arith.constant 0 : i32
    %c0_i32_1 = arith.constant 0 : i32
    return %arg0, %c0_i32, %c0_i32_0 : i32, i32, i32
  }
  func.func @transform_9(%arg0: i32) -> (i32, i32, i32) {
    %c0_i32 = arith.constant 0 : i32
    %c0_i32_0 = arith.constant 0 : i32
    %c0_i32_1 = arith.constant 0 : i32
    return %arg0, %c0_i32, %c0_i32_0 : i32, i32, i32
  }
  func.func @transform_10(%arg0: i32) -> (i32, i32, i32) {
    %c0_i32 = arith.constant 0 : i32
    %c0_i32_0 = arith.constant 0 : i32
    %c0_i32_1 = arith.constant 0 : i32
    return %arg0, %c0_i32, %c0_i32_0 : i32, i32, i32
  }
  func.func @transform_11(%arg0: i32) -> (i32, i32, i32) {
    %c0_i32 = arith.constant 0 : i32
    %c0_i32_0 = arith.constant 0 : i32
    %c0_i32_1 = arith.constant 0 : i32
    return %arg0, %c0_i32, %c0_i32_0 : i32, i32, i32
  }
  func.func @transform_12(%arg0: i32) -> (i32, i32, i32) {
    %c0_i32 = arith.constant 0 : i32
    %c0_i32_0 = arith.constant 0 : i32
    %c0_i32_1 = arith.constant 0 : i32
    return %arg0, %c0_i32, %c0_i32_0 : i32, i32, i32
  }
  func.func @transform_13(%arg0: i32) -> (i32, i32, i32) {
    %c0_i32 = arith.constant 0 : i32
    %c0_i32_0 = arith.constant 0 : i32
    %c0_i32_1 = arith.constant 0 : i32
    return %arg0, %c0_i32, %c0_i32_0 : i32, i32, i32
  }
  func.func @transform_14(%arg0: i32) -> (i32, i32, i32) {
    %c0_i32 = arith.constant 0 : i32
    %c0_i32_0 = arith.constant 0 : i32
    %c0_i32_1 = arith.constant 0 : i32
    return %arg0, %c0_i32, %c0_i32_0 : i32, i32, i32
  }
  func.func @transform_15(%arg0: i32) -> (i32, i32) {
    %c0_i32 = arith.constant 0 : i32
    %c0_i32_0 = arith.constant 0 : i32
    %c0_i32_1 = arith.constant 0 : i32
    return %c0_i32, %c0_i32_0 : i32, i32
  }
  func.func @transform_16(%arg0: i32) -> (i32, i32) {
    %c0_i32 = arith.constant 0 : i32
    %c0_i32_0 = arith.constant 0 : i32
    %c0_i32_1 = arith.constant 0 : i32
    return %c0_i32, %c0_i32_0 : i32, i32
  }
  func.func @transform_17(%arg0: i32) -> (i32, i32) {
    %c0_i32 = arith.constant 0 : i32
    %c0_i32_0 = arith.constant 0 : i32
    %c0_i32_1 = arith.constant 0 : i32
    return %c0_i32, %c0_i32_0 : i32, i32
  }
}

</mosaic_0001>

<bundles_post_ra>
// kernel: tpu_custom_call.1
= control target key start
LH: loop header
LB: loop body
LE: loop exit
PB: predicated region body
PF: predicated region fallthrough
CT: control target
= control target key end

     0   :  { %s6017_s0 = inlined_call_operand.hbm [shape: bf16[24,256], index: 0, kind: input, shape index: {}]   ;;  %s6018_s1 = inlined_call_operand.hbm [shape: bf16[256,128], index: 1, kind: input, shape index: {}]   ;;  %s6019_s2 = inlined_call_operand.hbm [shape: f32[24,128], index: 2, kind: input, shape index: {}]   ;;  %s6020_s3 = inlined_call_operand.vmem [shape: f32[2,1,128], index: 3, kind: input, shape index: {}]   ;;  %s6021_s4 = inlined_call_operand.hbm [shape: f32[2,1,128], index: 4, kind: input, shape index: {}]   ;;  %s6022_s5 = inlined_call_operand.hbm [shape: bf16[2,128,384], index: 5, kind: input, shape index: {}]   ;;  %s6023_s6 = inlined_call_operand.hbm [shape: f32[2,1,384], index: 6, kind: input, shape index: {}]   ;;  %s6024_s7 = inlined_call_operand.hbm [shape: bf16[2,128,128], index: 7, kind: input, shape index: {}]   ;;  %s6025_s8 = inlined_call_operand.hbm [shape: f32[2,1,128], index: 8, kind: input, shape index: {}]   ;;  %s6026_s9 = inlined_call_operand.hbm [shape: f32[2,1,128], index: 9, kind: input, shape index: {}]   ;;  %s6027_s10 = inlined_call_operand.hbm [shape: f32[2,1,128], index: 10, kind: input, shape index: {}]   ;;  %s6028_s11 = inlined_call_operand.hbm [shape: bf16[2,128,512], index: 11, kind: input, shape index: {}]   ;;  %s6029_s12 = inlined_call_operand.vmem [shape: f32[2,1,512], index: 12, kind: input, shape index: {}]   ;;  %s6030_s13 = inlined_call_operand.hbm [shape: bf16[2,512,128], index: 13, kind: input, shape index: {}]   ;;  %s6031_s14 = inlined_call_operand.vmem [shape: f32[2,1,128], index: 14, kind: input, shape index: {}]   ;;  %s6032_s15 = inlined_call_operand.vmem [shape: f32[1,128], index: 15, kind: input, shape index: {}]   ;;  %s6033_s16 = inlined_call_operand.vmem [shape: f32[1,128], index: 16, kind: input, shape index: {}]   ;;  %s6034_s17 = inlined_call_operand.hbm [shape: f32[24,128], index: 17, kind: output, shape index: {}]  }
   0x1   :  { %6052 = sst [smem:[#allocation39_spill]] %s6017_s0 }
   0x2   :  { %6053 = sst [smem:[#allocation40_spill]] %s6018_s1 }
   0x3   :  { %6054 = sst [smem:[#allocation41_spill]] %s6020_s3 }
   0x4   :  { %6055 = sst [smem:[#allocation42_spill]] %s6021_s4 }
   0x5   :  { %6056 = sst [smem:[#allocation43_spill]] %s6029_s12 }
   0x6   :  { %6057 = sst [smem:[#allocation44_spill]] %s6030_s13 }
   0x7   :  { %6058 = sst [smem:[#allocation45_spill]] %s6031_s14 }
   0x8   :  { %6059 = sst [smem:[#allocation46_spill]] %s6032_s15 }
   0x9   :  { %6060 = sst [smem:[#allocation47_spill]] %s6033_s16 }
   0xa   :  { %6061 = sst [smem:[#allocation48_spill]] %s6034_s17 }
   0xb   :  { %22 = vsyncpa [#allocation4], 0 }
   0xc   :  { %23 = vsyncpa [#allocation7], 0 }
   0xd   :  { %24 = vsyncpa [#allocation10], 0 }
   0xe   :  { %26 = vsyncpa [#allocation10 + $0x1], 0 }
   0xf   :  { %27 = vsyncpa [#allocation13], 0 }
  0x10   :  { %29 = vsyncpa [#allocation13 + $0x1], 0 }
  0x11   :  { %30 = vsyncpa [#allocation16], 0 }
  0x12   :  { %32 = vsyncpa [#allocation16 + $0x1], 0 }
  0x13   :  { %33 = vsyncpa [#allocation19], 0 }
  0x14   :  { %35 = vsyncpa [#allocation19 + $0x1], 0 }
  0x15   :  { %36 = vsyncpa [#allocation22], 0 }
  0x16   :  { %38 = vsyncpa [#allocation22 + $0x1], 0 }
  0x17   :  { %39 = vsyncpa [#allocation5], 0  ;;  %s5009_s24 = smov 0   ;;  %s5011_s25 = smov 0  }
  0x18   :  { %s5013_s26 = smov 0   ;;  %s5015_s27 = smov 0  }
  0x19 LB: > { %6062 = sst [smem:[#allocation32_spill]] %s4891_s25  ;;  %s5028_s28 = sadd.s32 4294967295, %s4899_s27   ;;  %s4899_s27 = sphi %s5015_s27, %s6101_s27   ;;  %s4895_s26 = sphi %s5013_s26, %s6104_s26   ;;  %s4891_s25 = sphi %s5011_s25, %s6103_s25   ;;  %s4887_s24 = sphi %s5009_s24, %s6102_s24  }
  0x1a   : > { %6063 = sst [smem:[#allocation33_spill]] %s4895_s26  ;;  %s5031_s29 = sadd.s32 1, %s4899_s27  }
  0x1b   : > { %6064 = sst [smem:[#allocation34_spill]] %s5028_s28  ;;  %s138_s0 = ssub.s32 %s4899_s27, %s5031_s29 }
  0x1c   : > { %6065 = sst [smem:[#allocation35_spill]] %s5031_s29  ;;  %s141_s30 = sadd.s32 1, %s4895_s26 }
  0x1d   : > { %p139_p0 = scmp.eq.s32.totalorder %s138_s0, 0  ;;  %p148_p1 = scmp.ne.s32.totalorder %s4895_s26, %s4891_s25 }
  0x1e   : > { %p149_p2 = scmp.eq.s32.totalorder %s4899_s27, 0  ;;  %p154_p3 = scmp.ne.s32.totalorder %s4891_s25, %s4887_s24 }
  0x1f   : > { %s5041_s18 = scalar_select %p139_p0, %s4895_s26, %s141_s30  }
  0x20   : > { %p5043_p4 = por %p149_p2, %p148_p1  ;;  %p155_p5 = scmp.eq.s32.totalorder %s5028_s28, 0 }
  0x21   : > { %6066 = sst [smem:[#allocation36_spill]] %s5041_s18  ;;  %p3544_p6 = scmp.ge.s32.totalorder %s4899_s27, 1 }
  0x22   : > { %p488_p7 = scmp.lt.s32.totalorder %s4899_s27, 3  ;;  %p5052_p8 = por %p155_p5, %p154_p3 }
  0x23   : > { %p3545_p9 = scmp.ne.s32.totalorder %s5028_s28, 0  ;;  %s6072_s23 = sld [smem:[#allocation40_spill]] }
  0x24   : > { %s6068_s1 = scalar_select %p5052_p8, 1, 0 }
  0x25   : > { %p5057_p10 = pnand %p3544_p6, %p488_p7  ;;  %s4901_s0 = smov [#allocation6]  }
  0x26   : > { %6069 = sst [smem:[#allocation37_spill]] %s6068_s1  ;;  %s515_s30 = sshll.u32 %s4901_s0, 4  ;;  %s516_s30 = int_to_ptr.vmem [resolvable:$true] %s515_s30 }
  0x27   : > { %s6070_s20 = scalar_select %p5057_p10, 1, 0 }
  0x28   : > { %p4218_p11 = pneg %p5057_p10  ;;  %p4259_p13 = scmp.lt.s32.totalorder %s4899_s27, 2 }
  0x29   : > { %6071 = sst [smem:[#allocation38_spill]] %s6070_s20  ;;  %s513_s24 = sshll.u32 %s6072_s23, 4  ;;  %s514_s24 = int_to_ptr.hbm [resolvable:$true] %s513_s24 }
  0x2a   : > { %p5068_p12 = pnand %p4218_p11, %p155_p5  ;;  %s5074_s29 = sand.u32 1, %s4899_s27  }
  0x2b   : > { %s6039_s17 = smov 64   ;;  %s6041_s21 = smov 4  }
  0x2c   : > { %4224 = dma.hbm_to_vmem [thread:$0]  (!%p5068_p12), %s514_s24, 2048, %s516_s30, [#allocation7], %s6039_s17, %s6039_s17, %s6041_s21  }
  0x2d   : > { %p5083_p0 = pnand %p4259_p13, %p5043_p4  ;;  %s5088_s23 = sand.u32 1, %s4895_s26  }
  0x2e   : > { %s6075_s4 = sld [smem:[#allocation42_spill]]  ;;  %s558_s12 = scalar_lea.vmem [#allocation9], %s5088_s23 }
  0x2f   : > { %s565_s3 = sshll.u32 %s558_s12, 4  ;;  %s556_s1 = scalar_lea.sflag [#allocation10], %s5074_s29  ;;  %s566_s3 = int_to_ptr.vmem [resolvable:$true] %s565_s3 }
  0x30   : > { %p5098_p2 = pneg %p5083_p0 }
  0x34   : > { %s561_s15 = scalar_lea.hbm %s6075_s4, %s4899_s27  ;;  %s4486_s12 = scalar_lea.hbm %s6075_s4, 2 }
  0x35   : > { %s563_s14 = sshll.u32 %s561_s15, 4  ;;  %s564_s14 = int_to_ptr.hbm [resolvable:$true] %s563_s14 }
  0x36   : > { %s4479_s24 = sshra.s32 %s564_s14, 4  ;;  %s4480_s24 = int_to_ptr.hbm [resolvable:$true] %s4479_s24 }
  0x37   : > { %s4481_s19 = scalar_lea.hbm %s4480_s24, 1  ;;  %p4487_p6 = scmp.lt.s32.totalorder %s4480_s24, %s6075_s4 }
  0x38   : > { %p4482_p1 = scmp.ne.s32.totalorder %s4480_s24, %s4481_s19  ;;  %p4488_p7 = scmp.lt.s32.totalorder %s4486_s12, %s4481_s19 }
  0x3a   : > { %p4484_p3 = pnand %p5098_p2, %p4482_p1  ;;  %p4489_p11 = por %p4488_p7, %p4487_p6 }
  0x3c   : > { %p4485_p4 = pneg %p4484_p3 }
  0x3e   : > { %p4490_p13 = pnand %p4489_p11, %p4485_p4 }
  0x40   : > { %4493 = shalt.err (!%p4490_p13)
}
  0x41   : > { %4231 = dma.hbm_to_vmem [thread:$0]  (!%p5083_p0), %s564_s14, 16, %s566_s3, %s556_s1  }
  0x42   : > { %s4180_s16 = smul.u32 3, %s5088_s23  ;;  %s641_s25 = scalar_lea.hbm %s6025_s8, %s4899_s27 }
  0x43   : > { %s4181_s15 = smul.u32 3, %s4899_s27  ;;  %s6049_s28 = scalar_lea.sflag [#allocation13], %s5074_s29 }
  0x44   : > { %s598_s24 = scalar_lea.vmem [#allocation12], %s4180_s16  ;;  %s4516_s26 = scalar_lea.hbm %s6023_s6, 6 }
  0x45   : > { %s602_s17 = scalar_lea.hbm %s6023_s6, %s4181_s15  ;;  %s606_s19 = sshll.u32 %s598_s24, 4  ;;  %s607_s19 = int_to_ptr.vmem [resolvable:$true] %s606_s19 }
  0x46   : > { %s604_s12 = sshll.u32 %s602_s17, 4  ;;  %s605_s12 = int_to_ptr.hbm [resolvable:$true] %s604_s12 }
  0x47   : > { %s4509_s20 = sshra.s32 %s605_s12, 4  ;;  %s4510_s20 = int_to_ptr.hbm [resolvable:$true] %s4509_s20 }
  0x48   : > { %s4511_s13 = scalar_lea.hbm %s4510_s20, 3  ;;  %p4517_p6 = scmp.lt.s32.totalorder %s4510_s20, %s6023_s6 }
  0x49   : > { %p4512_p1 = scmp.ne.s32.totalorder %s4510_s20, %s4511_s13  ;;  %p4518_p7 = scmp.lt.s32.totalorder %s4516_s26, %s4511_s13 }
  0x4b   : > { %p4514_p3 = pnand %p4512_p1, %p5098_p2  ;;  %p4519_p11 = por %p4518_p7, %p4517_p6 }
  0x4d   : > { %p4515_p4 = pneg %p4514_p3 }
  0x4f   : > { %p4520_p13 = pnand %p4519_p11, %p4515_p4 }
  0x51   : > { %4523 = shalt.err (!%p4520_p13)
}
  0x52   : > { %4237 = dma.hbm_to_vmem [thread:$0]  (!%p5083_p0), %s605_s12, 48, %s607_s19, %s6049_s28  }
  0x53   : > { %s643_s4 = sshll.u32 %s641_s25, 4  ;;  %s638_s15 = scalar_lea.vmem [#allocation15], %s5088_s23  ;;  %s644_s4 = int_to_ptr.hbm [resolvable:$true] %s643_s4 }
  0x54   : > { %s645_s17 = sshll.u32 %s638_s15, 4  ;;  %s6051_s24 = scalar_lea.sflag [#allocation16], %s5074_s29  ;;  %s646_s17 = int_to_ptr.vmem [resolvable:$true] %s645_s17 }
  0x55   : > { %s4539_s0 = sshra.s32 %s644_s4, 4  ;;  %s4546_s14 = scalar_lea.hbm %s6025_s8, 2  ;;  %s4540_s0 = int_to_ptr.hbm [resolvable:$true] %s4539_s0 }
  0x56   : > { %s4541_s13 = scalar_lea.hbm %s4540_s0, 1  ;;  %p4547_p6 = scmp.lt.s32.totalorder %s4540_s0, %s6025_s8 }
  0x57   : > { %p4542_p1 = scmp.ne.s32.totalorder %s4540_s0, %s4541_s13  ;;  %p4548_p7 = scmp.lt.s32.totalorder %s4546_s14, %s4541_s13 }
  0x59   : > { %p4544_p3 = pnand %p4542_p1, %p5098_p2  ;;  %p4549_p11 = por %p4548_p7, %p4547_p6 }
  0x5b   : > { %p4545_p4 = pneg %p4544_p3 }
  0x5d   : > { %p4550_p13 = pnand %p4549_p11, %p4545_p4 }
  0x5f   : > { %4553 = shalt.err (!%p4550_p13)
}
  0x60   : > { %4243 = dma.hbm_to_vmem [thread:$0]  (!%p5083_p0), %s644_s4, 16, %s646_s17, %s6051_s24  }
  0x61   : > { %s675_s12 = scalar_lea.hbm %s6027_s10, %s4899_s27  ;;  %s672_s16 = scalar_lea.vmem [#allocation18], %s5088_s23 }
  0x62   : > { %s679_s15 = sshll.u32 %s672_s16, 4  ;;  %s677_s0 = sshll.u32 %s675_s12, 4  ;;  %s680_s15 = int_to_ptr.vmem [resolvable:$true] %s679_s15  ;;  %s678_s0 = int_to_ptr.hbm [resolvable:$true] %s677_s0 }
  0x63   : > { %s6077_s3 = sld [smem:[#allocation39_spill]]  ;;  %s6050_s26 = scalar_lea.sflag [#allocation19], %s5074_s29 }
  0x64   : > { %s4569_s21 = sshra.s32 %s678_s0, 4  ;;  %s4576_s25 = scalar_lea.hbm %s6027_s10, 2  ;;  %s4570_s21 = int_to_ptr.hbm [resolvable:$true] %s4569_s21 }
  0x65   : > { %s4571_s28 = scalar_lea.hbm %s4570_s21, 1  ;;  %p4577_p6 = scmp.lt.s32.totalorder %s4570_s21, %s6027_s10 }
  0x66   : > { %p4572_p1 = scmp.ne.s32.totalorder %s4570_s21, %s4571_s28  ;;  %p4578_p7 = scmp.lt.s32.totalorder %s4576_s25, %s4571_s28 }
  0x68   : > { %p4574_p3 = pnand %p4572_p1, %p5098_p2  ;;  %p4579_p11 = por %p4578_p7, %p4577_p6 }
  0x69   : > { %s499_s14 = sshll.u32 %s6077_s3, 4  ;;  %s500_s14 = int_to_ptr.hbm [resolvable:$true] %s499_s14 }
  0x6a   : > { %p4575_p4 = pneg %p4574_p3 }
  0x6c   : > { %p4580_p13 = pnand %p4579_p11, %p4575_p4 }
  0x6e   : > { %4583 = shalt.err (!%p4580_p13)
}
  0x6f   : > { %4249 = dma.hbm_to_vmem [thread:$0]  (!%p5083_p0), %s678_s0, 16, %s680_s15, %s6050_s26  }
  0x70   : > { %s4904_s16 = smov [#allocation3]   ;;  %s4905_s20 = smov 128  }
  0x71   : > { %s501_s13 = sshll.u32 %s4904_s16, 4  ;;  %s4906_s3 = smov 8   ;;  %s502_s13 = int_to_ptr.vmem [resolvable:$true] %s501_s13 }
  0x72   : > { %4221 = dma.hbm_to_vmem [thread:$0]  (!%p5068_p12), %s500_s14, 384, %s502_s13, [#allocation4], %s4905_s20, %s4905_s20, %s4906_s3  }
  0x73   : > { %s527_s4 = sshll.u32 %s6019_s2, 4  ;;  %s4907_s17 = smov [#allocation8]   ;;  %s528_s4 = int_to_ptr.hbm [resolvable:$true] %s527_s4 }
  0x74   : > { %s529_s25 = sshll.u32 %s4907_s17, 4  ;;  %s4178_s19 = smul.u32 192, %s5088_s23  ;;  %s530_s25 = int_to_ptr.vmem [resolvable:$true] %s529_s25 }
  0x75   : > { %4227 = dma.hbm_to_vmem [thread:$0]  (!%p5068_p12), %s528_s4, 384, %s530_s25, [#allocation7], %s4905_s20, %s4905_s20, %s4906_s3  }
  0x76   : > { %s4179_s15 = smul.u32 192, %s4899_s27  ;;  %s576_s0 = scalar_lea.vmem [#allocation11], %s4178_s19 }
  0x77   : > { %s584_s12 = sshll.u32 %s576_s0, 4  ;;  %s3550_s13 = sshll.u32 %s5088_s23, 6  ;;  %s585_s12 = int_to_ptr.vmem [resolvable:$true] %s584_s12 }
  0x78   : > { %s581_s24 = scalar_lea.hbm %s6022_s5, %s4179_s15  ;;  %s4666_s3 = scalar_lea.hbm %s6022_s5, 384 }
  0x79   : > { %s582_s14 = sshll.u32 %s581_s24, 4  ;;  %s583_s14 = int_to_ptr.hbm [resolvable:$true] %s582_s14 }
  0x7a   : > { %s4659_s28 = sshra.s32 %s583_s14, 4  ;;  %s4660_s28 = int_to_ptr.hbm [resolvable:$true] %s4659_s28 }
  0x7b   : > { %s4661_s21 = scalar_lea.hbm %s4660_s28, 192  ;;  %p4667_p12 = scmp.lt.s32.totalorder %s4660_s28, %s6022_s5 }
  0x7c   : > { %p4662_p1 = scmp.ne.s32.totalorder %s4660_s28, %s4661_s21  ;;  %p4668_p6 = scmp.lt.s32.totalorder %s4666_s3, %s4661_s21 }
  0x7e   : > { %p4664_p3 = pnand %p4662_p1, %p5098_p2  ;;  %p4669_p7 = por %p4668_p6, %p4667_p12 }
  0x80   : > { %p4665_p4 = pneg %p4664_p3 }
  0x82   : > { %p4670_p11 = pnand %p4669_p7, %p4665_p4 }
  0x84   : > { %4673 = shalt.err (!%p4670_p11)
}
  0x85   : > { %s4908_s24 = smov 192   ;;  %s4909_s26 = smov 12  }
  0x86   : > { %4234 = dma.hbm_to_vmem [thread:$0]  (!%p5083_p0), %s583_s14, 3072, %s585_s12, %s556_s1, %s4908_s24, %s4908_s24, %s4909_s26  }
  0x87   : > { %s4045_s25 = sshll.u32 %s4899_s27, 6  ;;  %s617_s16 = scalar_lea.vmem [#allocation14], %s3550_s13 }
  0x88   : > { %s622_s0 = scalar_lea.hbm %s6024_s7, %s4045_s25  ;;  %s625_s28 = sshll.u32 %s617_s16, 4  ;;  %s626_s28 = int_to_ptr.vmem [resolvable:$true] %s625_s28 }
  0x89   : > { %s623_s21 = sshll.u32 %s622_s0, 4  ;;  %s4696_s1 = scalar_lea.hbm %s6024_s7, 128  ;;  %s624_s21 = int_to_ptr.hbm [resolvable:$true] %s623_s21 }
  0x8a   : > { %s4689_s18 = sshra.s32 %s624_s21, 4  ;;  %s4690_s18 = int_to_ptr.hbm [resolvable:$true] %s4689_s18 }
  0x8b   : > { %s4691_s20 = scalar_lea.hbm %s4690_s18, 64  ;;  %p4697_p4 = scmp.lt.s32.totalorder %s4690_s18, %s6024_s7 }
  0x8c   : > { %p4692_p13 = scmp.ne.s32.totalorder %s4690_s18, %s4691_s20  ;;  %p4698_p12 = scmp.lt.s32.totalorder %s4696_s1, %s4691_s20 }
  0x8e   : > { %p4694_p1 = pnand %p4692_p13, %p5098_p2  ;;  %p4699_p6 = por %p4698_p12, %p4697_p4 }
  0x90   : > { %p4695_p3 = pneg %p4694_p1 }
  0x92   : > { %p4700_p7 = pnand %p4699_p6, %p4695_p3 }
  0x94   : > { %4703 = shalt.err (!%p4700_p7)
}
  0x95   : > { %s6078_s13 = smov 4   ;;  %s6079_s17 = smov 64  }
  0x96   : > { %s6080_s24 = scalar_lea.sflag [#allocation13], %s5074_s29  ;;  %s658_s19 = scalar_lea.hbm %s6026_s9, %s4899_s27 }
  0x97   : > { %4240 = dma.hbm_to_vmem [thread:$0]  (!%p5083_p0), %s624_s21, 1024, %s626_s28, %s6080_s24, %s6079_s17, %s6079_s17, %s6078_s13  }
  0x98   : > { %s655_s15 = scalar_lea.vmem [#allocation17], %s5088_s23  ;;  %s660_s16 = sshll.u32 %s658_s19, 4  ;;  %s661_s16 = int_to_ptr.hbm [resolvable:$true] %s660_s16 }
  0x99   : > { %s662_s0 = sshll.u32 %s655_s15, 4  ;;  %s3553_s18 = sshll.u32 %s5088_s23, 8  ;;  %s663_s0 = int_to_ptr.vmem [resolvable:$true] %s662_s0 }
  0x9a   : > { %s4719_s20 = sshra.s32 %s661_s16, 4  ;;  %s4726_s28 = scalar_lea.hbm %s6026_s9, 2  ;;  %s4720_s20 = int_to_ptr.hbm [resolvable:$true] %s4719_s20 }
  0x9b   : > { %s4721_s3 = scalar_lea.hbm %s4720_s20, 1  ;;  %p4727_p3 = scmp.lt.s32.totalorder %s4720_s20, %s6026_s9 }
  0x9c   : > { %p4722_p11 = scmp.ne.s32.totalorder %s4720_s20, %s4721_s3  ;;  %p4728_p4 = scmp.lt.s32.totalorder %s4726_s28, %s4721_s3 }
  0x9e   : > { %p4724_p13 = pnand %p4722_p11, %p5098_p2  ;;  %p4729_p12 = por %p4728_p4, %p4727_p3 }
  0xa0   : > { %p4725_p1 = pneg %p4724_p13 }
  0xa2   : > { %p4730_p6 = pnand %p4729_p12, %p4725_p1 }
  0xa4   : > { %4733 = shalt.err (!%p4730_p6)
}
  0xa5   : > { %s6081_s14 = scalar_lea.sflag [#allocation16], %s5074_s29  ;;  %s4046_s24 = sshll.u32 %s4899_s27, 8 }
  0xa6   : > { %4246 = dma.hbm_to_vmem [thread:$0]  (!%p5083_p0), %s661_s16, 16, %s663_s0, %s6081_s14  }
  0xa7   : > { %s695_s19 = scalar_lea.hbm %s6028_s11, %s4046_s24  ;;  %s690_s15 = scalar_lea.vmem [#allocation20], %s3553_s18 }
  0xa8   : > { %s698_s20 = sshll.u32 %s690_s15, 4  ;;  %s696_s3 = sshll.u32 %s695_s19, 4  ;;  %s699_s20 = int_to_ptr.vmem [resolvable:$true] %s698_s20  ;;  %s697_s3 = int_to_ptr.hbm [resolvable:$true] %s696_s3 }
  0xa9   : > { %s4749_s4 = sshra.s32 %s697_s3, 4  ;;  %s4756_s27 = scalar_lea.hbm %s6028_s11, 512  ;;  %s4750_s4 = int_to_ptr.hbm [resolvable:$true] %s4749_s4 }
  0xaa   : > { %s4751_s1 = scalar_lea.hbm %s4750_s4, 256  ;;  %p4757_p1 = scmp.lt.s32.totalorder %s4750_s4, %s6028_s11 }
  0xab   : > { %p4752_p7 = scmp.ne.s32.totalorder %s4750_s4, %s4751_s1  ;;  %p4758_p3 = scmp.lt.s32.totalorder %s4756_s27, %s4751_s1 }
  0xad   : > { %p4754_p11 = pnand %p4752_p7, %p5098_p2  ;;  %p4759_p4 = por %p4758_p3, %p4757_p1 }
  0xaf   : > { %p4755_p13 = pneg %p4754_p11 }
  0xb1   : > { %p4760_p12 = pnand %p4759_p4, %p4755_p13 }
  0xb3   : > { %4763 = shalt.err (!%p4760_p12)
}
  0xb4   : > { %s4910_s12 = smov 256   ;;  %s4911_s14 = smov 16  }
  0xb5   : > { %s6082_s26 = scalar_lea.sflag [#allocation19], %s5074_s29  ;;  %s6083_s15 = sld [smem:[#allocation44_spill]] }
  0xb6   : > { %4252 = dma.hbm_to_vmem [thread:$0]  (!%p5083_p0), %s697_s3, 4096, %s699_s20, %s6082_s26, %s4910_s12, %s4910_s12, %s4911_s14  }
  0xb7   : > { %s719_s4 = scalar_lea.vmem [#allocation21], %s3553_s18  ;;  %s716_s27 = scalar_lea.sflag [#allocation22], %s5088_s23 }
  0xb8   : > { %s727_s1 = sshll.u32 %s719_s4, 4  ;;  %s728_s1 = int_to_ptr.vmem [resolvable:$true] %s727_s1 }
  0xbb   : > { %s724_s28 = scalar_lea.hbm %s6083_s15, %s4046_s24  ;;  %s4786_s3 = scalar_lea.hbm %s6083_s15, 512 }
  0xbc   : > { %s725_s0 = sshll.u32 %s724_s28, 4  ;;  %s726_s0 = int_to_ptr.hbm [resolvable:$true] %s725_s0 }
  0xbd   : > { %s4779_s16 = sshra.s32 %s726_s0, 4  ;;  %s4780_s16 = int_to_ptr.hbm [resolvable:$true] %s4779_s16 }
  0xbe   : > { %s4781_s21 = scalar_lea.hbm %s4780_s16, 256  ;;  %p4787_p13 = scmp.lt.s32.totalorder %s4780_s16, %s6083_s15 }
  0xbf   : > { %p4782_p6 = scmp.ne.s32.totalorder %s4780_s16, %s4781_s21  ;;  %p4788_p1 = scmp.lt.s32.totalorder %s4786_s3, %s4781_s21 }
  0xc1   : > { %p4784_p7 = pnand %p4782_p6, %p5098_p2  ;;  %p4789_p3 = por %p4788_p1, %p4787_p13 }
  0xc3   : > { %p4785_p11 = pneg %p4784_p7 }
  0xc5   : > { %p4790_p4 = pnand %p4789_p3, %p4785_p11 }
  0xc7   : > { %4793 = shalt.err (!%p4790_p4)
}
  0xc8   : > { %4255 = dma.hbm_to_vmem [thread:$0]  (!%p5083_p0), %s726_s0, 4096, %s728_s1, %s716_s27, %s6079_s17, %s6079_s17, %s6078_s13  }
  0xc9   : > { %745 = sbr.rel (%p5057_p10) target bundleno = 3162 (0xc5a), region = 88  ;;  %s6085_s30 = sld [smem:[#allocation34_spill]] (!%p5057_p10) }
  0xce   : > { %4854 = dma.done.wait (%p155_p5), [#allocation4], 384  }
  0xcf   : > { %4856 = vsyncadd (%p155_p5), [#allocation4], 4294966912 }
  0xd0   : > { %4858 = dma.done.wait (%p155_p5), [#allocation7], 2432  }
  0xd1   : > { %4860 = vsyncadd (%p155_p5), [#allocation7], 4294964864  ;;  %s6086_s22 = sld [smem:[#allocation32_spill]]  ;;  %s762_s14 = sand.u32 1, %s6085_s30  }
  0xd2   : > { %s763_s17 = scalar_lea.sflag [#allocation10], %s762_s14 }
  0xd7   : > { %s5282_s13 = sand.u32 1, %s6086_s22  }
  0xd8   : > { %s765_s26 = scalar_lea.vmem [#allocation9], %s5282_s13 }
  0xd9   : > { %4862 = dma.done.wait (%p5052_p8), %s763_s17, 3088  }
  0xda   : > { %4864 = vsyncadd (%p5052_p8), %s763_s17, 4294964208  ;;  %s4182_s25 = smul.u32 192, %s5282_s13  ;;  %s782_s0 = scalar_lea.sflag [#allocation13], %s762_s14 }
  0xdb   : > { %s4183_s19 = smul.u32 3, %s5282_s13 }
  0xdc   : > { %s5291_s28 = scalar_lea.vmem [#allocation11], %s4182_s25 }
  0xdd   : > { %s5293_s4 = scalar_lea.vmem [#allocation12], %s4183_s19 }
  0xde   : > { %4866 = dma.done.wait (%p5052_p8), %s782_s0, 1072  }
  0xdf   : > { %4868 = vsyncadd (%p5052_p8), %s782_s0, 4294966224  ;;  %s3563_s1 = sshll.u32 %s5282_s13, 6  ;;  %s802_s16 = scalar_lea.sflag [#allocation16], %s762_s14 }
  0xe0   : > { %s5300_s27 = scalar_lea.vmem [#allocation14], %s3563_s1 }
  0xe1   : > { %4870 = dma.done.wait (%p5052_p8), %s802_s16, 32  }
  0xe2   : > { %4872 = vsyncadd (%p5052_p8), %s802_s16, 4294967264  ;;  %s820_s20 = scalar_lea.sflag [#allocation19], %s762_s14 }
  0xe3   : > { %4874 = dma.done.wait (%p5052_p8), %s820_s20, 4112  }
  0xe4   : > { %4876 = vsyncadd (%p5052_p8), %s820_s20, 4294963184  ;;  %s3564_s12 = sshll.u32 %s5282_s13, 8  ;;  %s839_s23 = scalar_lea.sflag [#allocation22], %s5282_s13 }
  0xe5   : > { %s5314_s24 = scalar_lea.vmem [#allocation20], %s3564_s12  ;;  %s5317_s22 = scalar_lea.vmem [#allocation21], %s3564_s12 }
  0xe6   : > { %4878 = dma.done.wait (%p5052_p8), %s839_s23, 4096  }
  0xe7   : > { %4880 = vsyncadd (%p5052_p8), %s839_s23, 4294963200  ;;  %p935_p5 = scmp.lt.s32.totalorder %s6085_s30, 1  ;;  %s6088_s19 = sld [smem:[#allocation41_spill]] }
  0xe8   : > { %s6089_s12 = sld [smem:[#allocation43_spill]] }
  0xe9   : > { %s5325_s14 = scalar_select %p935_p5, %s6085_s30, 1 }
  0xea   : > { %s6090_s29 = sld [smem:[#allocation45_spill]] }
  0xeb   : > { %s3566_s1 = sshll.u32 %s5325_s14, 2 }
  0xec   : > { %949 = sbr.rel (%p3545_p9) target bundleno = 414 (0x19e), region = 140 }
  0xed   : > { %s937_s0 = scalar_lea.vmem %s6088_s19, %s5325_s14 }
  0xee   : > { %s5335_s3 = scalar_lea.vmem %s6089_s12, %s3566_s1 }
  0xf0   : > { %s944_s21 = scalar_lea.vmem %s6090_s29, %s5325_s14 }
  0xf1   : > { %v4057_v0 = vld [vmem:[#allocation6 + $0x38] sm:$0xff]  ;;  %v4056_v2 = vld [vmem:[#allocation6 + $0x30] sm:$0xff]  ;;  %v4055_v4 = vld [vmem:[#allocation6 + $0x28] sm:$0xff] }
  0xf2   : > { %v4065_v1 = vld [vmem:[#allocation6 + $0x78] sm:$0xff]  ;;  %1101 = vmatpush.bf16.msra.mxu0 %v4057_v0  ;;  %4162 = vmatpush.bf16.msra.mxu2 %v4057_v0  ;;  %v4064_v3 = vld [vmem:[#allocation6 + $0x70] sm:$0xff]  ;;  %v4063_v5 = vld [vmem:[#allocation6 + $0x68] sm:$0xff] }
  0xf3   : > { %1119 = vmatpush.bf16.msra.mxu1 %v4065_v1  ;;  %4170 = vmatpush.bf16.msra.mxu3 %v4065_v1  ;;  %v4054_v6 = vld [vmem:[#allocation6 + $0x20] sm:$0xff]  ;;  %v4053_v8 = vld [vmem:[#allocation6 + $0x18] sm:$0xff]  ;;  %v4052_v10 = vld [vmem:[#allocation6 + $0x10] sm:$0xff] }
  0xf4   : > { %v4062_v7 = vld [vmem:[#allocation6 + $0x60] sm:$0xff]  ;;  %v4061_v9 = vld [vmem:[#allocation6 + $0x58] sm:$0xff]  ;;  %v4060_v11 = vld [vmem:[#allocation6 + $0x50] sm:$0xff] }
  0xf5   : > { %v4051_v12 = vld [vmem:[#allocation6 + $0x8] sm:$0xff]  ;;  %v952_v13 = vld [vmem:[#allocation3 + $0x10] sm:$0xff]  ;;  %v4050_v16 = vld [vmem:[#allocation6] sm:$0xff] }
  0xf6   : > { %1102 = vmatpush.bf16.msra.mxu0 %v4056_v2  ;;  %4163 = vmatpush.bf16.msra.mxu2 %v4056_v2  ;;  %v4059_v14 = vld [vmem:[#allocation6 + $0x48] sm:$0xff]  ;;  %v995_v15 = vunpack.c.l.b16 %v952_v13  ;;  %v4049_v18 = vld [vmem:[#allocation3 + $0x4] sm:$0xf0]  ;;  %v996_v19 = vunpack.c.h.b16 %v952_v13  ;;  %v4058_v20 = vld [vmem:[#allocation6 + $0x40] sm:$0xff] }
  0xf7   : > { %1120 = vmatpush.bf16.msra.mxu1 %v4064_v3  ;;  %4171 = vmatpush.bf16.msra.mxu3 %v4064_v3  ;;  %v3570_v17 = vld [vmem:[#allocation3] sm:$0xf]  ;;  %v4048_v21 = vld [vmem:[#allocation3 + $0x4] sm:$0xf]  ;;  %v3572_v22 = vld [vmem:[#allocation3 + $0x8] sm:$0xf0] }
  0xf8   : > { %v3571_v23 = vor.u32 %v4049_v18, %v3570_v17  ;;  %v999_v24 = vpack.c.b16 %v995_v15, %v995_v15  ;;  %v3575_v25 = vor.u32 %v4048_v21, %v3572_v22  ;;  %v1000_v26 = vpack.c.b16 %v996_v19, %v996_v19  ;;  %v985_v27 = vld [vmem:[#allocation8] sm:$0xff]  ;;  %v987_v32 = vld [vmem:[#allocation8 + $0x10] sm:$0xff]  ;;  %v986_v34 = vld [vmem:[#allocation8 + $0x8] sm:$0xff] }
  0xfa   : > { %1103 = vmatpush.bf16.msra.mxu0 %v4055_v4  ;;  %4164 = vmatpush.bf16.msra.mxu2 %v4055_v4 }
  0xfb   : > { %1121 = vmatpush.bf16.msra.mxu1 %v4063_v5  ;;  %4172 = vmatpush.bf16.msra.mxu3 %v4063_v5 }
  0xfe   : > { %1104 = vmatpush.bf16.msra.mxu0 %v4054_v6  ;;  %4165 = vmatpush.bf16.msra.mxu2 %v4054_v6 }
  0xff   : > { %1122 = vmatpush.bf16.msra.mxu1 %v4062_v7  ;;  %4173 = vmatpush.bf16.msra.mxu3 %v4062_v7 }
 0x102   : > { %1105 = vmatpush.bf16.msra.mxu0 %v4053_v8  ;;  %4166 = vmatpush.bf16.msra.mxu2 %v4053_v8 }
 0x103   : > { %1123 = vmatpush.bf16.msra.mxu1 %v4061_v9  ;;  %4174 = vmatpush.bf16.msra.mxu3 %v4061_v9 }
 0x106   : > { %1106 = vmatpush.bf16.msra.mxu0 %v4052_v10  ;;  %4167 = vmatpush.bf16.msra.mxu2 %v4052_v10 }
 0x107   : > { %1124 = vmatpush.bf16.msra.mxu1 %v4060_v11  ;;  %4175 = vmatpush.bf16.msra.mxu3 %v4060_v11 }
 0x10a   : > { %1107 = vmatpush.bf16.msra.mxu0 %v4051_v12  ;;  %4168 = vmatpush.bf16.msra.mxu2 %v4051_v12 }
 0x10b   : > { %1125 = vmatpush.bf16.msra.mxu1 %v4059_v14  ;;  %4176 = vmatpush.bf16.msra.mxu3 %v4059_v14 }
 0x10e   : > { %1108 = vmatpush.bf16.msra.mxu0 %v4050_v16  ;;  %4169 = vmatpush.bf16.msra.mxu2 %v4050_v16 }
 0x10f   : > { %1126 = vmatpush.bf16.msra.mxu1 %v4058_v20  ;;  %4177 = vmatpush.bf16.msra.mxu3 %v4058_v20 }
 0x111   : > { %1109 = vmatmul.bf16.vlgmr.msra.gmra.mxu0 %v3571_v23  ;;  %1114 = vmatmul.bf16.vlgmr.msra.gmra.mxu2 %v999_v24 }
 0x112   : > { %1127 = vmatmul.bf16.vlgmr.msra.gmra.mxu1 %v3575_v25  ;;  %1132 = vmatmul.bf16.vlgmr.msra.gmra.mxu3 %v1000_v26 }
 0x18e   : > { %v1110_v28 = vpop.f32.mrf.mxu0 }
 0x18f   : > { %v1111_v29 = vadd.f32 %v1110_v28, %v985_v27  ;;  %v1128_v30 = vpop.f32.mrf.mxu1 }
 0x191   : > { %v1129_v31 = vadd.f32 %v1128_v30, %v1111_v29 }
 0x193   : > { %1137 = vst [vmem:[#allocation2 + $0x10] sm:$0xff] %v1129_v31 }
 0x194   : > { %v1115_v33 = vpop.f32.mrf.mxu2 }
 0x195   : > { %v1116_v35 = vadd.f32 %v1115_v33, %v987_v32  ;;  %v1133_v36 = vpop.f32.mrf.mxu3 }
 0x196   : > { %v1112_v37 = vpop.f32.mrf.mxu0 }
 0x197   : > { %v1134_v38 = vadd.f32 %v1133_v36, %v1116_v35  ;;  %v1113_v39 = vadd.f32 %v1112_v37, %v986_v34  ;;  %v1130_v40 = vpop.f32.mrf.mxu1 }
 0x199   : > { %1139 = vst [vmem:[#allocation2 + $0x8] sm:$0xff] %v1134_v38  ;;  %v1131_v41 = vadd.f32 %v1130_v40, %v1113_v39 }
 0x19b   : > { %1138 = vst [vmem:[#allocation2] sm:$0xff] %v1131_v41 }
 0x19c   : > { %v1117_v42 = vpop.f32.mrf.mxu2 }
 0x19d   : > { %v1135_v43 = vpop.f32.mrf.mxu3 }
 0x19e PF: > { %v1140_v44 = vld [vmem:[#allocation2 + $0x10] sm:$0xff]  ;;  %v4912_v47 = vmov 128.0   ;;  %v4088_v3 = vld [vmem:[%s5291_s28 + $0xb0] sm:$0xf0]  ;;  %v3728_v6 = vld [vmem:[%s5291_s28 + $0xb4] sm:$0xf0] }
 0x19f   : > { %1145 = vadd.xlane.f32.xlu0 %v1140_v44  ;;  %4336 = vrcp.f32 %v4912_v47  ;;  %v3726_v2 = vld [vmem:[%s5291_s28 + $0xa8] sm:$0xf]  ;;  %v4087_v4 = vld [vmem:[%s5291_s28 + $0xac] sm:$0xf]  ;;  %v3734_v7 = vld [vmem:[%s5291_s28 + $0xb0] sm:$0xf] }
 0x1a0   : > { %v1142_v45 = vld [vmem:[#allocation2 + $0x8] sm:$0xff]  ;;  %v3727_v5 = vor.u32 %v4088_v3, %v3726_v2  ;;  %v3731_v9 = vor.u32 %v4087_v4, %v3728_v6  ;;  %v3714_v11 = vld [vmem:[%s5291_s28 + $0x90] sm:$0xf]  ;;  %v4084_v13 = vld [vmem:[%s5291_s28 + $0x94] sm:$0xf]  ;;  %vm1451_vm10 = vcmask 261120  }
 0x1a1   : > { %1149 = vadd.xlane.f32.xlu2 %v1142_v45  ;;  %v4089_v8 = vld [vmem:[%s5291_s28 + $0xb8] sm:$0xf0]  ;;  %v3716_v15 = vld [vmem:[%s5291_s28 + $0x9c] sm:$0xf0]  ;;  %v3722_v16 = vld [vmem:[%s5291_s28 + $0x98] sm:$0xf] }
 0x1a2   : > { %v1141_v46 = vld [vmem:[#allocation2] sm:$0xff]  ;;  %v3735_v10 = vor.u32 %v4089_v8, %v3734_v7  ;;  %1394 = vmatpush.bf16.msra.mxu0 %v3727_v5  ;;  %1412 = vmatpush.bf16.msra.mxu1 %v3731_v9  ;;  %v4086_v17 = vld [vmem:[%s5291_s28 + $0xa0] sm:$0xf0]  ;;  %v3719_v18 = vor.u32 %v4084_v13, %v3716_v15  ;;  %v3704_v24 = vld [vmem:[%s5291_s28 + $0x84] sm:$0xf0]  ;;  %vm1526_vm11 = vcmask 1045504  }
 0x1a3   : > { %v4085_v12 = vld [vmem:[%s5291_s28 + $0x98] sm:$0xf0]  ;;  %v3723_v19 = vor.u32 %v4086_v17, %v3722_v16  ;;  %v3702_v20 = vld [vmem:[%s5291_s28 + $0x78] sm:$0xf]  ;;  %v4082_v21 = vld [vmem:[%s5291_s28 + $0x80] sm:$0xf0] }
 0x1a4   : > { %1430 = vmatpush.bf16.msra.mxu2 %v3735_v10  ;;  %v3715_v14 = vor.u32 %v4085_v12, %v3714_v11  ;;  %v4081_v22 = vld [vmem:[%s5291_s28 + $0x7c] sm:$0xf]  ;;  %v3703_v23 = vor.u32 %v4082_v21, %v3702_v20  ;;  %v3710_v25 = vld [vmem:[%s5291_s28 + $0x80] sm:$0xf]  ;;  %v4083_v26 = vld [vmem:[%s5291_s28 + $0x88] sm:$0xf0] }
 0x1a5   : > { %v4337_v48 = vpop.eup %4336  ;;  %v3707_v27 = vor.u32 %v4081_v22, %v3704_v24  ;;  %v3711_v28 = vor.u32 %v4083_v26, %v3710_v25  ;;  %v3690_v29 = vld [vmem:[%s5291_s28 + $0x60] sm:$0xf]  ;;  %v4079_v30 = vld [vmem:[%s5291_s28 + $0x68] sm:$0xf0]  ;;  %v4078_v31 = vld [vmem:[%s5291_s28 + $0x64] sm:$0xf] }
 0x1a6   : > { %v1152_v49 = vmul.f32 128.0, %v4337_v48  ;;  %vm1156_vm0 = vweird.f32 %v4337_v48  ;;  %1395 = vmatpush.bf16.msra.mxu0 %v3715_v14  ;;  %1413 = vmatpush.bf16.msra.mxu1 %v3719_v18  ;;  %v3691_v32 = vor.u32 %v4079_v30, %v3690_v29  ;;  %v3692_v33 = vld [vmem:[%s5291_s28 + $0x6c] sm:$0xf0]  ;;  %v3698_v34 = vld [vmem:[%s5291_s28 + $0x68] sm:$0xf]  ;;  %vm1472_vm12 = vcmask 97280  }
 0x1a7   : > { %1147 = vadd.xlane.f32.xlu0 %v1141_v46  ;;  %v4080_v35 = vld [vmem:[%s5291_s28 + $0x70] sm:$0xf0]  ;;  %v3695_v36 = vor.u32 %v4078_v31, %v3692_v33  ;;  %v3678_v38 = vld [vmem:[%s5291_s28 + $0x48] sm:$0xf]  ;;  %v4075_v40 = vld [vmem:[%s5291_s28 + $0x4c] sm:$0xf] }
 0x1a8   : > { %v1153_v50 = vsub.f32 1.0, %v1152_v49  ;;  %1431 = vmatpush.bf16.msra.mxu2 %v3723_v19  ;;  %v3699_v37 = vor.u32 %v4080_v35, %v3698_v34  ;;  %v4076_v39 = vld [vmem:[%s5291_s28 + $0x50] sm:$0xf0]  ;;  %v3680_v42 = vld [vmem:[%s5291_s28 + $0x54] sm:$0xf0]  ;;  %vm1476_vm13 = vcmask 93184  }
 0x1a9   : > { %v3679_v41 = vor.u32 %v4076_v39, %v3678_v38  ;;  %v3686_v43 = vld [vmem:[%s5291_s28 + $0x50] sm:$0xf]  ;;  %v4072_v49 = vld [vmem:[%s5291_s28 + $0x34] sm:$0xf]  ;;  %v4071_v2 = vld [vmem:[%s5291_s28 + $0x28] sm:$0xf0] }
 0x1aa   : > { %v1154_v51 = vmul.f32 %v4337_v48, %v1153_v50  ;;  %1396 = vmatpush.bf16.msra.mxu0 %v3703_v23  ;;  %1414 = vmatpush.bf16.msra.mxu1 %v3707_v27  ;;  %v3666_v47 = vld [vmem:[%s5291_s28 + $0x30] sm:$0xf]  ;;  %v3642_v5 = vld [vmem:[%s5291_s28] sm:$0xf]  ;;  %v4067_v6 = vld [vmem:[%s5291_s28 + $0x8] sm:$0xf0] }
 0x1ab   : > { %v4066_v7 = vld [vmem:[%s5291_s28 + $0x4] sm:$0xf]  ;;  %v3643_v10 = vor.u32 %v4067_v6, %v3642_v5  ;;  %v3644_v11 = vld [vmem:[%s5291_s28 + $0xc] sm:$0xf0]  ;;  %v3650_v12 = vld [vmem:[%s5291_s28 + $0x8] sm:$0xf] }
 0x1ac   : > { %v1155_v52 = vadd.f32 %v4337_v48, %v1154_v51  ;;  %1432 = vmatpush.bf16.msra.mxu2 %v3711_v28  ;;  %v3668_v51 = vld [vmem:[%s5291_s28 + $0x3c] sm:$0xf0]  ;;  %v4068_v13 = vld [vmem:[%s5291_s28 + $0x10] sm:$0xf0]  ;;  %v3647_v16 = vor.u32 %v4066_v7, %v3644_v11  ;;  %s4915_s17 = smov 32   ;;  %s6094_s25 = scalar_lea.vmem [#allocation18], %s5282_s13 }
 0x1ad   : > { %v3651_v17 = vor.u32 %v4068_v13, %v3650_v12 }
 0x1ae   : > { %v5343_v53 = vsel %vm1156_vm0, %v4337_v48, %v1155_v52  ;;  %1397 = vmatpush.bf16.msra.mxu0 %v3691_v32  ;;  %1415 = vmatpush.bf16.msra.mxu1 %v3695_v36  ;;  %v4073_v48 = vld [vmem:[%s5291_s28 + $0x38] sm:$0xf0]  ;;  %v3674_v52 = vld [vmem:[%s5291_s28 + $0x38] sm:$0xf] }
 0x1af   : > { %v3667_v50 = vor.u32 %v4073_v48, %v3666_v47 }
 0x1b0   : > { %1433 = vmatpush.bf16.msra.mxu2 %v3699_v37 }
 0x1b2   : > { %1398 = vmatpush.bf16.msra.mxu0 %v3679_v41 }
 0x1b6   : > { %1399 = vmatpush.bf16.msra.mxu0 %v3667_v50 }
 0x212   : > { %v1146_v54 = vpop.xlane.xlu0 %1145 }
 0x213   : > { %v1158_v56 = vmul.f32 %v5343_v53, %v1146_v54  ;;  %v4074_v54 = vld [vmem:[%s5291_s28 + $0x40] sm:$0xf0] }
 0x214   : > { %v1150_v55 = vpop.xlane.xlu2 %1149 }
 0x215   : > { %v1160_v57 = vmul.f32 %v5343_v53, %v1150_v55  ;;  %v5347_v58 = vsub.f32 %v1140_v44, %v1158_v56  ;;  %v4077_v44 = vld [vmem:[%s5291_s28 + $0x58] sm:$0xf0]  ;;  %v3671_v55 = vor.u32 %v4072_v49, %v3668_v51  ;;  %v3675_v56 = vor.u32 %v4074_v54, %v3674_v52 }
 0x217   : > { %v5349_v59 = vsub.f32 %v1142_v45, %v1160_v57  ;;  %v1164_v60 = vmul.f32 %v5347_v58, %v5347_v58  ;;  %v3683_v45 = vor.u32 %v4075_v40, %v3680_v42  ;;  %v3654_v57 = vld [vmem:[%s5291_s28 + $0x18] sm:$0xf]  ;;  %v4330_v40 = vld [vmem:[%s937_s0] ss:$0 sm:$0xff] }
 0x219   : > { %v1166_v61 = vmul.f32 %v5349_v59, %v5349_v59  ;;  %1167 = vadd.xlane.f32.xlu1 %v1164_v60  ;;  %1416 = vmatpush.bf16.msra.mxu1 %v3683_v45  ;;  %v4070_v60 = vld [vmem:[%s5291_s28 + $0x20] sm:$0xf0] }
 0x21a   : > { %v1148_v62 = vpop.xlane.xlu0 %1147 }
 0x21b   : > { %1171 = vadd.xlane.f32.xlu2 %v1166_v61  ;;  %v1159_v63 = vmul.f32 %v5343_v53, %v1148_v62  ;;  %v4069_v61 = vld [vmem:[%s5291_s28 + $0x1c] sm:$0xf]  ;;  %v3655_v62 = vor.u32 %v4070_v60, %v3654_v57  ;;  %v1258_v60 = vld [vmem:[%s5293_s4] sm:$0x7]  ;;  %s4914_s4 = smov 64  }
 0x21c   : > { %v1260_v6 = vperm.slane %v1258_v60, 0 }
 0x21d   : > { %v5356_v0 = vsub.f32 %v1141_v46, %v1159_v63  ;;  %v3687_v46 = vor.u32 %v4077_v44, %v3686_v43  ;;  %1417 = vmatpush.bf16.msra.mxu1 %v3671_v55  ;;  %v3656_v63 = vld [vmem:[%s5291_s28 + $0x24] sm:$0xf0]  ;;  %1400 = vmatpush.bf16.msra.mxu0 %v3655_v62 }
 0x21e   : > { %v3659_v3 = vor.u32 %v4069_v61, %v3656_v63  ;;  %v1261_v61 = vperm.slane %v1258_v60, 1 }
 0x21f   : > { %v1165_v1 = vmul.f32 %v5356_v0, %v5356_v0  ;;  %1434 = vmatpush.bf16.msra.mxu2 %v3687_v46  ;;  %v4331_v46 = vld [vmem:[%s765_s26] ss:$0 sm:$0xff]  ;;  %s4913_s26 = smov 96  }
 0x221   : > { %1169 = vadd.xlane.f32.xlu1 %v1165_v1  ;;  %v3662_v1 = vld [vmem:[%s5291_s28 + $0x20] sm:$0xf]  ;;  %1418 = vmatpush.bf16.msra.mxu1 %v3659_v3 }
 0x222   : > { %v3663_v4 = vor.u32 %v4071_v2, %v3662_v1  ;;  %1401 = vmatpush.bf16.msra.mxu0 %v3643_v10 }
 0x223   : > { %1435 = vmatpush.bf16.msra.mxu2 %v3675_v56 }
 0x225   : > { %1419 = vmatpush.bf16.msra.mxu1 %v3647_v16 }
 0x227   : > { %1436 = vmatpush.bf16.msra.mxu2 %v3663_v4 }
 0x22b   : > { %1437 = vmatpush.bf16.msra.mxu2 %v3651_v17 }
 0x28c   : > { %v1168_v8 = vpop.xlane.xlu1 %1167 }
 0x28d   : > { %v1173_v14 = vmul.f32 %v1168_v8, %v5343_v53 }
 0x28e   : > { %v1172_v9 = vpop.xlane.xlu2 %1171 }
 0x28f   : > { %v1175_v15 = vmul.f32 %v1172_v9, %v5343_v53  ;;  %v1176_v18 = vadd.f32 1e-06, %v1173_v14 }
 0x291   : > { %v1178_v19 = vadd.f32 1e-06, %v1175_v15  ;;  %4338 = vrsqrt.f32 %v1176_v18  ;;  %vm1185_vm2 = vweird.f32 %v1176_v18 }
 0x293   : > { %4340 = vrsqrt.f32 %v1178_v19  ;;  %vm1205_vm7 = vweird.f32 %v1178_v19 }
 0x294   : > { %v1170_v20 = vpop.xlane.xlu1 %1169 }
 0x295   : > { %v1174_v21 = vmul.f32 %v1170_v20, %v5343_v53 }
 0x297   : > { %v4339_v22 = vpop.eup %4338  ;;  %v1177_v23 = vadd.f32 1e-06, %v1174_v21 }
 0x298   : > { %v1180_v24 = vmul.f32 %v4339_v22, %v1176_v18  ;;  %vm1186_vm1 = vweird.f32 %v4339_v22 }
 0x299   : > { %v4341_v25 = vpop.eup %4340  ;;  %4342 = vrsqrt.f32 %v1177_v23  ;;  %vm1187_vm3 = vmor %vm1185_vm2, %vm1186_vm1  ;;  %vm1195_vm5 = vweird.f32 %v1177_v23 }
 0x29a   : > { %v1181_v26 = vmul.f32 %v4339_v22, %v1180_v24  ;;  %v1200_v28 = vmul.f32 %v4341_v25, %v1178_v19  ;;  %vm1206_vm8 = vweird.f32 %v4341_v25 }
 0x29b   : > { %vm1207_vm9 = vmor %vm1205_vm7, %vm1206_vm8 }
 0x29c   : > { %v1182_v27 = vmul.f32 0.5, %v1181_v26  ;;  %v1201_v33 = vmul.f32 %v4341_v25, %v1200_v28 }
 0x29e   : > { %v1183_v29 = vsub.f32 1.5, %v1182_v27  ;;  %v1202_v37 = vmul.f32 0.5, %v1201_v33 }
 0x29f   : > { %v4343_v30 = vpop.eup %4342 }
 0x2a0   : > { %v1184_v31 = vmul.f32 %v4339_v22, %v1183_v29  ;;  %v1190_v32 = vmul.f32 %v4343_v30, %v1177_v23  ;;  %vm1196_vm4 = vweird.f32 %v4343_v30  ;;  %v1203_v42 = vsub.f32 1.5, %v1202_v37 }
 0x2a1   : > { %vm1197_vm6 = vmor %vm1195_vm5, %vm1196_vm4 }
 0x2a2   : > { %v1191_v34 = vmul.f32 %v4343_v30, %v1190_v32  ;;  %v1188_v35 = vsel %vm1187_vm3, %v4339_v22, %v1184_v31  ;;  %v1204_v47 = vmul.f32 %v4341_v25, %v1203_v42 }
 0x2a3   : > { %v1209_v39 = vmul.f32 %v1188_v35, %v5347_v58 }
 0x2a4   : > { %v1192_v36 = vmul.f32 0.5, %v1191_v34  ;;  %v1208_v50 = vsel %vm1207_vm9, %v4341_v25, %v1204_v47 }
 0x2a5   : > { %v1215_v45 = vmul.f32 %v4330_v40, %v1209_v39  ;;  %v1211_v52 = vmul.f32 %v1208_v50, %v5349_v59  ;;  %v1262_v59 = vperm.slane %v1258_v60, 2 }
 0x2a6   : > { %v1193_v38 = vsub.f32 1.5, %v1192_v36 }
 0x2a7   : > { %v1221_v48 = vadd.f32 %v4331_v46, %v1215_v45  ;;  %v1217_v54 = vmul.f32 %v4330_v40, %v1211_v52 }
 0x2a8   : > { %v1194_v41 = vmul.f32 %v4343_v30, %v1193_v38 }
 0x2a9   : > { %v1223_v55 = vadd.f32 %v4331_v46, %v1217_v54 }
 0x2aa   : > { %v1198_v43 = vsel %vm1197_vm6, %v4343_v30, %v1194_v41 }
 0x2ab   : > { %v1210_v44 = vmul.f32 %v1198_v43, %v5356_v0  ;;  %v1225_v56 = vpack.c.bf16 %v1223_v55, %v1223_v55 }
 0x2ad   : > { %v1216_v58 = vmul.f32 %v4330_v40, %v1210_v44 }
 0x2af   : > { %v1222_v49 = vadd.f32 %v4331_v46, %v1216_v58 }
 0x2b1   : > { %v1224_v51 = vpack.c.bf16 %v1222_v49, %v1221_v48 }
 0x2b3   : > { %1402 = vmatmul.bf16.vlgmr.msra.gmra.mxu0 %v1224_v51  ;;  %1420 = vmatmul.bf16.vlgmr.msra.gmra.mxu1 %v1224_v51 }
 0x2b4   : > { %1438 = vmatmul.bf16.vlgmr.msra.gmra.mxu2 %v1224_v51 }
 0x2c3   : > { %1407 = vmatmul.bf16.gmra.mxu0 %v1225_v56  ;;  %1425 = vmatmul.bf16.gmra.mxu1 %v1225_v56 }
 0x2c4   : > { %1443 = vmatmul.bf16.gmra.mxu2 %v1225_v56 }
 0x330   : > { %v1403_v0 = vpop.f32.mrf.mxu0  ;;  %v1421_v57 = vpop.f32.mrf.mxu1 }
 0x331   : > { %v1422_v2 = vadd.f32 %v1421_v57, %v1261_v61  ;;  %v1404_v14 = vadd.f32 %v1403_v0, %v1260_v6 }
 0x337   : > { %v1439_v62 = vpop.f32.mrf.mxu2 }
 0x338   : > { %v1405_v63 = vpop.f32.mrf.mxu0  ;;  %v1423_v1 = vpop.f32.mrf.mxu1  ;;  %v1440_v8 = vadd.f32 %v1439_v62, %v1262_v59 }
 0x339   : > { %v1424_v3 = vadd.f32 %v1423_v1, %v1261_v61  ;;  %v1406_v9 = vadd.f32 %v1405_v63, %v1260_v6 }
 0x33b   : > { %v5422_v4 = vpack.c.bf16 %v1424_v3, %v1422_v2  ;;  %v1448_v17 = vpack.c.bf16 %v1406_v9, %v1404_v14 }
 0x33d   : > { %v1456_v5 = vsel %vm1451_vm10, %v5422_v4, 0 }
 0x33e   : > { %1465 = vmatpush.bf16.xpose.msra.mxu3 %v1456_v5 }
 0x33f   : > { %v1441_v7 = vpop.f32.mrf.mxu2 }
 0x340   : > { %v5426_v10 = vadd.f32 %v1441_v7, %v1262_v59  ;;  %v1408_v11 = vpop.f32.mrf.mxu0  ;;  %v1426_v12 = vpop.f32.mrf.mxu1 }
 0x341   : > { %v1427_v13 = vadd.f32 %v1426_v12, %v1261_v61  ;;  %v1409_v19 = vadd.f32 %v1408_v11, %v1260_v6 }
 0x342   : > { %v5429_v15 = vpack.c.bf16 %v5426_v10, %v1440_v8 }
 0x343   : > { %v1865_v16 = vpack.c.bf16 %v1427_v13, %v1424_v3  ;;  %v1864_v26 = vpack.c.bf16 %v1409_v19, %v1406_v9 }
 0x344   : > { %v1528_v18 = vsel %vm1526_vm11, %v5429_v15, 0 }
 0x345   : > { %v1870_v20 = vrot.slane %v1865_v16, 2  ;;  %3736 = vmatmul.msk.bf16.vlgmr.msra.gmra.mxu3 %vm1451_vm10, %v1448_v17  ;;  %v1868_v28 = vrot.slane %v1864_v26, 2 }
 0x346   : > { %1537 = vmatpush.bf16.msrb.mxu3 %v1528_v18 }
 0x347   : > { %v1444_v21 = vpop.f32.mrf.mxu2  ;;  %v1875_v22 = vsel %vm1451_vm10, %v1870_v20, 0 }
 0x348   : > { %v5435_v23 = vadd.f32 %v1444_v21, %v1262_v59  ;;  %1884 = vmatpush.bf16.xpose.msrb.mxu0 %v1875_v22  ;;  %v1410_v24 = vpop.f32.mrf.mxu0  ;;  %v1428_v25 = vpop.f32.mrf.mxu1 }
 0x34a   : > { %v1866_v27 = vpack.c.bf16 %v5435_v23, %v5426_v10 }
 0x34f   : > { %3744 = vmatmul.msk.bf16.vlgmr.msrb.gmra.mxu0 %vm1451_vm10, %v1868_v28  ;;  %v1446_v29 = vpop.f32.mrf.mxu2 }
 0x3c8   : > { %v1467_v30 = vpop.f32.mrf.mxu3 }
 0x3c9   : > { %v1473_v31 = vsel %vm1472_vm12, %v1467_v30, -inf }
 0x3ca   : > { %1474 = vmax.xlane.f32.xlu0 %v1473_v31 }
 0x3d0   : > { %v1469_v32 = vpop.f32.mrf.mxu3 }
 0x3d1   : > { %v1477_v33 = vsel %vm1476_vm13, %v1469_v32, -inf }
 0x3d2   : > { %1478 = vmax.xlane.f32.xlu1 %v1477_v33 }
 0x3eb   : > { %1548 = vrot.lane.b32.xlu1 %v5422_v4, %s4913_s26 }
 0x3f3   : > { %1644 = vrot.lane.b32.xlu1 %v5422_v4, %s4914_s4 }
 0x3fb   : > { %1962 = vrot.lane.b32.xlu1 %v1868_v28, %s4913_s26 }
 0x403   : > { %2059 = vrot.lane.b32.xlu1 %v1870_v20, %s4914_s4 }
 0x43d   : > { %v1475_v34 = vpop.xlane.xlu0 %1474 }
 0x43e   : > { %v1480_v35 = vsub.f32 %v1467_v30, %v1475_v34 }
 0x440   : > { %v1482_v36 = vmul.f32 1.442695, %v1480_v35 }
 0x442   : > { %4344 = vpow2.f32 %v1482_v36 }
 0x445   : > { %v1479_v37 = vpop.xlane.xlu1 %1478 }
 0x446   : > { %v1481_v38 = vsub.f32 %v1469_v32, %v1479_v37  ;;  %v5478_v32 = vpop.f32.mrf.mxu0 }
 0x448   : > { %v5448_v39 = vpop.eup %4344  ;;  %v1484_v40 = vmul.f32 1.442695, %v1481_v38 }
 0x449   : > { %v1486_v41 = vsel %vm1472_vm12, %v5448_v39, 0.0 }
 0x44a   : > { %4346 = vpow2.f32 %v1484_v40  ;;  %1487 = vadd.xlane.f32.xlu2 %v1486_v41 }
 0x44e   : > { %v5482_v37 = vpop.f32.mrf.mxu0 }
 0x450   : > { %v4347_v42 = vpop.eup %4346 }
 0x451   : > { %v1489_v43 = vsel %vm1476_vm13, %v4347_v42, 0.0 }
 0x452   : > { %1490 = vadd.xlane.f32.xlu0 %v1489_v43 }
 0x45d   : > { %v1549_v44 = vpop.permute.xlu1 %1548 }
 0x45e   : > { %v1554_v45 = vsel %vm1451_vm10, %v1549_v44, 0  ;;  %v1894_v44 = vsel %vm1476_vm13, %v5482_v37, -inf }
 0x45f   : > { %1563 = vmatpush.bf16.xpose.msra.mxu3 %v1554_v45 }
 0x462   : > { %1545 = vrot.lane.b32.xlu2 %v1448_v17, %s4913_s26 }
 0x465   : > { %v1645_v46 = vpop.permute.xlu1 %1644 }
 0x466   : > { %1739 = vrot.lane.b32.xlu0 %v5422_v4, %s4915_s17  ;;  %v1650_v47 = vsel %vm1451_vm10, %v1645_v46, 0 }
 0x467   : > { %1659 = vmatpush.bf16.xpose.msrb.mxu1 %v1650_v47 }
 0x46a   : > { %1737 = vrot.lane.b32.xlu2 %v1448_v17, %s4915_s17 }
 0x46d   : > { %v1963_v58 = vpop.permute.xlu1 %1962 }
 0x46e   : > { %1964 = vrot.lane.b32.xlu0 %v1870_v20, %s4913_s26 }
 0x472   : > { %1642 = vrot.lane.b32.xlu2 %v1448_v17, %s4914_s4 }
 0x475   : > { %v2060_v48 = vpop.permute.xlu1 %2059 }
 0x476   : > { %v2065_v49 = vsel %vm1451_vm10, %v2060_v48, 0  ;;  %2154 = vrot.lane.b32.xlu0 %v1870_v20, %s4915_s17 }
 0x477   : > { %2074 = vmatpush.bf16.xpose.msra.mxu0 %v2065_v49 }
 0x47a   : > { %2152 = vrot.lane.b32.xlu2 %v1868_v28, %s4915_s17 }
 0x47e   : > { %2057 = vrot.lane.b32.xlu0 %v1868_v28, %s4914_s4 }
 0x4bd   : > { %v1488_v50 = vpop.xlane.xlu2 %1487 }
 0x4be   : > { %4348 = vrcp.f32 %v1488_v50  ;;  %v1503_v63 = vand.u32 2147483648, %v1488_v50  ;;  %vm1497_vm15 = vweird.f32 %v1488_v50  ;;  %v1501_v1 = vand.u32 2147483647, %v1488_v50 }
 0x4c0   : > { %v1504_v6 = vor.u32 1.1754944e-38, %v1503_v63  ;;  %vm1502_vm2 = vcmp.eq.f32.partialorder %v1501_v1, 8.507059e+37 }
 0x4c4   : > { %v4349_v51 = vpop.eup %4348 }
 0x4c5   : > { %v1493_v52 = vmul.f32 %v4349_v51, %v1488_v50  ;;  %v1546_v54 = vpop.permute.xlu2 %1545  ;;  %v1491_v55 = vpop.xlane.xlu0 %1490  ;;  %vm1498_vm14 = vweird.f32 %v4349_v51 }
 0x4c6   : > { %4350 = vrcp.f32 %v1491_v55  ;;  %vm1499_vm0 = vmor %vm1497_vm15, %vm1498_vm14  ;;  %v1518_v3 = vand.u32 2147483648, %v1491_v55  ;;  %v1516_v5 = vand.u32 2147483647, %v1491_v55  ;;  %vm1512_vm3 = vweird.f32 %v1491_v55 }
 0x4c7   : > { %v1494_v56 = vsub.f32 1.0, %v1493_v52 }
 0x4c8   : > { %v1519_v8 = vor.u32 1.1754944e-38, %v1518_v3  ;;  %vm1517_vm5 = vcmp.eq.f32.partialorder %v1516_v5, 8.507059e+37 }
 0x4c9   : > { %v1495_v0 = vmul.f32 %v4349_v51, %v1494_v56 }
 0x4cb   : > { %v1496_v60 = vadd.f32 %v4349_v51, %v1495_v0 }
 0x4cc   : > { %v4351_v57 = vpop.eup %4350 }
 0x4cd   : > { %v1508_v61 = vmul.f32 %v4351_v57, %v1491_v55  ;;  %v1738_v62 = vpop.permute.xlu2 %1737  ;;  %v1500_v4 = vsel %vm1499_vm0, %v4349_v51, %v1496_v60  ;;  %vm1513_vm1 = vweird.f32 %v4351_v57 }
 0x4ce   : > { %vm1514_vm4 = vmor %vm1512_vm3, %vm1513_vm1  ;;  %v1505_v9 = vsel %vm1502_vm2, %v1504_v6, %v1500_v4 }
 0x4cf   : > { %v1509_v2 = vsub.f32 1.0, %v1508_v61  ;;  %v1506_v14 = vmul.f32 %v5448_v39, %v1505_v9  ;;  %v1891_v39 = vsel %vm1472_vm12, %v5478_v32, -inf }
 0x4d1   : > { %v1510_v59 = vmul.f32 %v4351_v57, %v1509_v2 }
 0x4d3   : > { %v1511_v7 = vadd.f32 %v4351_v57, %v1510_v59 }
 0x4d5   : > { %v1515_v11 = vsel %vm1514_vm4, %v4351_v57, %v1511_v7  ;;  %v1643_v12 = vpop.permute.xlu2 %1642 }
 0x4d6   : > { %3740 = vmatmul.msk.bf16.vlgmr.msrb.gmra.mxu1 %vm1451_vm10, %v1643_v12  ;;  %v1520_v13 = vsel %vm1517_vm5, %v1519_v8, %v1515_v11 }
 0x4d7   : > { %v1521_v16 = vmul.f32 %v4347_v42, %v1520_v13 }
 0x4d8   : > { %v1740_v17 = vpop.permute.xlu0 %1739 }
 0x4d9   : > { %v1745_v18 = vsel %vm1451_vm10, %v1740_v17, 0  ;;  %v1522_v19 = vpack.c.bf16 %v1521_v16, %v1506_v14 }
 0x4da   : > { %1754 = vmatpush.bf16.xpose.msrb.mxu2 %v1745_v18 }
 0x4db   : > { %3737 = vmatmul.msk.bf16.vlgmr.msrb.gmra.mxu3 %vm1472_vm12, %v1522_v19 }
 0x4dd   : > { %v2153_v26 = vpop.permute.xlu2 %2152 }
 0x4e0   : > { %v1965_v20 = vpop.permute.xlu0 %1964 }
 0x4e1   : > { %v1970_v21 = vsel %vm1451_vm10, %v1965_v20, 0  ;;  %3742 = vmatmul.msk.bf16.vlgmr.msrb.gmra.mxu2 %vm1451_vm10, %v1738_v62 }
 0x4e2   : > { %1979 = vmatpush.bf16.xpose.msra.mxu2 %v1970_v21 }
 0x4e8   : > { %v2155_v22 = vpop.permute.xlu0 %2154 }
 0x4e9   : > { %v2160_v24 = vsel %vm1451_vm10, %v2155_v22, 0 }
 0x4ea   : > { %2169 = vmatpush.bf16.xpose.msrb.mxu2 %v2160_v24 }
 0x4eb   : > { %3738 = vmatmul.msk.bf16.vlgmr.msra.gmra.mxu3 %vm1451_vm10, %v1546_v54 }
 0x4f0   : > { %v2058_v25 = vpop.permute.xlu0 %2057 }
 0x4f1   : > { %3746 = vmatmul.msk.bf16.vlgmr.msra.gmra.mxu2 %vm1451_vm10, %v1963_v58  ;;  %3748 = vmatmul.msk.bf16.vlgmr.msra.gmra.mxu0 %vm1451_vm10, %v2058_v25 }
 0x501   : > { %3750 = vmatmul.msk.bf16.vlgmr.msrb.gmra.mxu2 %vm1451_vm10, %v2153_v26 }
 0x553   : > { %v1661_v28 = vpop.f32.mrf.mxu1 }
 0x554   : > { %v1666_v29 = vsel %vm1472_vm12, %v1661_v28, -inf }
 0x555   : > { %1667 = vmax.xlane.f32.xlu1 %v1666_v29 }
 0x55b   : > { %v1663_v33 = vpop.f32.mrf.mxu1 }
 0x55c   : > { %v1669_v36 = vsel %vm1476_vm13, %v1663_v33, -inf }
 0x55e   : > { %v5487_v41 = vpop.f32.mrf.mxu3 }
 0x564   : > { %v1756_v30 = vpop.f32.mrf.mxu2 }
 0x565   : > { %v1761_v31 = vsel %vm1472_vm12, %v1756_v30, -inf }
 0x566   : > { %1762 = vmax.xlane.f32.xlu0 %v1761_v31  ;;  %v5496_v47 = vpop.f32.mrf.mxu3 }
 0x56c   : > { %v1758_v34 = vpop.f32.mrf.mxu2 }
 0x56d   : > { %v1764_v35 = vsel %vm1476_vm13, %v1758_v34, -inf }
 0x56e   : > { %1765 = vmax.xlane.f32.xlu2 %v1764_v35  ;;  %1670 = vmax.xlane.f32.xlu0 %v1669_v36  ;;  %v5489_v42 = vpop.f32.mrf.mxu0  ;;  %v1565_v51 = vpop.f32.mrf.mxu3 }
 0x56f   : > { %v2081_v46 = vsel %vm1472_vm12, %v5489_v42, -inf  ;;  %v1570_v55 = vsel %vm1472_vm12, %v1565_v51, -inf }
 0x574   : > { %v1981_v38 = vpop.f32.mrf.mxu2 }
 0x575   : > { %v1986_v40 = vsel %vm1472_vm12, %v1981_v38, -inf }
 0x576   : > { %1892 = vmax.xlane.f32.xlu0 %v1891_v39  ;;  %1987 = vmax.xlane.f32.xlu2 %v1986_v40  ;;  %v5498_v58 = vpop.f32.mrf.mxu0 }
 0x577   : > { %v2084_v50 = vsel %vm1476_vm13, %v5498_v58, -inf }
 0x57c   : > { %v1983_v43 = vpop.f32.mrf.mxu2 }
 0x57d   : > { %v1989_v45 = vsel %vm1476_vm13, %v1983_v43, -inf }
 0x57e   : > { %1895 = vmax.xlane.f32.xlu2 %v1894_v44  ;;  %1990 = vmax.xlane.f32.xlu1 %v1989_v45 }
 0x57f   : > { %2082 = vmax.xlane.f32.xlu0 %v2081_v46 }
 0x584   : > { %v5500_v48 = vpop.f32.mrf.mxu2 }
 0x585   : > { %v2176_v49 = vsel %vm1472_vm12, %v5500_v48, -inf }
 0x586   : > { %2177 = vmax.xlane.f32.xlu1 %v2176_v49  ;;  %2085 = vmax.xlane.f32.xlu2 %v2084_v50 }
 0x58c   : > { %v5506_v52 = vpop.f32.mrf.mxu2 }
 0x58d   : > { %v2179_v54 = vsel %vm1476_vm13, %v5506_v52, -inf }
 0x58e   : > { %2180 = vmax.xlane.f32.xlu0 %v2179_v54  ;;  %1571 = vmax.xlane.f32.xlu2 %v1570_v55  ;;  %v5563_v54 = vrot.slane %v1866_v27, 2 }
 0x5a6   : > { %1620 = vrot.lane.b32.xlu2 %v5429_v15, %s4913_s26 }
 0x5c8   : > { %v1668_v56 = vpop.xlane.xlu1 %1667 }
 0x5c9   : > { %v1672_v60 = vsub.f32 %v1661_v28, %v1668_v56 }
 0x5cb   : > { %v1674_v62 = vmul.f32 1.442695, %v1672_v60 }
 0x5d9   : > { %v1763_v0 = vpop.xlane.xlu0 %1762 }
 0x5da   : > { %v1767_v57 = vsub.f32 %v1756_v30, %v1763_v0  ;;  %v5534_v30 = vpop.f32.mrf.mxu3 }
 0x5dc   : > { %v1769_v61 = vmul.f32 1.442695, %v1767_v57 }
 0x5de   : > { %4352 = vpow2.f32 %v1769_v61 }
 0x5df   : > { %4354 = vpow2.f32 %v1674_v62 }
 0x5e1   : > { %v1766_v63 = vpop.xlane.xlu2 %1765  ;;  %v1671_v1 = vpop.xlane.xlu0 %1670 }
 0x5e2   : > { %v1768_v2 = vsub.f32 %v1758_v34, %v1766_v63  ;;  %v1673_v59 = vsub.f32 %v1663_v33, %v1671_v1  ;;  %v1573_v33 = vsel %vm1476_vm13, %v5534_v30, -inf }
 0x5e4   : > { %v5513_v3 = vpop.eup %4352  ;;  %v1771_v4 = vmul.f32 1.442695, %v1768_v2  ;;  %v1676_v6 = vmul.f32 1.442695, %v1673_v59 }
 0x5e5   : > { %v1773_v5 = vsel %vm1472_vm12, %v5513_v3, 0.0  ;;  %v5517_v8 = vpop.eup %4354 }
 0x5e6   : > { %4356 = vpow2.f32 %v1771_v4  ;;  %1774 = vadd.xlane.f32.xlu1 %v1773_v5  ;;  %v1678_v14 = vsel %vm1472_vm12, %v5517_v8, 0.0 }
 0x5e7   : > { %4358 = vpow2.f32 %v1676_v6 }
 0x5e9   : > { %v1988_v7 = vpop.xlane.xlu2 %1987  ;;  %v1893_v20 = vpop.xlane.xlu0 %1892 }
 0x5ea   : > { %v1992_v9 = vsub.f32 %v1981_v38, %v1988_v7  ;;  %v1897_v25 = vsub.f32 %v5478_v32, %v1893_v20 }
 0x5ec   : > { %v5519_v11 = vpop.eup %4356  ;;  %v1994_v12 = vmul.f32 1.442695, %v1992_v9  ;;  %v1899_v29 = vmul.f32 1.442695, %v1897_v25 }
 0x5ed   : > { %v1776_v13 = vsel %vm1476_vm13, %v5519_v11, 0.0  ;;  %v5525_v18 = vpop.eup %4358 }
 0x5ee   : > { %1777 = vadd.xlane.f32.xlu0 %v1776_v13  ;;  %1679 = vadd.xlane.f32.xlu1 %v1678_v14  ;;  %4360 = vpow2.f32 %v1994_v12  ;;  %v1681_v24 = vsel %vm1476_vm13, %v5525_v18, 0.0 }
 0x5f1   : > { %v1896_v16 = vpop.xlane.xlu2 %1895  ;;  %v1991_v17 = vpop.xlane.xlu1 %1990 }
 0x5f2   : > { %v1993_v19 = vsub.f32 %v1983_v43, %v1991_v17  ;;  %v1898_v39 = vsub.f32 %v5482_v37, %v1896_v16 }
 0x5f4   : > { %v1996_v21 = vmul.f32 1.442695, %v1993_v19  ;;  %v5527_v22 = vpop.eup %4360  ;;  %v1901_v43 = vmul.f32 1.442695, %v1898_v39 }
 0x5f5   : > { %v1998_v26 = vsel %vm1472_vm12, %v5527_v22, 0.0 }
 0x5f6   : > { %1682 = vadd.xlane.f32.xlu0 %v1681_v24  ;;  %1999 = vadd.xlane.f32.xlu1 %v1998_v26  ;;  %4362 = vpow2.f32 %v1996_v21 }
 0x5f7   : > { %4364 = vpow2.f32 %v1899_v29 }
 0x5f9   : > { %v2086_v28 = vpop.xlane.xlu2 %2085  ;;  %v5573_v10 = vpop.xlane.xlu1 %2177 }
 0x5fa   : > { %v2088_v61 = vsub.f32 %v5498_v58, %v2086_v28 }
 0x5fc   : > { %v5536_v31 = vpop.eup %4362  ;;  %v2091_v62 = vmul.f32 1.442695, %v2088_v61 }
 0x5fd   : > { %v2001_v32 = vsel %vm1476_vm13, %v5536_v31, 0.0  ;;  %v5542_v36 = vpop.eup %4364 }
 0x5fe   : > { %1574 = vmax.xlane.f32.xlu1 %v1573_v33  ;;  %2002 = vadd.xlane.f32.xlu0 %v2001_v32  ;;  %v1903_v40 = vsel %vm1472_vm12, %v5542_v36, 0.0 }
 0x601   : > { %v1572_v34 = vpop.xlane.xlu2 %1571 }
 0x602   : > { %v1576_v35 = vsub.f32 %v1565_v51, %v1572_v34  ;;  %v5558_v51 = vpop.xlane.xlu0 %2082 }
 0x604   : > { %v1578_v38 = vmul.f32 1.442695, %v1576_v35 }
 0x606   : > { %4366 = vpow2.f32 %v1578_v38  ;;  %1904 = vadd.xlane.f32.xlu0 %v1903_v40 }
 0x607   : > { %4368 = vpow2.f32 %v1901_v43 }
 0x609   : > { %v1621_v44 = vpop.permute.xlu2 %1620 }
 0x60a   : > { %v1626_v45 = vsel %vm1526_vm11, %v1621_v44, 0  ;;  %v2181_v55 = vpop.xlane.xlu0 %2180 }
 0x60b   : > { %1635 = vmatpush.bf16.msrb.mxu3 %v1626_v45  ;;  %v2183_v56 = vsub.f32 %v5506_v52, %v2181_v55 }
 0x60c   : > { %v5548_v46 = vpop.eup %4366 }
 0x60d   : > { %v1582_v49 = vsel %vm1472_vm12, %v5548_v46, 0.0  ;;  %v5552_v50 = vpop.eup %4368  ;;  %v2186_v0 = vmul.f32 1.442695, %v2183_v56 }
 0x60e   : > { %1583 = vadd.xlane.f32.xlu2 %v1582_v49  ;;  %v1906_v37 = vsel %vm1476_vm13, %v5552_v50, 0.0 }
 0x60f   : > { %4370 = vpow2.f32 %v2186_v0 }
 0x610   : > { %4372 = vpow2.f32 %v2091_v62 }
 0x615   : > { %v5568_v57 = vpop.eup %4370 }
 0x616   : > { %1907 = vadd.xlane.f32.xlu2 %v1906_v37  ;;  %v2191_v60 = vsel %vm1476_vm13, %v5568_v57, 0.0  ;;  %v5575_v23 = vpop.eup %4372 }
 0x617   : > { %v2096_v27 = vsel %vm1476_vm13, %v5575_v23, 0.0 }
 0x61a   : > { %1715 = vrot.lane.b32.xlu0 %v5429_v15, %s4914_s4 }
 0x62e   : > { %2035 = vrot.lane.b32.xlu2 %v5563_v54, %s4913_s26 }
 0x644   : > { %2192 = vadd.xlane.f32.xlu0 %v2191_v60 }
 0x657   : > { %2097 = vadd.xlane.f32.xlu2 %v2096_v27 }
 0x658   : > { %2225 = vrot.lane.b32.xlu0 %v5563_v54, %s4915_s17 }
 0x659   : > { %v1775_v52 = vpop.xlane.xlu1 %1774 }
 0x65a   : > { %4374 = vrcp.f32 %v1775_v52  ;;  %v1790_v13 = vand.u32 2147483648, %v1775_v52  ;;  %vm1784_vm7 = vweird.f32 %v1775_v52  ;;  %v1788_v16 = vand.u32 2147483647, %v1775_v52 }
 0x65c   : > { %v1791_v24 = vor.u32 1.1754944e-38, %v1790_v13  ;;  %vm1789_vm15 = vcmp.eq.f32.partialorder %v1788_v16, 8.507059e+37 }
 0x660   : > { %v4375_v63 = vpop.eup %4374 }
 0x661   : > { %v1780_v1 = vmul.f32 %v4375_v63, %v1775_v52  ;;  %v1778_v2 = vpop.xlane.xlu0 %1777  ;;  %v5581_v58 = vpop.xlane.xlu1 %1679  ;;  %vm1785_vm6 = vweird.f32 %v4375_v63 }
 0x662   : > { %4376 = vrcp.f32 %v1778_v2  ;;  %v1805_v17 = vand.u32 2147483648, %v1778_v2  ;;  %vm1786_vm8 = vmor %vm1784_vm7, %vm1785_vm6  ;;  %v1803_v20 = vand.u32 2147483647, %v1778_v2  ;;  %vm1799_vm14 = vweird.f32 %v1778_v2 }
 0x663   : > { %v1781_v4 = vsub.f32 1.0, %v1780_v1 }
 0x664   : > { %v1806_v26 = vor.u32 1.1754944e-38, %v1805_v17  ;;  %vm1804_vm1 = vcmp.eq.f32.partialorder %v1803_v20, 8.507059e+37 }
 0x665   : > { %v1782_v59 = vmul.f32 %v4375_v63, %v1781_v4 }
 0x667   : > { %v1783_v9 = vadd.f32 %v4375_v63, %v1782_v59 }
 0x668   : > { %v4377_v5 = vpop.eup %4376 }
 0x669   : > { %v1795_v6 = vmul.f32 %v4377_v5, %v1778_v2  ;;  %v5583_v7 = vpop.xlane.xlu0 %1682  ;;  %v5585_v12 = vpop.xlane.xlu1 %1999  ;;  %vm1800_vm9 = vweird.f32 %v4377_v5  ;;  %v1787_v21 = vsel %vm1786_vm8, %v4375_v63, %v1783_v9 }
 0x66a   : > { %4378 = vrcp.f32 %v5585_v12  ;;  %vm1801_vm0 = vmor %vm1799_vm14, %vm1800_vm9  ;;  %v1792_v28 = vsel %vm1789_vm15, %v1791_v24, %v1787_v21  ;;  %v2015_v52 = vand.u32 2147483648, %v5585_v12  ;;  %vm2009_vm3 = vweird.f32 %v5585_v12 }
 0x66b   : > { %v1796_v14 = vsub.f32 1.0, %v1795_v6  ;;  %4380 = vrcp.f32 %v5583_v7  ;;  %v5597_v43 = vmul.f32 %v5513_v3, %v1792_v28 }
 0x66c   : > { %4382 = vrcp.f32 %v5581_v58 }
 0x66d   : > { %v1797_v19 = vmul.f32 %v4377_v5, %v1796_v14  ;;  %v2016_v14 = vor.u32 1.1754944e-38, %v2015_v52 }
 0x66f   : > { %v1798_v25 = vadd.f32 %v4377_v5, %v1797_v19 }
 0x670   : > { %v4379_v33 = vpop.eup %4378 }
 0x671   : > { %v1802_v29 = vsel %vm1801_vm0, %v4377_v5, %v1798_v25  ;;  %v5590_v34 = vpop.eup %4380  ;;  %v2005_v38 = vmul.f32 %v4379_v33, %v5585_v12  ;;  %v2003_v39 = vpop.xlane.xlu0 %2002  ;;  %vm2010_vm2 = vweird.f32 %v4379_v33  ;;  %vm1704_vm0 = vweird.f32 %v5583_v7 }
 0x672   : > { %v1807_v32 = vsel %vm1804_vm1, %v1806_v26, %v1802_v29  ;;  %v1575_v40 = vpop.xlane.xlu1 %1574  ;;  %4384 = vrcp.f32 %v2003_v39  ;;  %v5599_v44 = vpop.eup %4382  ;;  %v1700_v49 = vmul.f32 %v5590_v34, %v5583_v7  ;;  %vm2011_vm4 = vmor %vm2009_vm3, %vm2010_vm2  ;;  %v2030_v4 = vand.u32 2147483648, %v2003_v39 }
 0x673   : > { %v5593_v35 = vmul.f32 %v5519_v11, %v1807_v32  ;;  %v2006_v45 = vsub.f32 1.0, %v2005_v38  ;;  %v1577_v37 = vsub.f32 %v5534_v30, %v1575_v40  ;;  %v1685_v56 = vmul.f32 %v5599_v44, %v5581_v58 }
 0x674   : > { %v1701_v3 = vsub.f32 1.0, %v1700_v49  ;;  %v2013_v30 = vand.u32 2147483647, %v5585_v12  ;;  %v2028_v6 = vand.u32 2147483647, %v2003_v39  ;;  %vm2024_vm7 = vweird.f32 %v2003_v39 }
 0x675   : > { %v1809_v11 = vpack.c.bf16 %v5593_v35, %v5597_v43  ;;  %v2007_v55 = vmul.f32 %v4379_v33, %v2006_v45  ;;  %v1580_v0 = vmul.f32 1.442695, %v1577_v37  ;;  %v1686_v27 = vsub.f32 1.0, %v1685_v56 }
 0x676   : > { %v1702_v2 = vmul.f32 %v5590_v34, %v1701_v3  ;;  %vm2014_vm6 = vcmp.eq.f32.partialorder %v2013_v30, 8.507059e+37  ;;  %v2031_v19 = vor.u32 1.1754944e-38, %v2030_v4  ;;  %vm1705_vm9 = vweird.f32 %v5590_v34 }
 0x677   : > { %4386 = vpow2.f32 %v1580_v0  ;;  %v2008_v61 = vadd.f32 %v4379_v33, %v2007_v55  ;;  %v1687_v13 = vmul.f32 %v5599_v44, %v1686_v27  ;;  %vm2029_vm14 = vcmp.eq.f32.partialorder %v2028_v6, 8.507059e+37 }
 0x678   : > { %v4385_v60 = vpop.eup %4384  ;;  %v1703_v21 = vadd.f32 %v5590_v34, %v1702_v2  ;;  %vm1690_vm15 = vweird.f32 %v5599_v44  ;;  %v1710_v25 = vand.u32 2147483648, %v5583_v7  ;;  %v1708_v29 = vand.u32 2147483647, %v5583_v7 }
 0x679   : > { %v2020_v62 = vmul.f32 %v4385_v60, %v2003_v39  ;;  %v5611_v1 = vpop.xlane.xlu0 %1904  ;;  %v2012_v59 = vsel %vm2011_vm4, %v4379_v33, %v2008_v61  ;;  %vm2025_vm5 = vweird.f32 %v4385_v60  ;;  %v1688_v28 = vadd.f32 %v5599_v44, %v1687_v13 }
 0x67a   : > { %4388 = vrcp.f32 %v5611_v1  ;;  %v2017_v17 = vsel %vm2014_vm6, %v2016_v14, %v2012_v59  ;;  %vm2026_vm8 = vmor %vm2024_vm7, %vm2025_vm5  ;;  %v1695_v39 = vand.u32 2147483648, %v5581_v58  ;;  %vm1689_vm1 = vweird.f32 %v5581_v58 }
 0x67b   : > { %v2021_v63 = vsub.f32 1.0, %v2020_v62  ;;  %v5630_v33 = vmul.f32 %v5527_v22, %v2017_v17  ;;  %v1693_v40 = vand.u32 2147483647, %v5581_v58  ;;  %vm1691_vm2 = vmor %vm1689_vm1, %vm1690_vm15  ;;  %v1711_v22 = vor.u32 1.1754944e-38, %v1710_v25 }
 0x67c   : > { %vm1709_vm3 = vcmp.eq.f32.partialorder %v1708_v29, 8.507059e+37  ;;  %v1696_v37 = vor.u32 1.1754944e-38, %v1695_v39  ;;  %v1920_v4 = vand.u32 2147483648, %v5611_v1  ;;  %vm1914_vm7 = vweird.f32 %v5611_v1 }
 0x67d   : > { %v2022_v5 = vmul.f32 %v4385_v60, %v2021_v63  ;;  %v5614_v9 = vpop.eup %4386  ;;  %vm1694_vm4 = vcmp.eq.f32.partialorder %v1693_v40, 8.507059e+37  ;;  %v2182_v25 = vsub.f32 %v5500_v48, %v5573_v10 }
 0x67e   : > { %v1585_v16 = vsel %vm1476_vm13, %v5614_v9, 0.0  ;;  %vm1706_vm13 = vmor %vm1704_vm0, %vm1705_vm9 }
 0x67f   : > { %v2023_v12 = vadd.f32 %v4385_v60, %v2022_v5  ;;  %1586 = vadd.xlane.f32.xlu1 %v1585_v16  ;;  %v1707_v45 = vsel %vm1706_vm13, %v5590_v34, %v1703_v21  ;;  %v1918_v5 = vand.u32 2147483647, %v5611_v1 }
 0x680   : > { %v4389_v38 = vpop.eup %4388  ;;  %v1712_v55 = vsel %vm1709_vm3, %v1711_v22, %v1707_v45 }
 0x681   : > { %v5620_v20 = vpop.xlane.xlu2 %1583  ;;  %v2027_v24 = vsel %vm2026_vm8, %v4385_v60, %v2023_v12  ;;  %v1910_v7 = vmul.f32 %v4389_v38, %v5611_v1  ;;  %v1713_v34 = vmul.f32 %v5525_v18, %v1712_v55  ;;  %vm1915_vm5 = vweird.f32 %v4389_v38 }
 0x682   : > { %v2032_v26 = vsel %vm2029_vm14, %v2031_v19, %v2027_v24  ;;  %vm1916_vm8 = vmor %vm1914_vm7, %vm1915_vm5  ;;  %v1921_v12 = vor.u32 1.1754944e-38, %v1920_v4  ;;  %vm1919_vm0 = vcmp.eq.f32.partialorder %v1918_v5, 8.507059e+37  ;;  %vm1593_vm1 = vweird.f32 %v5620_v20 }
 0x683   : > { %v5633_v32 = vmul.f32 %v5536_v31, %v2032_v26  ;;  %v1692_v31 = vsel %vm1691_vm2, %v5599_v44, %v1688_v28  ;;  %v1911_v0 = vsub.f32 1.0, %v1910_v7  ;;  %v1946_v44 = vsel %vm1526_vm11, %v5563_v54, 0 }
 0x684   : > { %v1697_v58 = vsel %vm1694_vm4, %v1696_v37, %v1692_v31  ;;  %v2184_v26 = vmul.f32 1.442695, %v2182_v25  ;;  %v2087_v28 = vsub.f32 %v5489_v42, %v5558_v51  ;;  %v1599_v31 = vand.u32 2147483648, %v5620_v20 }
 0x685   : > { %v2034_v49 = vpack.c.bf16 %v5633_v32, %v5630_v33  ;;  %v1698_v3 = vmul.f32 %v5517_v8, %v1697_v58  ;;  %v1912_v27 = vmul.f32 %v4389_v38, %v1911_v0  ;;  %v1597_v7 = vand.u32 2147483647, %v5620_v20 }
 0x686   : > { %v2089_v29 = vmul.f32 1.442695, %v2087_v28 }
 0x687   : > { %v1714_v52 = vpack.c.bf16 %v1713_v34, %v1698_v3  ;;  %v1913_v2 = vadd.f32 %v4389_v38, %v1912_v27  ;;  %v1600_v34 = vor.u32 1.1754944e-38, %v1599_v31  ;;  %vm1598_vm4 = vcmp.eq.f32.partialorder %v1597_v7, 8.507059e+37 }
 0x689   : > { %v1908_v56 = vpop.xlane.xlu2 %1907  ;;  %v1917_v13 = vsel %vm1916_vm8, %v4389_v38, %v1913_v2 }
 0x68a   : > { %4390 = vrcp.f32 %v1908_v56  ;;  %v1935_v18 = vand.u32 2147483648, %v1908_v56  ;;  %v1933_v59 = vand.u32 2147483647, %v1908_v56  ;;  %vm1929_vm9 = vweird.f32 %v1908_v56 }
 0x68b   : > { %v1922_v19 = vsel %vm1919_vm0, %v1921_v12, %v1917_v13  ;;  %4392 = vpow2.f32 %v2184_v26 }
 0x68c   : > { %v1716_v60 = vpop.permute.xlu0 %1715  ;;  %v1936_v14 = vor.u32 1.1754944e-38, %v1935_v18  ;;  %vm1934_vm15 = vcmp.eq.f32.partialorder %v1933_v59, 8.507059e+37  ;;  %v1923_v24 = vmul.f32 %v5542_v36, %v1922_v19  ;;  %4394 = vpow2.f32 %v2089_v29 }
 0x68d   : > { %v1721_v61 = vsel %vm1526_vm11, %v1716_v60, 0  ;;  %4396 = vrcp.f32 %v5620_v20 }
 0x68e   : > { %1730 = vmatpush.bf16.msra.mxu1 %v1721_v61 }
 0x690   : > { %v4391_v62 = vpop.eup %4390 }
 0x691   : > { %v1925_v30 = vmul.f32 %v4391_v62, %v1908_v56  ;;  %3741 = vmatmul.msk.bf16.vlgmr.msra.gmra.mxu1 %vm1472_vm12, %v1714_v52  ;;  %vm1930_vm6 = vweird.f32 %v4391_v62  ;;  %v5663_v38 = vpop.eup %4392  ;;  %v2036_v52 = vpop.permute.xlu2 %2035 }
 0x692   : > { %1955 = vmatpush.bf16.msrb.mxu1 %v1946_v44  ;;  %vm1931_vm14 = vmor %vm1929_vm9, %vm1930_vm6  ;;  %v5667_v36 = vpop.eup %4394  ;;  %v2041_v2 = vsel %vm1526_vm11, %v2036_v52, 0 }
 0x693   : > { %v1926_v63 = vsub.f32 1.0, %v1925_v30  ;;  %v4397_v42 = vpop.eup %4396 }
 0x694   : > { %v1589_v48 = vmul.f32 %v4397_v42, %v5620_v20  ;;  %vm1594_vm13 = vweird.f32 %v4397_v42 }
 0x695   : > { %v1927_v8 = vmul.f32 %v4391_v62, %v1926_v63  ;;  %vm1595_vm2 = vmor %vm1593_vm1, %vm1594_vm13 }
 0x696   : > { %v1590_v51 = vsub.f32 1.0, %v1589_v48 }
 0x697   : > { %v1928_v6 = vadd.f32 %v4391_v62, %v1927_v8 }
 0x698   : > { %1810 = vrot.lane.b32.xlu1 %v5429_v15, %s4915_s17  ;;  %v2188_v15 = vsel %vm1472_vm12, %v5663_v38, 0.0  ;;  %v1591_v39 = vmul.f32 %v4397_v42, %v1590_v51 }
 0x699   : > { %v1932_v16 = vsel %vm1931_vm14, %v4391_v62, %v1928_v6 }
 0x69a   : > { %v1937_v17 = vsel %vm1934_vm15, %v1936_v14, %v1932_v16  ;;  %v1592_v45 = vadd.f32 %v4397_v42, %v1591_v39 }
 0x69b   : > { %v1938_v21 = vmul.f32 %v5552_v50, %v1937_v17  ;;  %v2093_v50 = vsel %vm1472_vm12, %v5667_v36, 0.0 }
 0x69c   : > { %v1596_v55 = vsel %vm1595_vm2, %v4397_v42, %v1592_v45 }
 0x69d   : > { %v1939_v1 = vpack.c.bf16 %v1938_v21, %v1923_v24  ;;  %v1601_v60 = vsel %vm1598_vm4, %v1600_v34, %v1596_v55 }
 0x69e   : > { %v1602_v62 = vmul.f32 %v5548_v46, %v1601_v60 }
 0x6a1   : > { %3745 = vmatmul.msk.bf16.vlgmr.msrb.gmra.mxu1 %vm1472_vm12, %v1939_v1 }
 0x6b7   : > { %v2193_v18 = vpop.xlane.xlu0 %2192 }
 0x6b8   : > { %v2220_v16 = vand.u32 2147483648, %v2193_v18  ;;  %vm2214_vm9 = vweird.f32 %v2193_v18  ;;  %v2218_v33 = vand.u32 2147483647, %v2193_v18 }
 0x6ba   : > { %v2221_v1 = vor.u32 1.1754944e-38, %v2220_v16  ;;  %vm2219_vm0 = vcmp.eq.f32.partialorder %v2218_v33, 8.507059e+37  ;;  %v4093_v16 = vld [vmem:[%s5300_s27 + $0x18] sm:$0xff]  ;;  %v4092_v33 = vld [vmem:[%s5300_s27 + $0x10] sm:$0xff] }
 0x6c2   : > { %2189 = vadd.xlane.f32.xlu1 %v2188_v15 }
 0x6ca   : > { %2094 = vadd.xlane.f32.xlu1 %v2093_v50  ;;  %v2226_v4 = vpop.permute.xlu0 %2225  ;;  %v5692_v59 = vpop.xlane.xlu2 %2097 }
 0x6cb   : > { %v2231_v8 = vsel %vm1526_vm11, %v2226_v4, 0  ;;  %v2125_v55 = vand.u32 2147483648, %v5692_v59 }
 0x6cd   : > { %v2126_v34 = vor.u32 1.1754944e-38, %v2125_v55 }
 0x6e3   : > { %2130 = vrot.lane.b32.xlu1 %v5563_v54, %s4914_s4 }
 0x6f2   : > { %v1587_v10 = vpop.xlane.xlu1 %1586 }
 0x6f3   : > { %4398 = vrcp.f32 %v1587_v10  ;;  %v1614_v37 = vand.u32 2147483648, %v1587_v10  ;;  %v1612_v58 = vand.u32 2147483647, %v1587_v10  ;;  %vm1608_vm5 = vweird.f32 %v1587_v10 }
 0x6f4   : > { %4400 = vrcp.f32 %v2193_v18 }
 0x6f5   : > { %v1615_v3 = vor.u32 1.1754944e-38, %v1614_v37  ;;  %vm1613_vm7 = vcmp.eq.f32.partialorder %v1612_v58, 8.507059e+37 }
 0x6f9   : > { %v4399_v40 = vpop.eup %4398 }
 0x6fa   : > { %v1604_v22 = vmul.f32 %v4399_v40, %v1587_v10  ;;  %vm1609_vm3 = vweird.f32 %v4399_v40  ;;  %v4401_v46 = vpop.eup %4400 }
 0x6fb   : > { %vm1610_vm6 = vmor %vm1608_vm5, %vm1609_vm3  ;;  %vm2215_vm8 = vweird.f32 %v4401_v46 }
 0x6fc   : > { %v1605_v54 = vsub.f32 1.0, %v1604_v22  ;;  %vm2216_vm14 = vmor %vm2214_vm9, %vm2215_vm8 }
 0x6fe   : > { %v1606_v56 = vmul.f32 %v4399_v40, %v1605_v54 }
 0x700   : > { %v1607_v0 = vadd.f32 %v4399_v40, %v1606_v56 }
 0x702   : > { %v1611_v61 = vsel %vm1610_vm6, %v4399_v40, %v1607_v0 }
 0x703   : > { %v1616_v44 = vsel %vm1613_vm7, %v1615_v3, %v1611_v61  ;;  %vm2119_vm7 = vweird.f32 %v5692_v59 }
 0x704   : > { %v1617_v20 = vmul.f32 %v5614_v9, %v1616_v44  ;;  %v2210_v9 = vmul.f32 %v4401_v46, %v2193_v18 }
 0x706   : > { %v1618_v27 = vpack.c.bf16 %v1617_v20, %v1602_v62  ;;  %v2211_v5 = vsub.f32 1.0, %v2210_v9 }
 0x708   : > { %3739 = vmatmul.msk.bf16.vlgmr.msrb.gmra.mxu3 %vm1472_vm12, %v1618_v27  ;;  %v2212_v13 = vmul.f32 %v4401_v46, %v2211_v5 }
 0x70a   : > { %v1811_v30 = vpop.permute.xlu1 %1810 }
 0x70b   : > { %v1816_v63 = vsel %vm1526_vm11, %v1811_v30, 0 }
 0x70c   : > { %1825 = vmatpush.bf16.msra.mxu3 %v1816_v63 }
 0x710   : > { %2050 = vmatpush.bf16.msrb.mxu3 %v2041_v2 }
 0x718   : > { %3743 = vmatmul.msk.bf16.vlgmr.msra.gmra.mxu3 %vm1472_vm12, %v1809_v11  ;;  %v2213_v11 = vadd.f32 %v4401_v46, %v2212_v13 }
 0x719   : > { %2240 = vmatpush.bf16.msra.mxu3 %v2231_v8 }
 0x71a   : > { %v2217_v19 = vsel %vm2216_vm14, %v4401_v46, %v2213_v11  ;;  %v4096_v11 = vld [vmem:[%s5300_s27 + $0x30] sm:$0xff] }
 0x71b   : > { %v2222_v28 = vsel %vm2219_vm0, %v2221_v1, %v2217_v19 }
 0x71c   : > { %v2223_v51 = vmul.f32 %v5568_v57, %v2222_v28  ;;  %v2123_v57 = vand.u32 2147483647, %v5692_v59 }
 0x71e   : > { %vm2124_vm14 = vcmp.eq.f32.partialorder %v2123_v57, 8.507059e+37 }
 0x728   : > { %3747 = vmatmul.msk.bf16.vlgmr.msrb.gmra.mxu3 %vm1472_vm12, %v2034_v49 }
 0x735   : > { %v2190_v6 = vpop.xlane.xlu1 %2189 }
 0x736   : > { %4402 = vrcp.f32 %v2190_v6  ;;  %v2205_v17 = vand.u32 2147483648, %v2190_v6  ;;  %v2203_v24 = vand.u32 2147483647, %v2190_v6  ;;  %vm2199_vm13 = vweird.f32 %v2190_v6 }
 0x737   : > { %4404 = vrcp.f32 %v5692_v59 }
 0x738   : > { %v2206_v15 = vor.u32 1.1754944e-38, %v2205_v17  ;;  %vm2204_vm2 = vcmp.eq.f32.partialorder %v2203_v24, 8.507059e+37 }
 0x73c   : > { %v4403_v35 = vpop.eup %4402 }
 0x73d   : > { %v4405_v43 = vpop.eup %4404  ;;  %v2195_v14 = vmul.f32 %v4403_v35, %v2190_v6  ;;  %v2095_v12 = vpop.xlane.xlu1 %2094  ;;  %vm2200_vm15 = vweird.f32 %v4403_v35 }
 0x73e   : > { %4406 = vrcp.f32 %v2095_v12  ;;  %v2115_v49 = vmul.f32 %v4405_v43, %v5692_v59  ;;  %vm2201_vm1 = vmor %vm2199_vm13, %vm2200_vm15  ;;  %v2110_v7 = vand.u32 2147483648, %v2095_v12  ;;  %vm2120_vm4 = vweird.f32 %v4405_v43 }
 0x73f   : > { %v2196_v32 = vsub.f32 1.0, %v2195_v14  ;;  %vm2104_vm5 = vweird.f32 %v2095_v12  ;;  %v2108_v37 = vand.u32 2147483647, %v2095_v12  ;;  %vm2121_vm8 = vmor %vm2119_vm7, %vm2120_vm4  ;;  %v4095_v14 = vld [vmem:[%s5300_s27 + $0x28] sm:$0xff]  ;;  %vm2279_vm15 = vcmask 1043456  }
 0x740   : > { %v2116_v29 = vsub.f32 1.0, %v2115_v49  ;;  %v2111_v56 = vor.u32 1.1754944e-38, %v2110_v7  ;;  %v4090_v49 = vld [vmem:[%s5300_s27] sm:$0xff] }
 0x741   : > { %v2197_v21 = vmul.f32 %v4403_v35, %v2196_v32  ;;  %vm2109_vm9 = vcmp.eq.f32.partialorder %v2108_v37, 8.507059e+37  ;;  %v4091_v32 = vld [vmem:[%s5300_s27 + $0x8] sm:$0xff] }
 0x742   : > { %v2117_v40 = vmul.f32 %v4405_v43, %v2116_v29 }
 0x743   : > { %v2198_v25 = vadd.f32 %v4403_v35, %v2197_v21 }
 0x744   : > { %v4407_v26 = vpop.eup %4406  ;;  %v2118_v54 = vadd.f32 %v4405_v43, %v2117_v40 }
 0x745   : > { %v2202_v50 = vsel %vm2201_vm1, %v4403_v35, %v2198_v25  ;;  %v2100_v42 = vmul.f32 %v4407_v26, %v2095_v12  ;;  %vm2105_vm3 = vweird.f32 %v4407_v26  ;;  %v4094_v12 = vld [vmem:[%s5300_s27 + $0x20] sm:$0xff] }
 0x746   : > { %v2207_v48 = vsel %vm2204_vm2, %v2206_v15, %v2202_v50  ;;  %vm2106_vm6 = vmor %vm2104_vm5, %vm2105_vm3  ;;  %v2122_v58 = vsel %vm2121_vm8, %v4405_v43, %v2118_v54  ;;  %v4097_v43 = vld [vmem:[%s5300_s27 + $0x38] sm:$0xff]  ;;  %s6092_s27 = scalar_lea.vmem [#allocation15], %s5282_s13 }
 0x747   : > { %v2208_v10 = vmul.f32 %v5663_v38, %v2207_v48  ;;  %v2101_v39 = vsub.f32 1.0, %v2100_v42  ;;  %v2127_v60 = vsel %vm2124_vm14, %v2126_v34, %v2122_v58  ;;  %2352 = vmatpush.bf16.msrb.mxu0 %v4097_v43 }
 0x748   : > { %v2128_v44 = vmul.f32 %v5575_v23, %v2127_v60 }
 0x749   : > { %v2102_v45 = vmul.f32 %v4407_v26, %v2101_v39  ;;  %v2224_v22 = vpack.c.bf16 %v2223_v51, %v2208_v10 }
 0x74b   : > { %v2103_v31 = vadd.f32 %v4407_v26, %v2102_v45  ;;  %3751 = vmatmul.msk.bf16.vlgmr.msra.gmra.mxu3 %vm1472_vm12, %v2224_v22  ;;  %2353 = vmatpush.bf16.msrb.mxu0 %v4096_v11 }
 0x74d   : > { %v2107_v38 = vsel %vm2106_vm6, %v4407_v26, %v2103_v31 }
 0x74e   : > { %v2112_v0 = vsel %vm2109_vm9, %v2111_v56, %v2107_v38 }
 0x74f   : > { %v2113_v3 = vmul.f32 %v5667_v36, %v2112_v0  ;;  %v1732_v36 = vpop.f32.mrf.mxu1  ;;  %2354 = vmatpush.bf16.msrb.mxu0 %v4095_v14 }
 0x751   : > { %v2129_v20 = vpack.c.bf16 %v2128_v44, %v2113_v3  ;;  %v4332_v3 = vld [vmem:[%s6092_s27] ss:$0 sm:$0xff]  ;;  %v4438_v44 = vld [vmem:[#allocation2 + $0x10] sm:$0xff] }
 0x753   : > { %2355 = vmatpush.bf16.msrb.mxu0 %v4094_v12 }
 0x755   : > { %v2131_v61 = vpop.permute.xlu1 %2130 }
 0x756   : > { %v2136_v62 = vsel %vm1526_vm11, %v2131_v61, 0  ;;  %vm1858_vm11 = vcmask 523264  }
 0x757   : > { %2145 = vmatpush.bf16.msra.mxu1 %v2136_v62  ;;  %v1734_v4 = vpop.f32.mrf.mxu1  ;;  %2356 = vmatpush.bf16.msrb.mxu0 %v4093_v16  ;;  %v3898_v16 = vld [vmem:[%s5314_s24 + $0xe0] sm:$0xf] }
 0x75a   : > { %3749 = vmatmul.msk.bf16.vlgmr.msra.gmra.mxu1 %vm1472_vm12, %v2129_v20  ;;  %vm1861_vm12 = vcmask 785408  }
 0x75b   : > { %2357 = vmatpush.bf16.msrb.mxu0 %v4092_v33  ;;  %v4128_v33 = vld [vmem:[%s5314_s24 + $0xec] sm:$0xf0] }
 0x75f   : > { %v1957_v8 = vpop.f32.mrf.mxu1  ;;  %2358 = vmatpush.bf16.msrb.mxu0 %v4091_v32  ;;  %v4126_v32 = vld [vmem:[%s5314_s24 + $0xe4] sm:$0xf] }
 0x763   : > { %2359 = vmatpush.bf16.msrb.mxu0 %v4090_v49  ;;  %v3899_v49 = vor.u32 %v4128_v33, %v3898_v16  ;;  %v4111_v16 = vld [vmem:[%s5314_s24 + $0x6c] sm:$0xf]  ;;  %v3844_v33 = vld [vmem:[%s5314_s24 + $0x78] sm:$0xf0] }
 0x765   : > { %2658 = vmatpush.bf16.msrb.mxu1 %v3899_v49  ;;  %v3818_v49 = vld [vmem:[%s5314_s24 + $0x40] sm:$0xf] }
 0x767   : > { %v1959_v9 = vpop.f32.mrf.mxu1 }
 0x78b   : > { %v1637_v27 = vpop.f32.mrf.mxu3 }
 0x793   : > { %v1639_v52 = vpop.f32.mrf.mxu3 }
 0x79b   : > { %v1827_v30 = vpop.f32.mrf.mxu3 }
 0x79c   : > { %1850 = vrot.lane.b32.xlu2 %v1827_v30, %s4913_s26 }
 0x7a3   : > { %v1829_v63 = vpop.f32.mrf.mxu3 }
 0x7ab   : > { %v2052_v2 = vpop.f32.mrf.mxu3 }
 0x7ac   : > { %v4320_v18 = vpack.i.bf16 %v1639_v52, %v2052_v2  ;;  %v4439_v52 = vld [vmem:[#allocation2] sm:$0xff] }
 0x7ae   : > { %4321 = vrot.lane.b32.xlu0 %v4320_v18, %s4915_s17  ;;  %v4440_v18 = vld [vmem:[#allocation2 + $0x8] sm:$0xff] }
 0x7b3   : > { %v2054_v23 = vpop.f32.mrf.mxu3 }
 0x7ce   : > { %v2242_v46 = vpop.f32.mrf.mxu3 }
 0x7cf   : > { %v4325_v59 = vpack.i.bf16 %v1829_v63, %v2242_v46 }
 0x7d1   : > { %4326 = vrot.lane.b32.xlu0 %v4325_v59, %s4913_s26 }
 0x7d6   : > { %v2244_v35 = vpop.f32.mrf.mxu3 }
 0x7d7   : > { %v2147_v5 = vpop.f32.mrf.mxu1 }
 0x7d8   : > { %v4315_v6 = vpack.i.bf16 %v1734_v4, %v2147_v5 }
 0x7d9   : > { %1842 = vrot.lane.b32.xlu0 %v1732_v36, %s4914_s4 }
 0x7da   : > { %4316 = vrot.lane.b32.xlu1 %v4315_v6, %s4914_s4 }
 0x7df   : > { %v2149_v13 = vpop.f32.mrf.mxu1 }
 0x7e1   : > { %2259 = vrot.lane.b32.xlu0 %v2149_v13, %s4914_s4 }
 0x7e2   : > { %1834 = vrot.lane.b32.xlu1 %v1637_v27, %s4915_s17 }
 0x7ea   : > { %2251 = vrot.lane.b32.xlu1 %v2054_v23, %s4915_s17 }
 0x7f2   : > { %2267 = vrot.lane.b32.xlu1 %v2244_v35, %s4913_s26 }
 0x7f6   : > { %v1851_v22 = vpop.permute.xlu2 %1850 }
 0x820   : > { %v4322_v17 = vpop.permute.xlu0 %4321 }
 0x821   : > { %v4323_v19 = vunpack.i.l.bf16 %v4322_v17  ;;  %v4324_v25 = vunpack.i.h.bf16 %v4322_v17  ;;  %v3900_v17 = vld [vmem:[%s5314_s24 + $0xf0] sm:$0xf0] }
 0x823   : > { %v2271_v26 = vsel %vm1451_vm10, %v1957_v8, %v4323_v19  ;;  %v1857_v42 = vsel %vm1451_vm10, %v5496_v47, %v4324_v25  ;;  %v3906_v19 = vld [vmem:[%s5314_s24 + $0xe8] sm:$0xf]  ;;  %v4127_v25 = vld [vmem:[%s5314_s24 + $0xec] sm:$0xf] }
 0x843   : > { %v4327_v21 = vpop.permute.xlu0 %4326 }
 0x844   : > { %v4328_v28 = vunpack.i.l.bf16 %v4327_v21  ;;  %v4329_v10 = vunpack.i.h.bf16 %v4327_v21  ;;  %v4129_v21 = vld [vmem:[%s5314_s24 + $0xf4] sm:$0xf0] }
 0x84b   : > { %v1843_v40 = vpop.permute.xlu0 %1842 }
 0x84c   : > { %v4317_v24 = vpop.permute.xlu1 %4316 }
 0x84d   : > { %v4318_v1 = vunpack.i.l.bf16 %v4317_v24  ;;  %v4319_v29 = vunpack.i.h.bf16 %v4317_v24  ;;  %v3903_v24 = vor.u32 %v4126_v32, %v3900_v17  ;;  %v3847_v32 = vor.u32 %v4111_v16, %v3844_v33  ;;  %v4108_v17 = vld [vmem:[%s5314_s24 + $0x4c] sm:$0xf0] }
 0x84f   : > { %v2273_v15 = vsel %vm1858_vm11, %v2271_v26, %v4318_v1  ;;  %v1860_v48 = vsel %vm1858_vm11, %v1857_v42, %v4319_v29  ;;  %v3907_v1 = vor.u32 %v4129_v21, %v3906_v19  ;;  %v3908_v26 = vld [vmem:[%s5314_s24 + $0xf8] sm:$0xf0]  ;;  %2676 = vmatpush.bf16.msra.mxu2 %v3903_v24  ;;  %v3882_v29 = vld [vmem:[%s5314_s24 + $0xc0] sm:$0xf]  ;;  %v4106_v19 = vld [vmem:[%s5314_s24 + $0x44] sm:$0xf]  ;;  %v3819_v21 = vor.u32 %v4108_v17, %v3818_v49 }
 0x850   : > { %v2275_v50 = vsel %vm1861_vm12, %v2273_v15, %v4328_v28  ;;  %v1863_v31 = vsel %vm1861_vm12, %v1860_v48, %v4329_v10  ;;  %v3911_v28 = vor.u32 %v4127_v25, %v3908_v26  ;;  %v4124_v15 = vld [vmem:[%s5314_s24 + $0xcc] sm:$0xf0]  ;;  %v3884_v48 = vld [vmem:[%s5314_s24 + $0xd0] sm:$0xf0]  ;;  %v4125_v10 = vld [vmem:[%s5314_s24 + $0xd4] sm:$0xf0] }
 0x851   : > { %v2280_v51 = vrot.slane %v2275_v50, 4  ;;  %2694 = vmatpush.bf16.msrb.mxu3 %v3907_v1  ;;  %v4122_v50 = vld [vmem:[%s5314_s24 + $0xc4] sm:$0xf]  ;;  %v3883_v42 = vor.u32 %v4124_v15, %v3882_v29  ;;  %v3820_v24 = vld [vmem:[%s5314_s24 + $0x50] sm:$0xf0] }
 0x852   : > { %2712 = vmatpush.bf16.msra.mxu0 %v3911_v28  ;;  %v3826_v1 = vld [vmem:[%s5314_s24 + $0x48] sm:$0xf]  ;;  %v4109_v25 = vld [vmem:[%s5314_s24 + $0x54] sm:$0xf0]  ;;  %v3823_v26 = vor.u32 %v4106_v19, %v3820_v24  ;;  %v4107_v29 = vld [vmem:[%s5314_s24 + $0x4c] sm:$0xf] }
 0x853   : > { %v2285_v47 = vsel %vm2279_vm15, %v1863_v31, %v2280_v51  ;;  %v2260_v38 = vpop.permute.xlu0 %2259  ;;  %2659 = vmatpush.bf16.msrb.mxu1 %v3883_v42  ;;  %v3827_v28 = vor.u32 %v4109_v25, %v3826_v1  ;;  %v3828_v15 = vld [vmem:[%s5314_s24 + $0x58] sm:$0xf0]  ;;  %v3802_v42 = vld [vmem:[%s5314_s24 + $0x20] sm:$0xf] }
 0x854   : > { %v1835_v39 = vpop.permute.xlu1 %1834 }
 0x855   : > { %v1856_v45 = vsel %vm1451_vm10, %v5487_v41, %v1835_v39  ;;  %v3887_v39 = vor.u32 %v4122_v50, %v3884_v48  ;;  %v3831_v50 = vor.u32 %v4107_v29, %v3828_v15  ;;  %v4104_v48 = vld [vmem:[%s5314_s24 + $0x2c] sm:$0xf0]  ;;  %v4334_v29 = vld [vmem:[%s6094_s25] ss:$0 sm:$0xff] }
 0x856   : > { %v1859_v7 = vsel %vm1858_vm11, %v1856_v45, %v1843_v40  ;;  %v4123_v45 = vld [vmem:[%s5314_s24 + $0xcc] sm:$0xf] }
 0x857   : > { %v1862_v54 = vsel %vm1861_vm12, %v1859_v7, %v1851_v22  ;;  %v3892_v22 = vld [vmem:[%s5314_s24 + $0xd8] sm:$0xf0]  ;;  %2677 = vmatpush.bf16.msra.mxu2 %v3887_v39  ;;  %v3866_v7 = vld [vmem:[%s5314_s24 + $0xa0] sm:$0xf]  ;;  %v3804_v39 = vld [vmem:[%s5314_s24 + $0x30] sm:$0xf0] }
 0x858   : > { %v2286_v37 = vpack.c.bf16 %v2285_v47, %v1862_v54  ;;  %v3895_v31 = vor.u32 %v4123_v45, %v3892_v22  ;;  %v4120_v54 = vld [vmem:[%s5314_s24 + $0xac] sm:$0xf0]  ;;  %v4118_v47 = vld [vmem:[%s5314_s24 + $0xa4] sm:$0xf]  ;;  %v4105_v45 = vld [vmem:[%s5314_s24 + $0x34] sm:$0xf0] }
 0x85a   : > { %2360 = vmatmul.bf16.vlgmr.msrb.gmra.mxu0 %v2286_v37  ;;  %v3867_v37 = vor.u32 %v4120_v54, %v3866_v7  ;;  %v4103_v54 = vld [vmem:[%s5314_s24 + $0x2c] sm:$0xf] }
 0x85b   : > { %2713 = vmatpush.bf16.msra.mxu0 %v3895_v31 }
 0x85c   : > { %v2252_v55 = vpop.permute.xlu1 %2251  ;;  %2660 = vmatpush.bf16.msrb.mxu1 %v3867_v37 }
 0x85d   : > { %v2272_v57 = vsel %vm1451_vm10, %v1959_v9, %v2252_v55  ;;  %v3868_v55 = vld [vmem:[%s5314_s24 + $0xb0] sm:$0xf0] }
 0x85e   : > { %v2274_v58 = vsel %vm1858_vm11, %v2272_v57, %v2260_v38  ;;  %v3874_v57 = vld [vmem:[%s5314_s24 + $0xa8] sm:$0xf]  ;;  %v4121_v38 = vld [vmem:[%s5314_s24 + $0xb4] sm:$0xf0] }
 0x864   : > { %v2268_v56 = vpop.permute.xlu1 %2267 }
 0x865   : > { %v2276_v41 = vsel %vm1861_vm12, %v2274_v58, %v2268_v56  ;;  %v3871_v56 = vor.u32 %v4118_v47, %v3868_v55  ;;  %v3875_v58 = vor.u32 %v4121_v38, %v3874_v57  ;;  %v3812_v47 = vld [vmem:[%s5314_s24 + $0x38] sm:$0xf0]  ;;  %v3786_v57 = vld [vmem:[%s5314_s24] sm:$0xf]  ;;  %v4100_v38 = vld [vmem:[%s5314_s24 + $0xc] sm:$0xf0] }
 0x866   : > { %v2281_v34 = vrot.slane %v2276_v41, 4  ;;  %v4119_v41 = vld [vmem:[%s5314_s24 + $0xac] sm:$0xf]  ;;  %v3815_v55 = vor.u32 %v4103_v54, %v3812_v47  ;;  %v4136_v54 = vld [vmem:[%s5317_s22 + $0x30] sm:$0xff]  ;;  %v4145_v47 = vld [vmem:[%s5317_s22 + $0x78] sm:$0xff] }
 0x867   : > { %2678 = vmatpush.bf16.msra.mxu2 %v3871_v56  ;;  %v4098_v56 = vld [vmem:[%s5314_s24 + $0x4] sm:$0xf] }
 0x868   : > { %v2282_v0 = vsel %vm2279_vm15, %v2280_v51, %v2281_v34  ;;  %v3890_v51 = vld [vmem:[%s5314_s24 + $0xc8] sm:$0xf]  ;;  %v3876_v34 = vld [vmem:[%s5314_s24 + $0xb8] sm:$0xf0] }
 0x869   : > { %v2287_v60 = vpack.c.bf16 %v2282_v0, %v2282_v0  ;;  %v3891_v40 = vor.u32 %v4125_v10, %v3890_v51  ;;  %v3879_v0 = vor.u32 %v4119_v41, %v3876_v34  ;;  %v4102_v51 = vld [vmem:[%s5314_s24 + $0x24] sm:$0xf]  ;;  %v3803_v10 = vor.u32 %v4104_v48, %v3802_v42  ;;  %v3788_v34 = vld [vmem:[%s5314_s24 + $0x10] sm:$0xf0] }
 0x86a   : > { %v3807_v31 = vor.u32 %v4102_v51, %v3804_v39  ;;  %v3787_v41 = vor.u32 %v4100_v38, %v3786_v57  ;;  %v4159_v57 = vld [vmem:[%s5317_s22 + $0xe8] sm:$0xff]  ;;  %v4144_v38 = vld [vmem:[%s5317_s22 + $0x70] sm:$0xff] }
 0x86b   : > { %2365 = vmatmul.bf16.gmra.mxu0 %v2287_v60  ;;  %2695 = vmatpush.bf16.msrb.mxu3 %v3891_v40  ;;  %v3850_v60 = vld [vmem:[%s5314_s24 + $0x80] sm:$0xf]  ;;  %v3810_v40 = vld [vmem:[%s5314_s24 + $0x28] sm:$0xf] }
 0x86c   : > { %2714 = vmatpush.bf16.msra.mxu0 %v3879_v0  ;;  %v3811_v7 = vor.u32 %v4105_v45, %v3810_v40  ;;  %v3794_v0 = vld [vmem:[%s5314_s24 + $0x8] sm:$0xf] }
 0x86f   : > { %2696 = vmatpush.bf16.msrb.mxu3 %v3875_v58 }
 0x8d7   : > { %v2361_v61 = vpop.f32.mrf.mxu0 }
 0x8d8   : > { %v2370_v62 = vadd.f32 %v4438_v44, %v2361_v61  ;;  %v4114_v61 = vld [vmem:[%s5314_s24 + $0x84] sm:$0xf] }
 0x8da   : > { %v5741_v20 = vadd.f32 %v4332_v3, %v2370_v62  ;;  %v3852_v62 = vld [vmem:[%s5314_s24 + $0x90] sm:$0xf0] }
 0x8dc   : > { %2382 = vadd.xlane.f32.xlu0 %v5741_v20 }
 0x8df   : > { %v2363_v27 = vpop.f32.mrf.mxu0 }
 0x8e0   : > { %v2371_v30 = vadd.f32 %v4439_v52, %v2363_v27  ;;  %v3858_v27 = vld [vmem:[%s5314_s24 + $0x88] sm:$0xf]  ;;  %v4117_v52 = vld [vmem:[%s5314_s24 + $0x94] sm:$0xf0] }
 0x8e2   : > { %v5744_v63 = vadd.f32 %v4332_v3, %v2371_v30  ;;  %v3855_v30 = vor.u32 %v4114_v61, %v3852_v62  ;;  %v4099_v61 = vld [vmem:[%s5314_s24 + $0xc] sm:$0xf] }
 0x8e4   : > { %2384 = vadd.xlane.f32.xlu1 %v5744_v63  ;;  %2679 = vmatpush.bf16.msra.mxu2 %v3855_v30 }
 0x8e8   : > { %v2366_v2 = vpop.f32.mrf.mxu0 }
 0x8e9   : > { %v2372_v36 = vadd.f32 %v4440_v18, %v2366_v2  ;;  %v3859_v2 = vor.u32 %v4117_v52, %v3858_v27  ;;  %v4115_v18 = vld [vmem:[%s5314_s24 + $0x8c] sm:$0xf] }
 0x8eb   : > { %v5747_v4 = vadd.f32 %v4332_v3, %v2372_v36  ;;  %v4116_v3 = vld [vmem:[%s5314_s24 + $0x8c] sm:$0xf0]  ;;  %v3860_v36 = vld [vmem:[%s5314_s24 + $0x98] sm:$0xf0]  ;;  %2697 = vmatpush.bf16.msrb.mxu3 %v3859_v2 }
 0x8ec   : > { %v3851_v44 = vor.u32 %v4116_v3, %v3850_v60  ;;  %v3791_v60 = vor.u32 %v4098_v56, %v3788_v34  ;;  %v4101_v3 = vld [vmem:[%s5314_s24 + $0x14] sm:$0xf0]  ;;  %v4152_v56 = vld [vmem:[%s5317_s22 + $0xb0] sm:$0xff]  ;;  %v4143_v34 = vld [vmem:[%s5317_s22 + $0x68] sm:$0xff] }
 0x8ed   : > { %2386 = vadd.xlane.f32.xlu2 %v5747_v4  ;;  %v3795_v62 = vor.u32 %v4101_v3, %v3794_v0  ;;  %v4151_v0 = vld [vmem:[%s5317_s22 + $0xa8] sm:$0xff]  ;;  %v4157_v3 = vld [vmem:[%s5317_s22 + $0xd8] sm:$0xff] }
 0x8ee   : > { %2661 = vmatpush.bf16.msrb.mxu1 %v3851_v44  ;;  %v3796_v44 = vld [vmem:[%s5314_s24 + $0x18] sm:$0xf0] }
 0x8ef   : > { %v3799_v27 = vor.u32 %v4099_v61, %v3796_v44  ;;  %v4142_v61 = vld [vmem:[%s5317_s22 + $0x60] sm:$0xff] }
 0x8f0   : > { %v2368_v8 = vpop.f32.mrf.mxu0  ;;  %v4150_v44 = vld [vmem:[%s5317_s22 + $0xa0] sm:$0xff] }
 0x8f1   : > { %v3863_v8 = vor.u32 %v4115_v18, %v3860_v36 }
 0x8f3   : > { %2715 = vmatpush.bf16.msra.mxu0 %v3863_v8 }
 0x8f7   : > { %2716 = vmatpush.bf16.msra.mxu0 %v3847_v32 }
 0x8fb   : > { %2717 = vmatpush.bf16.msra.mxu0 %v3831_v50 }
 0x8ff   : > { %2718 = vmatpush.bf16.msra.mxu0 %v3815_v55  ;;  %v4135_v55 = vld [vmem:[%s5317_s22 + $0x28] sm:$0xff] }
 0x903   : > { %2719 = vmatpush.bf16.msra.mxu0 %v3799_v27  ;;  %v4132_v27 = vld [vmem:[%s5317_s22 + $0x10] sm:$0xff] }
 0x94f   : > { %v2383_v23 = vpop.xlane.xlu0 %2382 }
 0x950   : > { %v2388_v46 = vmul.f32 %v2383_v23, %v5343_v53  ;;  %v3834_v23 = vld [vmem:[%s5314_s24 + $0x60] sm:$0xf] }
 0x952   : > { %v5752_v9 = vsub.f32 %v5741_v20, %v2388_v46  ;;  %v4112_v46 = vld [vmem:[%s5314_s24 + $0x6c] sm:$0xf0] }
 0x954   : > { %v2394_v59 = vmul.f32 %v5752_v9, %v5752_v9 }
 0x956   : > { %2397 = vadd.xlane.f32.xlu0 %v2394_v59  ;;  %v4110_v59 = vld [vmem:[%s5314_s24 + $0x64] sm:$0xf] }
 0x957   : > { %v2385_v5 = vpop.xlane.xlu1 %2384 }
 0x958   : > { %v2389_v6 = vmul.f32 %v2385_v5, %v5343_v53  ;;  %v3835_v5 = vor.u32 %v4112_v46, %v3834_v23 }
 0x95a   : > { %v5758_v13 = vsub.f32 %v5744_v63, %v2389_v6  ;;  %v3836_v6 = vld [vmem:[%s5314_s24 + $0x70] sm:$0xf0]  ;;  %2662 = vmatpush.bf16.msrb.mxu1 %v3835_v5 }
 0x95c   : > { %v2395_v35 = vmul.f32 %v5758_v13, %v5758_v13 }
 0x95e   : > { %2399 = vadd.xlane.f32.xlu1 %v2395_v35  ;;  %v3842_v35 = vld [vmem:[%s5314_s24 + $0x68] sm:$0xf]  ;;  %2663 = vmatpush.bf16.msrb.mxu1 %v3819_v21 }
 0x960   : > { %v2387_v43 = vpop.xlane.xlu2 %2386 }
 0x961   : > { %v2390_v11 = vmul.f32 %v2387_v43, %v5343_v53  ;;  %v4113_v43 = vld [vmem:[%s5314_s24 + $0x74] sm:$0xf0]  ;;  %s6093_s24 = scalar_lea.vmem [#allocation17], %s5282_s13 }
 0x962   : > { %2664 = vmatpush.bf16.msrb.mxu1 %v3803_v10  ;;  %v4333_v17 = vld [vmem:[%s6093_s24] ss:$0 sm:$0xff] }
 0x963   : > { %v5764_v14 = vsub.f32 %v5747_v4, %v2390_v11  ;;  %v3839_v11 = vor.u32 %v4110_v59, %v3836_v6 }
 0x965   : > { %v2396_v12 = vmul.f32 %v5764_v14, %v5764_v14  ;;  %2680 = vmatpush.bf16.msra.mxu2 %v3839_v11 }
 0x966   : > { %2665 = vmatpush.bf16.msrb.mxu1 %v3787_v41  ;;  %v4158_v41 = vld [vmem:[%s5317_s22 + $0xe0] sm:$0xff] }
 0x967   : > { %2401 = vadd.xlane.f32.xlu0 %v2396_v12  ;;  %v3843_v12 = vor.u32 %v4113_v43, %v3842_v35 }
 0x969   : > { %2698 = vmatpush.bf16.msrb.mxu3 %v3843_v12  ;;  %2681 = vmatpush.bf16.msra.mxu2 %v3823_v26 }
 0x96d   : > { %2699 = vmatpush.bf16.msrb.mxu3 %v3827_v28  ;;  %2682 = vmatpush.bf16.msra.mxu2 %v3807_v31  ;;  %v4137_v31 = vld [vmem:[%s5317_s22 + $0x38] sm:$0xff] }
 0x96e   : > { %3106 = vmatpush.bf16.msra.mxu1 %v4137_v31 }
 0x971   : > { %2700 = vmatpush.bf16.msrb.mxu3 %v3811_v7  ;;  %2683 = vmatpush.bf16.msra.mxu2 %v3791_v60  ;;  %v4161_v7 = vld [vmem:[%s5317_s22 + $0xf8] sm:$0xff] }
 0x972   : > { %3160 = vmatpush.bf16.msrb.mxu0 %v4161_v7  ;;  %3107 = vmatpush.bf16.msra.mxu1 %v4136_v54  ;;  %v4133_v60 = vld [vmem:[%s5317_s22 + $0x18] sm:$0xff] }
 0x975   : > { %2701 = vmatpush.bf16.msrb.mxu3 %v3795_v62  ;;  %3124 = vmatpush.bf16.msrb.mxu2 %v4145_v47  ;;  %v2488_v62 = vld [vmem:[%s5335_s3] sm:$0xf] }
 0x976   : > { %3108 = vmatpush.bf16.msra.mxu1 %v4135_v55 }
 0x979   : > { %3125 = vmatpush.bf16.msrb.mxu2 %v4144_v38 }
 0x97d   : > { %3126 = vmatpush.bf16.msrb.mxu2 %v4143_v34 }
 0x981   : > { %3127 = vmatpush.bf16.msrb.mxu2 %v4142_v61 }
 0x9c9   : > { %v2398_v22 = vpop.xlane.xlu0 %2397 }
 0x9ca   : > { %v2403_v37 = vmul.f32 %v2398_v22, %v5343_v53 }
 0x9cc   : > { %v2406_v58 = vadd.f32 1e-06, %v2403_v37  ;;  %v4153_v37 = vld [vmem:[%s5317_s22 + $0xb8] sm:$0xff] }
 0x9cd   : > { %3142 = vmatpush.bf16.msra.mxu3 %v4153_v37 }
 0x9ce   : > { %4408 = vrsqrt.f32 %v2406_v58  ;;  %vm2415_vm0 = vweird.f32 %v2406_v58 }
 0x9d1   : > { %v2400_v52 = vpop.xlane.xlu1 %2399  ;;  %3143 = vmatpush.bf16.msra.mxu3 %v4152_v56 }
 0x9d2   : > { %v2404_v30 = vmul.f32 %v2400_v52, %v5343_v53  ;;  %v4156_v52 = vld [vmem:[%s5317_s22 + $0xd0] sm:$0xff] }
 0x9d4   : > { %v4409_v2 = vpop.eup %4408  ;;  %v2407_v18 = vadd.f32 1e-06, %v2404_v30  ;;  %v4141_v30 = vld [vmem:[%s5317_s22 + $0x58] sm:$0xff] }
 0x9d5   : > { %v2410_v36 = vmul.f32 %v4409_v2, %v2406_v58  ;;  %vm2416_vm10 = vweird.f32 %v4409_v2  ;;  %v4134_v58 = vld [vmem:[%s5317_s22 + $0x20] sm:$0xff]  ;;  %3144 = vmatpush.bf16.msra.mxu3 %v4151_v0  ;;  %3128 = vmatpush.bf16.msrb.mxu2 %v4141_v30 }
 0x9d6   : > { %4410 = vrsqrt.f32 %v2407_v18  ;;  %vm2417_vm13 = vmor %vm2415_vm0, %vm2416_vm10  ;;  %vm2425_vm2 = vweird.f32 %v2407_v18  ;;  %3109 = vmatpush.bf16.msra.mxu1 %v4134_v58 }
 0x9d7   : > { %v2411_v8 = vmul.f32 %v4409_v2, %v2410_v36  ;;  %v5867_v36 = vperm.slane %v2488_v62, 3 }
 0x9d9   : > { %v2412_v23 = vmul.f32 0.5, %v2411_v8  ;;  %3145 = vmatpush.bf16.msra.mxu3 %v4150_v44  ;;  %v4131_v8 = vld [vmem:[%s5317_s22 + $0x8] sm:$0xff] }
 0x9da   : > { %v2402_v46 = vpop.xlane.xlu0 %2401  ;;  %3110 = vmatpush.bf16.msra.mxu1 %v4133_v60 }
 0x9db   : > { %v2413_v59 = vsub.f32 1.5, %v2412_v23  ;;  %v2405_v5 = vmul.f32 %v2402_v46, %v5343_v53  ;;  %v4155_v23 = vld [vmem:[%s5317_s22 + $0xc8] sm:$0xff] }
 0x9dc   : > { %v4411_v6 = vpop.eup %4410 }
 0x9dd   : > { %v2414_v35 = vmul.f32 %v4409_v2, %v2413_v59  ;;  %v2420_v43 = vmul.f32 %v4411_v6, %v2407_v18  ;;  %v2408_v11 = vadd.f32 1e-06, %v2405_v5  ;;  %vm2426_vm1 = vweird.f32 %v4411_v6  ;;  %v4140_v59 = vld [vmem:[%s5317_s22 + $0x50] sm:$0xff] }
 0x9de   : > { %vm2427_vm3 = vmor %vm2425_vm2, %vm2426_vm1  ;;  %3111 = vmatpush.bf16.msra.mxu1 %v4132_v27  ;;  %v5865_v18 = vperm.slane %v2488_v62, 0  ;;  %v4148_v5 = vld [vmem:[%s5317_s22 + $0x90] sm:$0xff]  ;;  %3129 = vmatpush.bf16.msrb.mxu2 %v4140_v59 }
 0x9df   : > { %v2421_v12 = vmul.f32 %v4411_v6, %v2420_v43  ;;  %4412 = vrsqrt.f32 %v2408_v11  ;;  %v2418_v16 = vsel %vm2417_vm13, %v4409_v2, %v2414_v35  ;;  %vm2435_vm5 = vweird.f32 %v2408_v11  ;;  %v4149_v2 = vld [vmem:[%s5317_s22 + $0x98] sm:$0xff] }
 0x9e0   : > { %v2439_v49 = vmul.f32 %v2418_v16, %v5752_v9  ;;  %3146 = vmatpush.bf16.msra.mxu3 %v4149_v2 }
 0x9e1   : > { %v2422_v33 = vmul.f32 0.5, %v2421_v12  ;;  %v4154_v12 = vld [vmem:[%s5317_s22 + $0xc0] sm:$0xff] }
 0x9e2   : > { %v2445_v28 = vmul.f32 %v4333_v17, %v2439_v49  ;;  %3112 = vmatpush.bf16.msra.mxu1 %v4131_v8  ;;  %v5887_v49 = vperm.slane %v2488_v62, 2 }
 0x9e3   : > { %v2423_v32 = vsub.f32 1.5, %v2422_v33  ;;  %v5883_v33 = vperm.slane %v2488_v62, 1 }
 0x9e4   : > { %v2451_v48 = vadd.f32 %v4334_v29, %v2445_v28  ;;  %3147 = vmatpush.bf16.msra.mxu3 %v4148_v5 }
 0x9e5   : > { %v4413_v19 = vpop.eup %4412  ;;  %v2424_v21 = vmul.f32 %v4411_v6, %v2423_v32 }
 0x9e6   : > { %v2430_v24 = vmul.f32 %v4413_v19, %v2408_v11  ;;  %vm2436_vm4 = vweird.f32 %v4413_v19  ;;  %v4130_v11 = vld [vmem:[%s5317_s22] sm:$0xff] }
 0x9e7   : > { %v2428_v1 = vsel %vm2427_vm3, %v4411_v6, %v2424_v21  ;;  %vm2437_vm6 = vmor %vm2435_vm5, %vm2436_vm4  ;;  %3113 = vmatpush.bf16.msra.mxu1 %v4130_v11 }
 0x9e8   : > { %v2440_v25 = vmul.f32 %v2428_v1, %v5758_v13  ;;  %v2431_v26 = vmul.f32 %v4413_v19, %v2430_v24 }
 0x9ea   : > { %v2432_v15 = vmul.f32 0.5, %v2431_v26  ;;  %v2446_v50 = vmul.f32 %v4333_v17, %v2440_v25 }
 0x9ec   : > { %v2433_v42 = vsub.f32 1.5, %v2432_v15  ;;  %v2452_v9 = vadd.f32 %v4334_v29, %v2446_v50  ;;  %v4146_v15 = vld [vmem:[%s5317_s22 + $0x80] sm:$0xff] }
 0x9ee   : > { %v2434_v51 = vmul.f32 %v4413_v19, %v2433_v42  ;;  %v2454_v10 = vpack.c.bf16 %v2452_v9, %v2451_v48 }
 0x9f0   : > { %v2438_v39 = vsel %vm2437_vm6, %v4413_v19, %v2434_v51  ;;  %2666 = vmatmul.bf16.vlgmr.msrb.gmra.mxu1 %v2454_v10  ;;  %2684 = vmatmul.bf16.vlgmr.msra.gmra.mxu2 %v2454_v10  ;;  %v4147_v19 = vld [vmem:[%s5317_s22 + $0x88] sm:$0xff] }
 0x9f1   : > { %2702 = vmatmul.bf16.vlgmr.msrb.gmra.mxu3 %v2454_v10  ;;  %2720 = vmatmul.bf16.vlgmr.msra.gmra.mxu0 %v2454_v10  ;;  %v2441_v13 = vmul.f32 %v2438_v39, %v5764_v14  ;;  %v4160_v14 = vld [vmem:[%s5317_s22 + $0xf0] sm:$0xff] }
 0x9f2   : > { %3161 = vmatpush.bf16.msrb.mxu0 %v4160_v14  ;;  %3148 = vmatpush.bf16.msra.mxu3 %v4147_v19 }
 0x9f3   : > { %v2447_v40 = vmul.f32 %v4333_v17, %v2441_v13  ;;  %v4139_v17 = vld [vmem:[%s5317_s22 + $0x48] sm:$0xff] }
 0x9f4   : > { %3130 = vmatpush.bf16.msrb.mxu2 %v4139_v17 }
 0x9f5   : > { %v2453_v45 = vadd.f32 %v4334_v29, %v2447_v40  ;;  %v4138_v29 = vld [vmem:[%s5317_s22 + $0x40] sm:$0xff] }
 0x9f6   : > { %3162 = vmatpush.bf16.msrb.mxu0 %v4159_v57  ;;  %3149 = vmatpush.bf16.msra.mxu3 %v4146_v15 }
 0x9f7   : > { %v2455_v22 = vpack.c.bf16 %v2453_v45, %v2453_v45 }
 0x9f8   : > { %3131 = vmatpush.bf16.msrb.mxu2 %v4138_v29 }
 0x9fa   : > { %3163 = vmatpush.bf16.msrb.mxu0 %v4158_v41 }
 0x9fe   : > { %3164 = vmatpush.bf16.msrb.mxu0 %v4157_v3 }
 0xa00   : > { %2671 = vmatmul.bf16.gmra.mxu1 %v2455_v22  ;;  %2689 = vmatmul.bf16.gmra.mxu2 %v2455_v22 }
 0xa01   : > { %2707 = vmatmul.bf16.gmra.mxu3 %v2455_v22  ;;  %2725 = vmatmul.bf16.gmra.mxu0 %v2455_v22 }
 0xa02   : > { %3165 = vmatpush.bf16.msrb.mxu0 %v4156_v52 }
 0xa06   : > { %3166 = vmatpush.bf16.msrb.mxu0 %v4155_v23 }
 0xa0a   : > { %3167 = vmatpush.bf16.msrb.mxu0 %v4154_v12 }
 0xa6d   : > { %v2667_v46 = vpop.f32.mrf.mxu1 }
 0xa6e   : > { %v5874_v6 = vadd.f32 %v2667_v46, %v5865_v18  ;;  %v2721_v35 = vpop.f32.mrf.mxu0 }
 0xa6f   : > { %v5877_v43 = vadd.f32 %v2721_v35, %v5867_v36 }
 0xa70   : > { %v2730_v16 = vmul.f32 %v5874_v6, %v5874_v6 }
 0xa71   : > { %v2733_v32 = vmul.f32 %v5877_v43, %v5877_v43 }
 0xa72   : > { %v2742_v21 = vmul.f32 %v2730_v16, %v5874_v6 }
 0xa73   : > { %v2745_v24 = vmul.f32 %v2733_v32, %v5877_v43  ;;  %v2685_v1 = vpop.f32.mrf.mxu2 }
 0xa74   : > { %v2754_v25 = vmul.f32 0.044715, %v2742_v21  ;;  %v5894_v26 = vadd.f32 %v2685_v1, %v5883_v33  ;;  %v2703_v28 = vpop.f32.mrf.mxu3 }
 0xa75   : > { %v2757_v50 = vmul.f32 0.044715, %v2745_v24  ;;  %v5899_v42 = vadd.f32 %v2703_v28, %v5887_v49  ;;  %v2669_v48 = vpop.f32.mrf.mxu1 }
 0xa76   : > { %v2766_v9 = vadd.f32 %v2754_v25, %v5874_v6  ;;  %v2731_v51 = vmul.f32 %v5894_v26, %v5894_v26  ;;  %v5905_v10 = vadd.f32 %v2669_v48, %v5865_v18  ;;  %v2723_v39 = vpop.f32.mrf.mxu0 }
 0xa77   : > { %v2769_v13 = vadd.f32 %v2757_v50, %v5877_v43  ;;  %v2732_v40 = vmul.f32 %v5899_v42, %v5899_v42  ;;  %v5911_v45 = vadd.f32 %v2723_v39, %v5867_v36 }
 0xa78   : > { %v2778_v22 = vmul.f32 0.7978846, %v2766_v9  ;;  %v2743_v31 = vmul.f32 %v2731_v51, %v5894_v26  ;;  %v2734_v7 = vmul.f32 %v5905_v10, %v5905_v10 }
 0xa79   : > { %v2781_v54 = vmul.f32 0.7978846, %v2769_v13  ;;  %v2744_v14 = vmul.f32 %v2732_v40, %v5899_v42  ;;  %v2737_v47 = vmul.f32 %v5911_v45, %v5911_v45 }
 0xa7a   : > { %v2755_v37 = vmul.f32 0.044715, %v2743_v31  ;;  %v2746_v55 = vmul.f32 %v2734_v7, %v5905_v10  ;;  %4414 = vtanh.f32 %v2778_v22 }
 0xa7b   : > { %v2756_v57 = vmul.f32 0.044715, %v2744_v14  ;;  %v2749_v38 = vmul.f32 %v2737_v47, %v5911_v45  ;;  %v2687_v56 = vpop.f32.mrf.mxu2  ;;  %4416 = vtanh.f32 %v2781_v54 }
 0xa7c   : > { %v2767_v58 = vadd.f32 %v2755_v37, %v5894_v26  ;;  %v2758_v41 = vmul.f32 0.044715, %v2746_v55  ;;  %v5923_v34 = vadd.f32 %v2687_v56, %v5883_v33  ;;  %v2705_v0 = vpop.f32.mrf.mxu3 }
 0xa7d   : > { %v2768_v60 = vadd.f32 %v2756_v57, %v5899_v42  ;;  %v2761_v3 = vmul.f32 0.044715, %v2749_v38  ;;  %v5927_v61 = vadd.f32 %v2705_v0, %v5887_v49  ;;  %v2672_v44 = vpop.f32.mrf.mxu1 }
 0xa7e   : > { %v2779_v62 = vmul.f32 0.7978846, %v2767_v58  ;;  %v2770_v27 = vadd.f32 %v2758_v41, %v5905_v10  ;;  %v2735_v52 = vmul.f32 %v5923_v34, %v5923_v34  ;;  %v5933_v30 = vadd.f32 %v2672_v44, %v5865_v18  ;;  %v2726_v2 = vpop.f32.mrf.mxu0 }
 0xa7f   : > { %v2780_v8 = vmul.f32 0.7978846, %v2768_v60  ;;  %v2773_v23 = vadd.f32 %v2761_v3, %v5911_v45  ;;  %v2736_v46 = vmul.f32 %v5927_v61, %v5927_v61  ;;  %v5939_v59 = vadd.f32 %v2726_v2, %v5867_v36 }
 0xa80   : > { %4418 = vtanh.f32 %v2779_v62  ;;  %v2782_v5 = vmul.f32 0.7978846, %v2770_v27  ;;  %v2747_v35 = vmul.f32 %v2735_v52, %v5923_v34  ;;  %v2738_v11 = vmul.f32 %v5933_v30, %v5933_v30  ;;  %v4415_v12 = vpop.eup %4414 }
 0xa81   : > { %4420 = vtanh.f32 %v2780_v8  ;;  %v2785_v18 = vmul.f32 0.7978846, %v2773_v23  ;;  %v2748_v16 = vmul.f32 %v2736_v46, %v5927_v61  ;;  %v4417_v32 = vpop.eup %4416  ;;  %v2741_v21 = vmul.f32 %v5939_v59, %v5939_v59 }
 0xa82   : > { %4422 = vtanh.f32 %v2782_v5  ;;  %v2759_v17 = vmul.f32 0.044715, %v2747_v35  ;;  %v2750_v19 = vmul.f32 %v2738_v11, %v5933_v30  ;;  %v2802_v1 = vadd.f32 1.0, %v4415_v12 }
 0xa83   : > { %4424 = vtanh.f32 %v2785_v18  ;;  %v2760_v36 = vmul.f32 0.044715, %v2748_v16  ;;  %v2690_v24 = vpop.f32.mrf.mxu2  ;;  %v2805_v50 = vadd.f32 1.0, %v4417_v32  ;;  %v2753_v9 = vmul.f32 %v2741_v21, %v5939_v59 }
 0xa84   : > { %v2771_v25 = vadd.f32 %v2759_v17, %v5923_v34  ;;  %v2762_v28 = vmul.f32 0.044715, %v2750_v19  ;;  %v5950_v29 = vadd.f32 %v2690_v24, %v5883_v33  ;;  %v2708_v15 = vpop.f32.mrf.mxu3  ;;  %v2814_v55 = vmul.f32 0.5, %v2802_v1 }
 0xa85   : > { %v2772_v48 = vadd.f32 %v2760_v36, %v5927_v61  ;;  %v5955_v51 = vadd.f32 %v2708_v15, %v5887_v49  ;;  %v2674_v39 = vpop.f32.mrf.mxu1  ;;  %v2765_v14 = vmul.f32 0.044715, %v2753_v9  ;;  %v2817_v56 = vmul.f32 0.5, %v2805_v50 }
 0xa86   : > { %v4419_v13 = vpop.eup %4418  ;;  %v2783_v40 = vmul.f32 0.7978846, %v2771_v25  ;;  %v2739_v22 = vmul.f32 %v5950_v29, %v5950_v29  ;;  %v2728_v31 = vpop.f32.mrf.mxu0  ;;  %v2774_v7 = vadd.f32 %v2762_v28, %v5933_v30  ;;  %v2826_v5 = vmul.f32 %v2814_v55, %v5874_v6 }
 0xa87   : > { %v4421_v33 = vpop.eup %4420  ;;  %v2784_v54 = vmul.f32 0.7978846, %v2772_v48  ;;  %v2740_v47 = vmul.f32 %v5955_v51, %v5955_v51  ;;  %v2803_v0 = vadd.f32 1.0, %v4419_v13  ;;  %v2777_v52 = vadd.f32 %v2765_v14, %v5939_v59 }
 0xa88   : > { %v4423_v37 = vpop.eup %4422  ;;  %4426 = vtanh.f32 %v2783_v40  ;;  %v2751_v49 = vmul.f32 %v2739_v22, %v5950_v29  ;;  %v2786_v57 = vmul.f32 0.7978846, %v2774_v7  ;;  %v2804_v2 = vadd.f32 1.0, %v4421_v33 }
 0xa89   : > { %v4425_v38 = vpop.eup %4424  ;;  %v2806_v58 = vadd.f32 1.0, %v4423_v37  ;;  %4428 = vtanh.f32 %v2784_v54  ;;  %v2752_v41 = vmul.f32 %v2740_v47, %v5955_v51  ;;  %v2789_v11 = vmul.f32 0.7978846, %v2777_v52 }
 0xa8a   : > { %v2809_v60 = vadd.f32 1.0, %v4425_v38  ;;  %v2763_v3 = vmul.f32 0.044715, %v2751_v49  ;;  %4430 = vtanh.f32 %v2786_v57  ;;  %v2829_v16 = vmul.f32 %v2817_v56, %v5877_v43 }
 0xa8b   : > { %v2818_v44 = vmul.f32 0.5, %v2806_v58  ;;  %v2764_v62 = vmul.f32 0.044715, %v2752_v41  ;;  %v2692_v27 = vpop.f32.mrf.mxu2  ;;  %v2815_v32 = vmul.f32 0.5, %v2803_v0  ;;  %4432 = vtanh.f32 %v2789_v11 }
 0xa8c   : > { %v2821_v8 = vmul.f32 0.5, %v2809_v60  ;;  %v2710_v23 = vpop.f32.mrf.mxu3  ;;  %v2775_v46 = vadd.f32 %v2763_v3, %v5950_v29  ;;  %v2816_v28 = vmul.f32 0.5, %v2804_v2 }
 0xa8d   : > { %v2830_v35 = vmul.f32 %v2818_v44, %v5905_v10  ;;  %v2776_v12 = vadd.f32 %v2764_v62, %v5955_v51  ;;  %v2827_v43 = vmul.f32 %v2815_v32, %v5894_v26 }
 0xa8e   : > { %v4427_v18 = vpop.eup %4426  ;;  %v2833_v17 = vmul.f32 %v2821_v8, %v5911_v45  ;;  %v2787_v19 = vmul.f32 0.7978846, %v2775_v46  ;;  %v2828_v9 = vmul.f32 %v2816_v28, %v5899_v42 }
 0xa8f   : > { %v4429_v36 = vpop.eup %4428  ;;  %v2807_v21 = vadd.f32 1.0, %v4427_v18  ;;  %v2838_v24 = vpack.c.bf16 %v2830_v35, %v2826_v5  ;;  %v2788_v1 = vmul.f32 0.7978846, %v2776_v12 }
 0xa90   : > { %v4431_v25 = vpop.eup %4430  ;;  %v2808_v6 = vadd.f32 1.0, %v4429_v36  ;;  %v2841_v15 = vpack.c.bf16 %v2833_v17, %v2829_v16  ;;  %4434 = vtanh.f32 %v2787_v19 }
 0xa91   : > { %v2819_v10 = vmul.f32 0.5, %v2807_v21  ;;  %3114 = vmatmul.bf16.vlgmr.msra.gmra.mxu1 %v2838_v24  ;;  %4436 = vtanh.f32 %v2788_v1  ;;  %v2810_v48 = vadd.f32 1.0, %v4431_v25  ;;  %v4433_v13 = vpop.eup %4432 }
 0xa92   : > { %v2820_v50 = vmul.f32 0.5, %v2808_v6  ;;  %3168 = vmatmul.bf16.vlgmr.msrb.gmra.mxu0 %v2841_v15  ;;  %v2813_v7 = vadd.f32 1.0, %v4433_v13 }
 0xa93   : > { %v2831_v45 = vmul.f32 %v2819_v10, %v5923_v34  ;;  %v2822_v54 = vmul.f32 0.5, %v2810_v48 }
 0xa94   : > { %v2832_v39 = vmul.f32 %v2820_v50, %v5927_v61  ;;  %v2825_v14 = vmul.f32 0.5, %v2813_v7 }
 0xa95   : > { %v2839_v40 = vpack.c.bf16 %v2831_v45, %v2827_v43  ;;  %v2834_v26 = vmul.f32 %v2822_v54, %v5933_v30  ;;  %v4335_v30 = vld [vmem:[%s944_s21] ss:$0 sm:$0xff]  ;;  %s6096_s21 = sld [smem:[#allocation34_spill]] }
 0xa96   : > { %v4435_v22 = vpop.eup %4434  ;;  %v2840_v31 = vpack.c.bf16 %v2832_v39, %v2828_v9  ;;  %v2837_v34 = vmul.f32 %v2825_v14, %v5939_v59 }
 0xa97   : > { %v4437_v33 = vpop.eup %4436  ;;  %3132 = vmatmul.bf16.vlgmr.msrb.gmra.mxu2 %v2839_v40  ;;  %v2811_v47 = vadd.f32 1.0, %v4435_v22  ;;  %v2842_v61 = vpack.c.bf16 %v2834_v26, %v2834_v26 }
 0xa98   : > { %3150 = vmatmul.bf16.vlgmr.msra.gmra.mxu3 %v2840_v31  ;;  %v2812_v37 = vadd.f32 1.0, %v4437_v33  ;;  %v2845_v49 = vpack.c.bf16 %v2837_v34, %v2837_v34 }
 0xa99   : > { %v2823_v42 = vmul.f32 0.5, %v2811_v47 }
 0xa9a   : > { %v2824_v55 = vmul.f32 0.5, %v2812_v37 }
 0xa9b   : > { %v2835_v57 = vmul.f32 %v2823_v42, %v5950_v29  ;;  %p4040_p8 = scmp.ne.s32.totalorder %s6096_s21, 1 }
 0xa9c   : > { %v2836_v38 = vmul.f32 %v2824_v55, %v5955_v51  ;;  %s6097_s0 = sld [smem:[#allocation46_spill]] (!%p4040_p8) }
 0xa9d   : > { %v2843_v56 = vpack.c.bf16 %v2835_v57, %v2835_v57  ;;  %s6098_s20 = sld [smem:[#allocation47_spill]] (!%p4040_p8) }
 0xa9e   : > { %v2844_v58 = vpack.c.bf16 %v2836_v38, %v2836_v38 }
 0xaa1   : > { %3119 = vmatmul.bf16.gmra.mxu1 %v2842_v61 }
 0xaa2   : > { %3173 = vmatmul.bf16.gmra.mxu0 %v2845_v49 }
 0xaa7   : > { %3137 = vmatmul.bf16.gmra.mxu2 %v2843_v56 }
 0xaa8   : > { %3155 = vmatmul.bf16.gmra.mxu3 %v2844_v58 }
 0xb0e   : > { %v3115_v41 = vpop.f32.mrf.mxu1 }
 0xb0f   : > { %v3169_v0 = vpop.f32.mrf.mxu0  ;;  %v3116_v3 = vadd.f32 %v4335_v30, %v3115_v41 }
 0xb16   : > { %v3117_v59 = vpop.f32.mrf.mxu1 }
 0xb17   : > { %v3171_v60 = vpop.f32.mrf.mxu0  ;;  %v3118_v8 = vadd.f32 %v4335_v30, %v3117_v59 }
 0xb1a   : > { %v3133_v44 = vpop.f32.mrf.mxu2 }
 0xb1b   : > { %v3134_v62 = vadd.f32 %v3133_v44, %v3116_v3  ;;  %v3151_v29 = vpop.f32.mrf.mxu3 }
 0xb1d   : > { %v3152_v27 = vadd.f32 %v3151_v29, %v3134_v62 }
 0xb1e   : > { %v3120_v52 = vpop.f32.mrf.mxu1 }
 0xb1f   : > { %v3170_v51 = vadd.f32 %v3169_v0, %v3152_v27  ;;  %v3174_v2 = vpop.f32.mrf.mxu0  ;;  %v3121_v32 = vadd.f32 %v4335_v30, %v3120_v52 }
 0xb21   : > { %v3178_v23 = vadd.f32 %v3170_v51, %v5741_v20 }
 0xb22   : > { %v3135_v46 = vpop.f32.mrf.mxu2 }
 0xb23   : > { %3181 = vst [vmem:[#allocation2 + $0x10] sm:$0xff] %v3178_v23  ;;  %v3136_v5 = vadd.f32 %v3135_v46, %v3118_v8  ;;  %v3153_v35 = vpop.f32.mrf.mxu3 }
 0xb25   : > { %v3154_v11 = vadd.f32 %v3153_v35, %v3136_v5 }
 0xb26   : > { %v3122_v12 = vpop.f32.mrf.mxu1 }
 0xb27   : > { %v3172_v18 = vadd.f32 %v3171_v60, %v3154_v11  ;;  %v3176_v16 = vpop.f32.mrf.mxu0 }
 0xb29   : > { %v3179_v17 = vadd.f32 %v3172_v18, %v5744_v63 }
 0xb2a   : > { %v3138_v19 = vpop.f32.mrf.mxu2 }
 0xb2b   : > { %3182 = vst [vmem:[#allocation2] sm:$0xff] %v3179_v17  ;;  %v3139_v36 = vadd.f32 %v3138_v19, %v3121_v32  ;;  %v3156_v21 = vpop.f32.mrf.mxu3 }
 0xb2d   : > { %v3157_v24 = vadd.f32 %v3156_v21, %v3139_v36 }
 0xb2f   : > { %v3175_v1 = vadd.f32 %v3174_v2, %v3157_v24  ;;  %3187 = sbr.rel (%p4040_p8) target bundleno = 3151 (0xc4f), region = 144 }
 0xb31   : > { %v3180_v25 = vadd.f32 %v3175_v1, %v5747_v4 }
 0xb32   : > { %v3140_v20 = vpop.f32.mrf.mxu2 }
 0xb33   : > { %3183 = vst [vmem:[#allocation2 + $0x8] sm:$0xff] %v3180_v25  ;;  %v3158_v28 = vpop.f32.mrf.mxu3 }
 0xb34   : > { %3190 = vadd.xlane.f32.xlu0 %v3178_v23  ;;  %3194 = vadd.xlane.f32.xlu1 %v3180_v25  ;;  %v4441_v56 = vld [vmem:[%s6097_s0] ss:$0 sm:$0xff] }
 0xb3c   : > { %3192 = vadd.xlane.f32.xlu0 %v3179_v17 }
 0xba7   : > { %v3191_v6 = vpop.xlane.xlu0 %3190  ;;  %v3195_v43 = vpop.xlane.xlu1 %3194 }
 0xba8   : > { %v3196_v63 = vmul.f32 %v3191_v6, %v5343_v53  ;;  %v3198_v48 = vmul.f32 %v3195_v43, %v5343_v53 }
 0xbaa   : > { %v3199_v15 = vsub.f32 %v3178_v23, %v3196_v63  ;;  %v3201_v39 = vsub.f32 %v3180_v25, %v3198_v48 }
 0xbac   : > { %v3202_v10 = vmul.f32 %v3199_v15, %v3199_v15  ;;  %v3204_v13 = vmul.f32 %v3201_v39, %v3201_v39 }
 0xbae   : > { %3205 = vadd.xlane.f32.xlu1 %v3202_v10 }
 0xbaf   : > { %v3193_v50 = vpop.xlane.xlu0 %3192 }
 0xbb0   : > { %v3197_v45 = vmul.f32 %v3193_v50, %v5343_v53 }
 0xbb2   : > { %v3200_v4 = vsub.f32 %v3179_v17, %v3197_v45 }
 0xbb4   : > { %v3203_v9 = vmul.f32 %v3200_v4, %v3200_v4 }
 0xbb6   : > { %3207 = vadd.xlane.f32.xlu2 %v3203_v9 }
 0xbbe   : > { %3209 = vadd.xlane.f32.xlu2 %v3204_v13 }
 0xc21   : > { %v3206_v40 = vpop.xlane.xlu1 %3205 }
 0xc22   : > { %v3211_v22 = vmul.f32 %v3206_v40, %v5343_v53 }
 0xc24   : > { %v3214_v31 = vadd.f32 1e-06, %v3211_v22 }
 0xc26   : > { %4443 = vrsqrt.f32 %v3214_v31  ;;  %vm3223_vm8 = vweird.f32 %v3214_v31 }
 0xc29   : > { %v3208_v7 = vpop.xlane.xlu2 %3207 }
 0xc2a   : > { %v3212_v33 = vmul.f32 %v3208_v7, %v5343_v53 }
 0xc2c   : > { %v4444_v54 = vpop.eup %4443  ;;  %v3215_v14 = vadd.f32 1e-06, %v3212_v33 }
 0xc2d   : > { %v3218_v47 = vmul.f32 %v4444_v54, %v3214_v31  ;;  %vm3224_vm7 = vweird.f32 %v4444_v54 }
 0xc2e   : > { %4445 = vrsqrt.f32 %v3215_v14  ;;  %vm3225_vm9 = vmor %vm3223_vm8, %vm3224_vm7  ;;  %vm3233_vm11 = vweird.f32 %v3215_v14 }
 0xc2f   : > { %v3219_v37 = vmul.f32 %v4444_v54, %v3218_v47 }
 0xc31   : > { %v3220_v26 = vmul.f32 0.5, %v3219_v37  ;;  %v3210_v34 = vpop.xlane.xlu2 %3209 }
 0xc32   : > { %v3213_v42 = vmul.f32 %v3210_v34, %v5343_v53  ;;  %v4442_v53 = vld [vmem:[%s6098_s20] ss:$0 sm:$0xff] }
 0xc33   : > { %v3221_v55 = vsub.f32 1.5, %v3220_v26 }
 0xc34   : > { %v4446_v61 = vpop.eup %4445  ;;  %v3216_v49 = vadd.f32 1e-06, %v3213_v42 }
 0xc35   : > { %v3222_v57 = vmul.f32 %v4444_v54, %v3221_v55  ;;  %v3228_v38 = vmul.f32 %v4446_v61, %v3215_v14  ;;  %vm3234_vm14 = vweird.f32 %v4446_v61 }
 0xc36   : > { %4447 = vrsqrt.f32 %v3216_v49  ;;  %vm3235_vm12 = vmor %vm3233_vm11, %vm3234_vm14  ;;  %vm3243_vm10 = vweird.f32 %v3216_v49 }
 0xc37   : > { %v3226_v58 = vsel %vm3225_vm9, %v4444_v54, %v3222_v57  ;;  %v3229_v41 = vmul.f32 %v4446_v61, %v3228_v38 }
 0xc38   : > { %v3247_v0 = vmul.f32 %v3226_v58, %v3199_v15 }
 0xc39   : > { %v3230_v30 = vmul.f32 0.5, %v3229_v41 }
 0xc3a   : > { %v3253_v59 = vmul.f32 %v4441_v56, %v3247_v0 }
 0xc3b   : > { %v3231_v60 = vsub.f32 1.5, %v3230_v30 }
 0xc3c   : > { %v4448_v3 = vpop.eup %4447  ;;  %v3259_v44 = vadd.f32 %v4442_v53, %v3253_v59 }
 0xc3d   : > { %v3232_v62 = vmul.f32 %v4446_v61, %v3231_v60  ;;  %v3238_v29 = vmul.f32 %v4448_v3, %v3216_v49  ;;  %vm3244_vm15 = vweird.f32 %v4448_v3 }
 0xc3e   : > { %3262 = vst [vmem:[#allocation23] sm:$0xff] %v3259_v44  ;;  %vm3245_vm0 = vmor %vm3243_vm10, %vm3244_vm15 }
 0xc3f   : > { %v3236_v27 = vsel %vm3235_vm12, %v4446_v61, %v3232_v62  ;;  %v3239_v52 = vmul.f32 %v4448_v3, %v3238_v29 }
 0xc40   : > { %v3248_v51 = vmul.f32 %v3236_v27, %v3200_v4 }
 0xc41   : > { %v3240_v2 = vmul.f32 0.5, %v3239_v52 }
 0xc42   : > { %v3254_v8 = vmul.f32 %v4441_v56, %v3248_v51 }
 0xc43   : > { %v3241_v23 = vsub.f32 1.5, %v3240_v2 }
 0xc44   : > { %v3260_v46 = vadd.f32 %v4442_v53, %v3254_v8 }
 0xc45   : > { %v3242_v5 = vmul.f32 %v4448_v3, %v3241_v23 }
 0xc46   : > { %3263 = vst [vmem:[#allocation23 + $0x8] sm:$0xff] %v3260_v46 }
 0xc47   : > { %v3246_v35 = vsel %vm3245_vm0, %v4448_v3, %v3242_v5 }
 0xc48   : > { %v3249_v11 = vmul.f32 %v3246_v35, %v3201_v39 }
 0xc4a   : > { %v3255_v12 = vmul.f32 %v4441_v56, %v3249_v11 }
 0xc4c   : > { %v3261_v18 = vadd.f32 %v4442_v53, %v3255_v12 }
 0xc4e   : > { %3264 = vst [vmem:[#allocation23 + $0x10] sm:$0xff] %v3261_v18 }
 0xc4f PF: > { %s6099_s12 = sld [smem:[#allocation34_spill]]  ;;  %s4916_s18 = smov [#allocation23]  }
 0xc50   : > { %s3270_s23 = sshll.u32 %s4916_s18, 4  ;;  %s6100_s29 = sld [smem:[#allocation48_spill]]  ;;  %s3271_s23 = int_to_ptr.vmem [resolvable:$true] %s3270_s23 }
 0xc51   : > { %s4917_s4 = smov 128   ;;  %s4918_s17 = smov 8  }
 0xc55   : > { %p4263_p9 = scmp.eq.s32.totalorder %s6099_s12, 1 }
 0xc56   : > { %s3272_s26 = sshll.u32 %s6100_s29, 4  ;;  %s3273_s26 = int_to_ptr.hbm [resolvable:$true] %s3272_s26 }
 0xc57   : > { %4215 = dma.vmem_to_hbm [thread:$0]  (%p4263_p9), %s3271_s23, 384, %s3273_s26, [#allocation5], %s4917_s4, %s4917_s4, %s4918_s17  }
 0xc58   : > { %4882 = dma.done.wait (%p4263_p9), [#allocation5], 384  }
 0xc59   : > { %4884 = vsyncadd (%p4263_p9), [#allocation5], 4294966912 }
 0xc5a PF: > { %s6101_s27 = sld [smem:[#allocation35_spill]] }
 0xc5b   : > { %s6102_s24 = sld [smem:[#allocation32_spill]] }
 0xc5c   : > { %s6103_s25 = sld [smem:[#allocation33_spill]] }
 0xc5d   : > { %s6104_s26 = sld [smem:[#allocation36_spill]] }
 0xc60   : > { %p42_p10 = scmp.ge.s32.totalorder %s6101_s27, 4  }
 0xc62   :  { %44 = sbr.rel (!%p42_p10) target bundleno = 25 (0x19), region = 251 }
 0xc67   :  { %3289 = vsyncpa [#allocation4], 1 }
 0xc68   :  { %3291 = vsyncpa [#allocation4 + $0x1], 1 }
 0xc69   :  { %3292 = vsyncpa [#allocation7], 1 }
 0xc6a   :  { %3293 = vsyncpa [#allocation10], 1 }
 0xc6b   :  { %3295 = vsyncpa [#allocation10 + $0x1], 1 }
 0xc6c   :  { %3296 = vsyncpa [#allocation13], 1 }
 0xc6d   :  { %3298 = vsyncpa [#allocation13 + $0x1], 1 }
 0xc6e   :  { %3299 = vsyncpa [#allocation16], 1 }
 0xc6f   :  { %3301 = vsyncpa [#allocation16 + $0x1], 1 }
 0xc70   :  { %3302 = vsyncpa [#allocation19], 1 }
 0xc71   :  { %3304 = vsyncpa [#allocation19 + $0x1], 1 }
 0xc72   :  { %3305 = vsyncpa [#allocation22], 1 }
 0xc73   :  { %3307 = vsyncpa [#allocation22 + $0x1], 1 }
 0xc74   :  { %3308 = vsyncpa [#allocation5], 1 }
 0xc75   :  { %3310 = vsyncpa [#allocation5 + $0x1], 1 }

</bundles_post_ra>
